<compile_context>
chip_gen: v7x
topology: tpu7x:2x2x1
jax: 0.10.0
libtpu: 0.0.40
codegen_flags: <defaults>
</compile_context>

<pallas_src>
import numpy as np
import jax
import jax.numpy as jnp
from jax.experimental import pallas as pl
from jax.experimental.pallas import tpu as pltpu

F32 = jnp.float32
PREC = jax.lax.Precision.HIGHEST
DOUT_PAD = 128  # lane-dense fc output width (sliced to 10 on the host)


# ----------------------------- Pallas kernels -----------------------------

def conv_stage_kernel(patches_ref, w1_ref, b1_ref, w2_ref, b2_ref, out_ref,
                      p_scr, pt_scr, r_scr):
    """Fused conv1+ReLU+pool -> (in-kernel im2col) conv2+ReLU+pool for one
    batch chunk.

    patches_ref: (1, 4, 25, Lc)  phase-ordered conv1 im2col patches
                 (Lc = Bc*144, column = b_local*144 + r*12 + c)
    w1_ref: (10, 25)   b1_ref: (10, 1)
    w2_ref: (20, 250)  b2_ref: (20, 1)   (w2 columns ordered tap-major)
    out_ref: (1, 20, Lc)  max-over-2x2-window map; pooled values sit at the
                          even (row, col) anchors of each 12x12 frame.
    p_scr:  (10, Lc+64)  pooled conv1 map (zero padded tail)
    pt_scr: (250, Lc)    in-kernel im2col matrix for conv2
    r_scr:  (20, Lc+16)  relu(conv2) map (zero padded tail)
    """
    Lc = out_ref.shape[-1]

    # ---- conv1 as GEMM over phase-ordered patches, pool via max over phases.
    s = jnp.dot(w1_ref[...], patches_ref[0, 0],
                preferred_element_type=F32, precision=PREC)            # (10, Lc)
    for k in range(1, 4):
        s = jnp.maximum(
            s, jnp.dot(w1_ref[...], patches_ref[0, k],
                       preferred_element_type=F32, precision=PREC))
    p_scr[...] = jnp.zeros_like(p_scr)                                 # zero pad tail
    p_scr[:, :Lc] = jnp.maximum(s + b1_ref[...], 0.0)                  # bias + ReLU (== pool(relu(conv+b)))

    # ---- conv2: im2col via 25 shifted lane-slices of pooled1, one GEMM.
    for di in range(5):
        for dj in range(5):
            t = di * 5 + dj
            off = di * 12 + dj
            pt_scr[t * 10:(t + 1) * 10, :] = p_scr[:, off:off + Lc]
    c2 = jnp.dot(w2_ref[...], pt_scr[...],
                 preferred_element_type=F32, precision=PREC)           # (20, Lc)
    r_scr[...] = jnp.zeros_like(r_scr)
    r_scr[:, :Lc] = jnp.maximum(c2 + b2_ref[...], 0.0)                 # bias + ReLU

    # ---- 2x2 max-pool of conv2 via window-offset maxima (offsets 0,1,12,13).
    m = r_scr[:, 0:Lc]
    for off in (1, 12, 13):
        m = jnp.maximum(m, r_scr[:, off:off + Lc])
    out_ref[0] = m


def fc_stage_kernel(x_ref, w1_ref, b1_ref, w2_ref, b2_ref, out_ref):
    """Fused Linear(320->50) -> Linear(50->128 zero-padded), no activation."""
    h = jnp.dot(x_ref[0], w1_ref[...],
                preferred_element_type=F32, precision=PREC) + b1_ref[...]
    out_ref[0] = jnp.dot(h, w2_ref[...],
                         preferred_element_type=F32, precision=PREC) + b2_ref[...]


# ----------------------------- Pallas wrappers -----------------------------

def conv_stage(patches, w1_mat, b1_col, w2_mat, b2_col):
    n_chunks, nph, k1, lc = patches.shape
    cout1, cout2, k2 = w1_mat.shape[0], w2_mat.shape[0], w2_mat.shape[1]
    cost = pl.CostEstimate(
        flops=int(2 * n_chunks * lc * (nph * cout1 * k1 + cout2 * k2)),
        transcendentals=0,
        bytes_accessed=int(4 * (patches.size + w1_mat.size + b1_col.size
                                + w2_mat.size + b2_col.size
                                + n_chunks * cout2 * lc)))
    return pl.pallas_call(
        conv_stage_kernel,
        out_shape=jax.ShapeDtypeStruct((n_chunks, cout2, lc), F32),
        grid=(n_chunks,),
        in_specs=[
            pl.BlockSpec((1, nph, k1, lc), lambda i: (i, 0, 0, 0)),
            pl.BlockSpec((cout1, k1), lambda i: (0, 0)),
            pl.BlockSpec((cout1, 1), lambda i: (0, 0)),
            pl.BlockSpec((cout2, k2), lambda i: (0, 0)),
            pl.BlockSpec((cout2, 1), lambda i: (0, 0)),
        ],
        out_specs=pl.BlockSpec((1, cout2, lc), lambda i: (i, 0, 0)),
        scratch_shapes=[
            pltpu.VMEM((cout1, lc + 64), F32),
            pltpu.VMEM((k2, lc), F32),
            pltpu.VMEM((cout2, lc + 16), F32),
        ],
        compiler_params=pltpu.CompilerParams(dimension_semantics=("parallel",)),
        cost_estimate=cost,
    )(patches, w1_mat, b1_col, w2_mat, b2_col)


def fc_stage(xf, w1, b1, w2p, b2p):
    n_chunks, bc, d_in = xf.shape
    h = w1.shape[1]
    d_out = w2p.shape[1]
    cost = pl.CostEstimate(
        flops=int(2 * n_chunks * bc * (d_in * h + h * d_out)),
        transcendentals=0,
        bytes_accessed=int(4 * (xf.size + w1.size + b1.size + w2p.size
                                + b2p.size + n_chunks * bc * d_out)))
    return pl.pallas_call(
        fc_stage_kernel,
        out_shape=jax.ShapeDtypeStruct((n_chunks, bc, d_out), F32),
        grid=(n_chunks,),
        in_specs=[
            pl.BlockSpec((1, bc, d_in), lambda i: (i, 0, 0)),
            pl.BlockSpec((d_in, h), lambda i: (0, 0)),
            pl.BlockSpec((1, h), lambda i: (0, 0)),
            pl.BlockSpec((h, d_out), lambda i: (0, 0)),
            pl.BlockSpec((1, d_out), lambda i: (0, 0)),
        ],
        out_specs=pl.BlockSpec((1, bc, d_out), lambda i: (i, 0, 0)),
        compiler_params=pltpu.CompilerParams(dimension_semantics=("parallel",)),
        cost_estimate=cost,
    )(xf, w1, b1, w2p, b2p)


# ----------------------------- host-side glue (layout only) -----------------------------

def _pick_chunk(batch):
    """Largest chunk size (<=16) dividing batch that still gives >=2 chunks."""
    if batch <= 1:
        return 1
    best = 1
    for c in range(1, min(batch, 16) + 1):
        if batch % c == 0 and (batch // c) >= 2:
            best = c
    return best


def build_patches1(x, bc):
    """x (B,1,28,28) -> phase-ordered conv1 im2col patches (n_chunks, 4, 25, bc*144).

    patches[n, k, di*5+dj, b_local*144 + r*12 + c] = x[b, 0, 2r + k//2 + di, 2c + k%2 + dj]
    """
    batch = x.shape[0]
    xs = x[:, 0]                                            # (B, 28, 28)
    phases = []
    for a in range(2):
        for b2 in range(2):
            taps = []
            for di in range(5):
                for dj in range(5):
                    sl = xs[:, a + di:a + di + 24:2, b2 + dj:b2 + dj + 24:2]  # (B,12,12)
                    taps.append(sl.reshape(batch, 144))
            phases.append(jnp.stack(taps, axis=1))          # (B, 25, 144)
    patches = jnp.stack(phases, axis=1)                     # (B, 4, 25, 144)
    n_chunks = batch // bc
    patches = patches.reshape(n_chunks, bc, 4, 25, 144)
    patches = jnp.moveaxis(patches, 1, 3)                   # (n_chunks, 4, 25, bc, 144)
    return patches.reshape(n_chunks, 4, 25, bc * 144)


def init_params(key):
    """Deterministic init, PyTorch-shaped tensors (Conv2d OIHW, Linear (out, in))."""
    ks = jax.random.split(key, 8)

    def u(k, shape, fan_in):
        bound = 1.0 / np.sqrt(fan_in)
        return jax.random.uniform(k, shape, F32, minval=-bound, maxval=bound)

    return {
        "w1": u(ks[0], (10, 1, 5, 5), 25),
        "b1": u(ks[1], (10,), 25),
        "w2": u(ks[2], (20, 10, 5, 5), 250),
        "b2": u(ks[3], (20,), 250),
        "fc1_w": u(ks[4], (50, 320), 320),
        "fc1_b": u(ks[5], (50,), 320),
        "fc2_w": u(ks[6], (10, 50), 50),
        "fc2_b": u(ks[7], (10,), 50),
    }


def net_forward(x, params):
    """Pallas implementation of Net.forward for x: (B, 1, 28, 28) float32."""
    batch = x.shape[0]
    bc = _pick_chunk(batch)
    n_chunks = batch // bc
    lc = bc * 144

    # ---- conv stage (single fused kernel over batch chunks) ----
    patches1 = build_patches1(x, bc)                                  # (n_chunks, 4, 25, lc)
    w1_mat = params["w1"].reshape(10, 25)
    b1_col = params["b1"].reshape(10, 1)
    w2_mat = jnp.transpose(params["w2"], (0, 2, 3, 1)).reshape(20, 250)   # tap-major columns
    b2_col = params["b2"].reshape(20, 1)
    m = conv_stage(patches1, w1_mat, b1_col, w2_mat, b2_col)          # (n_chunks, 20, lc)

    # extract pool2 anchors (even rows/cols of the 12x12 frame) and pivot to (B, 320)
    m5 = m.reshape(n_chunks, 20, bc, 12, 12)[:, :, :, 0:8:2, 0:8:2]   # (n_chunks, 20, bc, 4, 4)
    xf = jnp.transpose(m5, (0, 2, 1, 3, 4)).reshape(n_chunks, bc, 320)

    # ---- fc stage (lane-dense, zero-padded to 128 outputs) ----
    fc1_wT = params["fc1_w"].T                                        # (320, 50)
    fc1_b = params["fc1_b"].reshape(1, 50)
    fc2_wp = jnp.zeros((50, DOUT_PAD), F32).at[:, :10].set(params["fc2_w"].T)
    fc2_bp = jnp.zeros((1, DOUT_PAD), F32).at[:, :10].set(params["fc2_b"].reshape(1, 10))
    y = fc_stage(xf, fc1_wT, fc1_b, fc2_wp, fc2_bp)                   # (n_chunks, bc, 128)
    return y.reshape(batch, DOUT_PAD)[:, :10]


# ----------------------------- pure-JAX reference -----------------------------

def reference_forward(x, params):
    def conv2d(y, w, b):
        out = jax.lax.conv_general_dilated(
            y, w, (1, 1), "VALID",
            dimension_numbers=("NCHW", "OIHW", "NCHW"), precision=PREC)
        return out + b[None, :, None, None]

    def maxpool2(y):
        return jax.lax.reduce_window(y, -jnp.inf, jax.lax.max,
                                     (1, 1, 2, 2), (1, 1, 2, 2), "VALID")

    y = maxpool2(jnp.maximum(conv2d(x, params["w1"], params["b1"]), 0.0))
    y = maxpool2(jnp.maximum(conv2d(y, params["w2"], params["b2"]), 0.0))
    y = y.reshape(x.shape[0], -1)
    y = jnp.dot(y, params["fc1_w"].T, precision=PREC) + params["fc1_b"]
    y = jnp.dot(y, params["fc2_w"].T, precision=PREC) + params["fc2_b"]
    return y


if __name__ == "__main__":
    key = jax.random.PRNGKey(0)
    pkey, xkey = jax.random.split(key)
    params = init_params(pkey)
    # 28x28 input is forced by the 320-dim flatten in the module; batch kept small.
    x = jax.random.normal(xkey, (2, 1, 28, 28), F32)

    fwd = jax.jit(net_forward)
    out = jax.block_until_ready(fwd(x, params))

    ref = reference_forward(x, params)
    assert out.shape == (2, 10), out.shape
    if not np.allclose(np.asarray(out), np.asarray(ref), rtol=1e-3, atol=1e-3):
        err = float(np.max(np.abs(np.asarray(out) - np.asarray(ref))))
        raise AssertionError(f"Pallas output mismatch vs reference, max abs err = {err}")
    print("KERNEL_OK")
</pallas_src>

<mosaic_0001>
module attributes {stable_mosaic.version = 11 : i64} {
  func.func @conv_stage_kernel(%arg0: i32, %arg1: memref<1x4x25x144xf32, #tpu.memory_space<vmem>>, %arg2: memref<10x25xf32, #tpu.memory_space<vmem>>, %arg3: memref<10x1xf32, #tpu.memory_space<vmem>>, %arg4: memref<20x250xf32, #tpu.memory_space<vmem>>, %arg5: memref<20x1xf32, #tpu.memory_space<vmem>>, %arg6: memref<1x20x144xf32, #tpu.memory_space<vmem>>, %arg7: memref<10x208xf32, #tpu.memory_space<vmem>>, %arg8: memref<250x144xf32, #tpu.memory_space<vmem>>, %arg9: memref<20x160xf32, #tpu.memory_space<vmem>>) attributes {dimension_semantics = [#tpu.dimension_semantics<parallel>], iteration_bounds = array<i64: 2>, scalar_prefetch = 0 : i64, scratch_operands = 3 : i64, tpu.core_type = #tpu.core_type<tc>, window_params = [{transform_indices = @transform_0, window_bounds = array<i64: 1, 4, 25, 144>}, {pipeline_mode = #tpu.pipeline_mode<synchronous>, transform_indices = @transform_1, window_bounds = array<i64: 10, 25>}, {pipeline_mode = #tpu.pipeline_mode<synchronous>, transform_indices = @transform_2, window_bounds = array<i64: 10, 1>}, {pipeline_mode = #tpu.pipeline_mode<synchronous>, transform_indices = @transform_3, window_bounds = array<i64: 20, 250>}, {pipeline_mode = #tpu.pipeline_mode<synchronous>, transform_indices = @transform_4, window_bounds = array<i64: 20, 1>}, {transform_indices = @transform_5, window_bounds = array<i64: 1, 20, 144>}]} {
    %c0 = arith.constant 0 : index
    %c0_0 = arith.constant 0 : index
    %0 = vector.load %arg2[%c0, %c0_0] : memref<10x25xf32, #tpu.memory_space<vmem>>, vector<10x25xf32>
    %c0_1 = arith.constant 0 : index
    %c0_2 = arith.constant 0 : index
    %c0_3 = arith.constant 0 : index
    %c0_4 = arith.constant 0 : index
    %1 = vector.load %arg1[%c0_1, %c0_2, %c0_3, %c0_4] : memref<1x4x25x144xf32, #tpu.memory_space<vmem>>, vector<1x1x25x144xf32>
    %2 = vector.shape_cast %1 : vector<1x1x25x144xf32> to vector<25x144xf32>
    %cst = arith.constant dense<0.000000e+00> : vector<10x144xf32>
    %3 = tpu.matmul %0, %2, %cst {dimension_numbers = #tpu.dot_dimension_numbers<[1], [0], [0], [1], [0, 0, 1, 1], [], []>, precision = #tpu.contract_precision<fp32>} : vector<10x25xf32>, vector<25x144xf32>, vector<10x144xf32> -> vector<10x144xf32>
    %c0_5 = arith.constant 0 : index
    %c0_6 = arith.constant 0 : index
    %4 = vector.load %arg2[%c0_5, %c0_6] : memref<10x25xf32, #tpu.memory_space<vmem>>, vector<10x25xf32>
    %c0_7 = arith.constant 0 : index
    %c1 = arith.constant 1 : index
    %c0_8 = arith.constant 0 : index
    %c0_9 = arith.constant 0 : index
    %5 = vector.load %arg1[%c0_7, %c1, %c0_8, %c0_9] : memref<1x4x25x144xf32, #tpu.memory_space<vmem>>, vector<1x1x25x144xf32>
    %6 = vector.shape_cast %5 : vector<1x1x25x144xf32> to vector<25x144xf32>
    %cst_10 = arith.constant dense<0.000000e+00> : vector<10x144xf32>
    %7 = tpu.matmul %4, %6, %cst_10 {dimension_numbers = #tpu.dot_dimension_numbers<[1], [0], [0], [1], [0, 0, 1, 1], [], []>, precision = #tpu.contract_precision<fp32>} : vector<10x25xf32>, vector<25x144xf32>, vector<10x144xf32> -> vector<10x144xf32>
    %8 = arith.maximumf %3, %7 : vector<10x144xf32>
    %c0_11 = arith.constant 0 : index
    %c0_12 = arith.constant 0 : index
    %9 = vector.load %arg2[%c0_11, %c0_12] : memref<10x25xf32, #tpu.memory_space<vmem>>, vector<10x25xf32>
    %c0_13 = arith.constant 0 : index
    %c2 = arith.constant 2 : index
    %c0_14 = arith.constant 0 : index
    %c0_15 = arith.constant 0 : index
    %10 = vector.load %arg1[%c0_13, %c2, %c0_14, %c0_15] : memref<1x4x25x144xf32, #tpu.memory_space<vmem>>, vector<1x1x25x144xf32>
    %11 = vector.shape_cast %10 : vector<1x1x25x144xf32> to vector<25x144xf32>
    %cst_16 = arith.constant dense<0.000000e+00> : vector<10x144xf32>
    %12 = tpu.matmul %9, %11, %cst_16 {dimension_numbers = #tpu.dot_dimension_numbers<[1], [0], [0], [1], [0, 0, 1, 1], [], []>, precision = #tpu.contract_precision<fp32>} : vector<10x25xf32>, vector<25x144xf32>, vector<10x144xf32> -> vector<10x144xf32>
    %13 = arith.maximumf %8, %12 : vector<10x144xf32>
    %c0_17 = arith.constant 0 : index
    %c0_18 = arith.constant 0 : index
    %14 = vector.load %arg2[%c0_17, %c0_18] : memref<10x25xf32, #tpu.memory_space<vmem>>, vector<10x25xf32>
    %c0_19 = arith.constant 0 : index
    %c3 = arith.constant 3 : index
    %c0_20 = arith.constant 0 : index
    %c0_21 = arith.constant 0 : index
    %15 = vector.load %arg1[%c0_19, %c3, %c0_20, %c0_21] : memref<1x4x25x144xf32, #tpu.memory_space<vmem>>, vector<1x1x25x144xf32>
    %16 = vector.shape_cast %15 : vector<1x1x25x144xf32> to vector<25x144xf32>
    %cst_22 = arith.constant dense<0.000000e+00> : vector<10x144xf32>
    %17 = tpu.matmul %14, %16, %cst_22 {dimension_numbers = #tpu.dot_dimension_numbers<[1], [0], [0], [1], [0, 0, 1, 1], [], []>, precision = #tpu.contract_precision<fp32>} : vector<10x25xf32>, vector<25x144xf32>, vector<10x144xf32> -> vector<10x144xf32>
    %18 = arith.maximumf %13, %17 : vector<10x144xf32>
    %cst_23 = arith.constant 0.000000e+00 : f32
    %19 = vector.broadcast %cst_23 : f32 to vector<10x208xf32>
    %c0_24 = arith.constant 0 : index
    %c0_25 = arith.constant 0 : index
    %20 = vector.load %arg7[%c0_24, %c0_25] : memref<10x208xf32, #tpu.memory_space<vmem>>, vector<10x208xf32>
    tpu.vector_store %arg7[%c0_24, %c0_25], %19 {strides = array<i32>} : memref<10x208xf32, #tpu.memory_space<vmem>>, vector<10x208xf32>,
    %c0_26 = arith.constant 0 : index
    %c0_27 = arith.constant 0 : index
    %21 = vector.load %arg3[%c0_26, %c0_27] : memref<10x1xf32, #tpu.memory_space<vmem>>, vector<10x1xf32>
    %22 = vector.broadcast %21 : vector<10x1xf32> to vector<10x144xf32>
    %23 = arith.addf %18, %22 : vector<10x144xf32>
    %cst_28 = arith.constant 0.000000e+00 : f32
    %24 = vector.broadcast %cst_28 : f32 to vector<10x144xf32>
    %25 = arith.maximumf %23, %24 : vector<10x144xf32>
    %c0_29 = arith.constant 0 : index
    %c0_30 = arith.constant 0 : index
    %26 = vector.load %arg7[%c0_29, %c0_30] : memref<10x208xf32, #tpu.memory_space<vmem>>, vector<10x144xf32>
    tpu.vector_store %arg7[%c0_29, %c0_30], %25 {strides = array<i32>} : memref<10x208xf32, #tpu.memory_space<vmem>>, vector<10x144xf32>,
    %c0_31 = arith.constant 0 : index
    %c0_32 = arith.constant 0 : index
    %27 = vector.load %arg7[%c0_31, %c0_32] : memref<10x208xf32, #tpu.memory_space<vmem>>, vector<10x144xf32>
    %c0_33 = arith.constant 0 : index
    %c0_34 = arith.constant 0 : index
    %28 = vector.load %arg8[%c0_33, %c0_34] : memref<250x144xf32, #tpu.memory_space<vmem>>, vector<10x144xf32>
    tpu.vector_store %arg8[%c0_33, %c0_34], %27 {strides = array<i32>} : memref<250x144xf32, #tpu.memory_space<vmem>>, vector<10x144xf32>,
    %c0_35 = arith.constant 0 : index
    %c1_36 = arith.constant 1 : index
    %29 = vector.load %arg7[%c0_35, %c1_36] : memref<10x208xf32, #tpu.memory_space<vmem>>, vector<10x144xf32>
    %c10 = arith.constant 10 : index
    %c0_37 = arith.constant 0 : index
    %30 = vector.load %arg8[%c10, %c0_37] : memref<250x144xf32, #tpu.memory_space<vmem>>, vector<10x144xf32>
    tpu.vector_store %arg8[%c10, %c0_37], %29 {strides = array<i32>} : memref<250x144xf32, #tpu.memory_space<vmem>>, vector<10x144xf32>,
    %c0_38 = arith.constant 0 : index
    %c2_39 = arith.constant 2 : index
    %31 = vector.load %arg7[%c0_38, %c2_39] : memref<10x208xf32, #tpu.memory_space<vmem>>, vector<10x144xf32>
    %c20 = arith.constant 20 : index
    %c0_40 = arith.constant 0 : index
    %32 = vector.load %arg8[%c20, %c0_40] : memref<250x144xf32, #tpu.memory_space<vmem>>, vector<10x144xf32>
    tpu.vector_store %arg8[%c20, %c0_40], %31 {strides = array<i32>} : memref<250x144xf32, #tpu.memory_space<vmem>>, vector<10x144xf32>,
    %c0_41 = arith.constant 0 : index
    %c3_42 = arith.constant 3 : index
    %33 = vector.load %arg7[%c0_41, %c3_42] : memref<10x208xf32, #tpu.memory_space<vmem>>, vector<10x144xf32>
    %c30 = arith.constant 30 : index
    %c0_43 = arith.constant 0 : index
    %34 = vector.load %arg8[%c30, %c0_43] : memref<250x144xf32, #tpu.memory_space<vmem>>, vector<10x144xf32>
    tpu.vector_store %arg8[%c30, %c0_43], %33 {strides = array<i32>} : memref<250x144xf32, #tpu.memory_space<vmem>>, vector<10x144xf32>,
    %c0_44 = arith.constant 0 : index
    %c4 = arith.constant 4 : index
    %35 = vector.load %arg7[%c0_44, %c4] : memref<10x208xf32, #tpu.memory_space<vmem>>, vector<10x144xf32>
    %c40 = arith.constant 40 : index
    %c0_45 = arith.constant 0 : index
    %36 = vector.load %arg8[%c40, %c0_45] : memref<250x144xf32, #tpu.memory_space<vmem>>, vector<10x144xf32>
    tpu.vector_store %arg8[%c40, %c0_45], %35 {strides = array<i32>} : memref<250x144xf32, #tpu.memory_space<vmem>>, vector<10x144xf32>,
    %c0_46 = arith.constant 0 : index
    %c12 = arith.constant 12 : index
    %37 = vector.load %arg7[%c0_46, %c12] : memref<10x208xf32, #tpu.memory_space<vmem>>, vector<10x144xf32>
    %c50 = arith.constant 50 : index
    %c0_47 = arith.constant 0 : index
    %38 = vector.load %arg8[%c50, %c0_47] : memref<250x144xf32, #tpu.memory_space<vmem>>, vector<10x144xf32>
    tpu.vector_store %arg8[%c50, %c0_47], %37 {strides = array<i32>} : memref<250x144xf32, #tpu.memory_space<vmem>>, vector<10x144xf32>,
    %c0_48 = arith.constant 0 : index
    %c13 = arith.constant 13 : index
    %39 = vector.load %arg7[%c0_48, %c13] : memref<10x208xf32, #tpu.memory_space<vmem>>, vector<10x144xf32>
    %c60 = arith.constant 60 : index
    %c0_49 = arith.constant 0 : index
    %40 = vector.load %arg8[%c60, %c0_49] : memref<250x144xf32, #tpu.memory_space<vmem>>, vector<10x144xf32>
    tpu.vector_store %arg8[%c60, %c0_49], %39 {strides = array<i32>} : memref<250x144xf32, #tpu.memory_space<vmem>>, vector<10x144xf32>,
    %c0_50 = arith.constant 0 : index
    %c14 = arith.constant 14 : index
    %41 = vector.load %arg7[%c0_50, %c14] : memref<10x208xf32, #tpu.memory_space<vmem>>, vector<10x144xf32>
    %c70 = arith.constant 70 : index
    %c0_51 = arith.constant 0 : index
    %42 = vector.load %arg8[%c70, %c0_51] : memref<250x144xf32, #tpu.memory_space<vmem>>, vector<10x144xf32>
    tpu.vector_store %arg8[%c70, %c0_51], %41 {strides = array<i32>} : memref<250x144xf32, #tpu.memory_space<vmem>>, vector<10x144xf32>,
    %c0_52 = arith.constant 0 : index
    %c15 = arith.constant 15 : index
    %43 = vector.load %arg7[%c0_52, %c15] : memref<10x208xf32, #tpu.memory_space<vmem>>, vector<10x144xf32>
    %c80 = arith.constant 80 : index
    %c0_53 = arith.constant 0 : index
    %44 = vector.load %arg8[%c80, %c0_53] : memref<250x144xf32, #tpu.memory_space<vmem>>, vector<10x144xf32>
    tpu.vector_store %arg8[%c80, %c0_53], %43 {strides = array<i32>} : memref<250x144xf32, #tpu.memory_space<vmem>>, vector<10x144xf32>,
    %c0_54 = arith.constant 0 : index
    %c16 = arith.constant 16 : index
    %45 = vector.load %arg7[%c0_54, %c16] : memref<10x208xf32, #tpu.memory_space<vmem>>, vector<10x144xf32>
    %c90 = arith.constant 90 : index
    %c0_55 = arith.constant 0 : index
    %46 = vector.load %arg8[%c90, %c0_55] : memref<250x144xf32, #tpu.memory_space<vmem>>, vector<10x144xf32>
    tpu.vector_store %arg8[%c90, %c0_55], %45 {strides = array<i32>} : memref<250x144xf32, #tpu.memory_space<vmem>>, vector<10x144xf32>,
    %c0_56 = arith.constant 0 : index
    %c24 = arith.constant 24 : index
    %47 = vector.load %arg7[%c0_56, %c24] : memref<10x208xf32, #tpu.memory_space<vmem>>, vector<10x144xf32>
    %c100 = arith.constant 100 : index
    %c0_57 = arith.constant 0 : index
    %48 = vector.load %arg8[%c100, %c0_57] : memref<250x144xf32, #tpu.memory_space<vmem>>, vector<10x144xf32>
    tpu.vector_store %arg8[%c100, %c0_57], %47 {strides = array<i32>} : memref<250x144xf32, #tpu.memory_space<vmem>>, vector<10x144xf32>,
    %c0_58 = arith.constant 0 : index
    %c25 = arith.constant 25 : index
    %49 = vector.load %arg7[%c0_58, %c25] : memref<10x208xf32, #tpu.memory_space<vmem>>, vector<10x144xf32>
    %c110 = arith.constant 110 : index
    %c0_59 = arith.constant 0 : index
    %50 = vector.load %arg8[%c110, %c0_59] : memref<250x144xf32, #tpu.memory_space<vmem>>, vector<10x144xf32>
    tpu.vector_store %arg8[%c110, %c0_59], %49 {strides = array<i32>} : memref<250x144xf32, #tpu.memory_space<vmem>>, vector<10x144xf32>,
    %c0_60 = arith.constant 0 : index
    %c26 = arith.constant 26 : index
    %51 = vector.load %arg7[%c0_60, %c26] : memref<10x208xf32, #tpu.memory_space<vmem>>, vector<10x144xf32>
    %c120 = arith.constant 120 : index
    %c0_61 = arith.constant 0 : index
    %52 = vector.load %arg8[%c120, %c0_61] : memref<250x144xf32, #tpu.memory_space<vmem>>, vector<10x144xf32>
    tpu.vector_store %arg8[%c120, %c0_61], %51 {strides = array<i32>} : memref<250x144xf32, #tpu.memory_space<vmem>>, vector<10x144xf32>,
    %c0_62 = arith.constant 0 : index
    %c27 = arith.constant 27 : index
    %53 = vector.load %arg7[%c0_62, %c27] : memref<10x208xf32, #tpu.memory_space<vmem>>, vector<10x144xf32>
    %c130 = arith.constant 130 : index
    %c0_63 = arith.constant 0 : index
    %54 = vector.load %arg8[%c130, %c0_63] : memref<250x144xf32, #tpu.memory_space<vmem>>, vector<10x144xf32>
    tpu.vector_store %arg8[%c130, %c0_63], %53 {strides = array<i32>} : memref<250x144xf32, #tpu.memory_space<vmem>>, vector<10x144xf32>,
    %c0_64 = arith.constant 0 : index
    %c28 = arith.constant 28 : index
    %55 = vector.load %arg7[%c0_64, %c28] : memref<10x208xf32, #tpu.memory_space<vmem>>, vector<10x144xf32>
    %c140 = arith.constant 140 : index
    %c0_65 = arith.constant 0 : index
    %56 = vector.load %arg8[%c140, %c0_65] : memref<250x144xf32, #tpu.memory_space<vmem>>, vector<10x144xf32>
    tpu.vector_store %arg8[%c140, %c0_65], %55 {strides = array<i32>} : memref<250x144xf32, #tpu.memory_space<vmem>>, vector<10x144xf32>,
    %c0_66 = arith.constant 0 : index
    %c36 = arith.constant 36 : index
    %57 = vector.load %arg7[%c0_66, %c36] : memref<10x208xf32, #tpu.memory_space<vmem>>, vector<10x144xf32>
    %c150 = arith.constant 150 : index
    %c0_67 = arith.constant 0 : index
    %58 = vector.load %arg8[%c150, %c0_67] : memref<250x144xf32, #tpu.memory_space<vmem>>, vector<10x144xf32>
    tpu.vector_store %arg8[%c150, %c0_67], %57 {strides = array<i32>} : memref<250x144xf32, #tpu.memory_space<vmem>>, vector<10x144xf32>,
    %c0_68 = arith.constant 0 : index
    %c37 = arith.constant 37 : index
    %59 = vector.load %arg7[%c0_68, %c37] : memref<10x208xf32, #tpu.memory_space<vmem>>, vector<10x144xf32>
    %c160 = arith.constant 160 : index
    %c0_69 = arith.constant 0 : index
    %60 = vector.load %arg8[%c160, %c0_69] : memref<250x144xf32, #tpu.memory_space<vmem>>, vector<10x144xf32>
    tpu.vector_store %arg8[%c160, %c0_69], %59 {strides = array<i32>} : memref<250x144xf32, #tpu.memory_space<vmem>>, vector<10x144xf32>,
    %c0_70 = arith.constant 0 : index
    %c38 = arith.constant 38 : index
    %61 = vector.load %arg7[%c0_70, %c38] : memref<10x208xf32, #tpu.memory_space<vmem>>, vector<10x144xf32>
    %c170 = arith.constant 170 : index
    %c0_71 = arith.constant 0 : index
    %62 = vector.load %arg8[%c170, %c0_71] : memref<250x144xf32, #tpu.memory_space<vmem>>, vector<10x144xf32>
    tpu.vector_store %arg8[%c170, %c0_71], %61 {strides = array<i32>} : memref<250x144xf32, #tpu.memory_space<vmem>>, vector<10x144xf32>,
    %c0_72 = arith.constant 0 : index
    %c39 = arith.constant 39 : index
    %63 = vector.load %arg7[%c0_72, %c39] : memref<10x208xf32, #tpu.memory_space<vmem>>, vector<10x144xf32>
    %c180 = arith.constant 180 : index
    %c0_73 = arith.constant 0 : index
    %64 = vector.load %arg8[%c180, %c0_73] : memref<250x144xf32, #tpu.memory_space<vmem>>, vector<10x144xf32>
    tpu.vector_store %arg8[%c180, %c0_73], %63 {strides = array<i32>} : memref<250x144xf32, #tpu.memory_space<vmem>>, vector<10x144xf32>,
    %c0_74 = arith.constant 0 : index
    %c40_75 = arith.constant 40 : index
    %65 = vector.load %arg7[%c0_74, %c40_75] : memref<10x208xf32, #tpu.memory_space<vmem>>, vector<10x144xf32>
    %c190 = arith.constant 190 : index
    %c0_76 = arith.constant 0 : index
    %66 = vector.load %arg8[%c190, %c0_76] : memref<250x144xf32, #tpu.memory_space<vmem>>, vector<10x144xf32>
    tpu.vector_store %arg8[%c190, %c0_76], %65 {strides = array<i32>} : memref<250x144xf32, #tpu.memory_space<vmem>>, vector<10x144xf32>,
    %c0_77 = arith.constant 0 : index
    %c48 = arith.constant 48 : index
    %67 = vector.load %arg7[%c0_77, %c48] : memref<10x208xf32, #tpu.memory_space<vmem>>, vector<10x144xf32>
    %c200 = arith.constant 200 : index
    %c0_78 = arith.constant 0 : index
    %68 = vector.load %arg8[%c200, %c0_78] : memref<250x144xf32, #tpu.memory_space<vmem>>, vector<10x144xf32>
    tpu.vector_store %arg8[%c200, %c0_78], %67 {strides = array<i32>} : memref<250x144xf32, #tpu.memory_space<vmem>>, vector<10x144xf32>,
    %c0_79 = arith.constant 0 : index
    %c49 = arith.constant 49 : index
    %69 = vector.load %arg7[%c0_79, %c49] : memref<10x208xf32, #tpu.memory_space<vmem>>, vector<10x144xf32>
    %c210 = arith.constant 210 : index
    %c0_80 = arith.constant 0 : index
    %70 = vector.load %arg8[%c210, %c0_80] : memref<250x144xf32, #tpu.memory_space<vmem>>, vector<10x144xf32>
    tpu.vector_store %arg8[%c210, %c0_80], %69 {strides = array<i32>} : memref<250x144xf32, #tpu.memory_space<vmem>>, vector<10x144xf32>,
    %c0_81 = arith.constant 0 : index
    %c50_82 = arith.constant 50 : index
    %71 = vector.load %arg7[%c0_81, %c50_82] : memref<10x208xf32, #tpu.memory_space<vmem>>, vector<10x144xf32>
    %c220 = arith.constant 220 : index
    %c0_83 = arith.constant 0 : index
    %72 = vector.load %arg8[%c220, %c0_83] : memref<250x144xf32, #tpu.memory_space<vmem>>, vector<10x144xf32>
    tpu.vector_store %arg8[%c220, %c0_83], %71 {strides = array<i32>} : memref<250x144xf32, #tpu.memory_space<vmem>>, vector<10x144xf32>,
    %c0_84 = arith.constant 0 : index
    %c51 = arith.constant 51 : index
    %73 = vector.load %arg7[%c0_84, %c51] : memref<10x208xf32, #tpu.memory_space<vmem>>, vector<10x144xf32>
    %c230 = arith.constant 230 : index
    %c0_85 = arith.constant 0 : index
    %74 = vector.load %arg8[%c230, %c0_85] : memref<250x144xf32, #tpu.memory_space<vmem>>, vector<10x144xf32>
    tpu.vector_store %arg8[%c230, %c0_85], %73 {strides = array<i32>} : memref<250x144xf32, #tpu.memory_space<vmem>>, vector<10x144xf32>,
    %c0_86 = arith.constant 0 : index
    %c52 = arith.constant 52 : index
    %75 = vector.load %arg7[%c0_86, %c52] : memref<10x208xf32, #tpu.memory_space<vmem>>, vector<10x144xf32>
    %c240 = arith.constant 240 : index
    %c0_87 = arith.constant 0 : index
    %76 = vector.load %arg8[%c240, %c0_87] : memref<250x144xf32, #tpu.memory_space<vmem>>, vector<10x144xf32>
    tpu.vector_store %arg8[%c240, %c0_87], %75 {strides = array<i32>} : memref<250x144xf32, #tpu.memory_space<vmem>>, vector<10x144xf32>,
    %c0_88 = arith.constant 0 : index
    %c0_89 = arith.constant 0 : index
    %77 = vector.load %arg4[%c0_88, %c0_89] : memref<20x250xf32, #tpu.memory_space<vmem>>, vector<20x250xf32>
    %c0_90 = arith.constant 0 : index
    %c0_91 = arith.constant 0 : index
    %78 = vector.load %arg8[%c0_90, %c0_91] : memref<250x144xf32, #tpu.memory_space<vmem>>, vector<250x144xf32>
    %cst_92 = arith.constant dense<0.000000e+00> : vector<20x144xf32>
    %79 = tpu.matmul %77, %78, %cst_92 {dimension_numbers = #tpu.dot_dimension_numbers<[1], [0], [0], [1], [0, 0, 1, 1], [], []>, precision = #tpu.contract_precision<fp32>} : vector<20x250xf32>, vector<250x144xf32>, vector<20x144xf32> -> vector<20x144xf32>
    %cst_93 = arith.constant 0.000000e+00 : f32
    %80 = vector.broadcast %cst_93 : f32 to vector<20x160xf32>
    %c0_94 = arith.constant 0 : index
    %c0_95 = arith.constant 0 : index
    %81 = vector.load %arg9[%c0_94, %c0_95] : memref<20x160xf32, #tpu.memory_space<vmem>>, vector<20x160xf32>
    tpu.vector_store %arg9[%c0_94, %c0_95], %80 {strides = array<i32>} : memref<20x160xf32, #tpu.memory_space<vmem>>, vector<20x160xf32>,
    %c0_96 = arith.constant 0 : index
    %c0_97 = arith.constant 0 : index
    %82 = vector.load %arg5[%c0_96, %c0_97] : memref<20x1xf32, #tpu.memory_space<vmem>>, vector<20x1xf32>
    %83 = vector.broadcast %82 : vector<20x1xf32> to vector<20x144xf32>
    %84 = arith.addf %79, %83 : vector<20x144xf32>
    %cst_98 = arith.constant 0.000000e+00 : f32
    %85 = vector.broadcast %cst_98 : f32 to vector<20x144xf32>
    %86 = arith.maximumf %84, %85 : vector<20x144xf32>
    %c0_99 = arith.constant 0 : index
    %c0_100 = arith.constant 0 : index
    %87 = vector.load %arg9[%c0_99, %c0_100] : memref<20x160xf32, #tpu.memory_space<vmem>>, vector<20x144xf32>
    tpu.vector_store %arg9[%c0_99, %c0_100], %86 {strides = array<i32>} : memref<20x160xf32, #tpu.memory_space<vmem>>, vector<20x144xf32>,
    %c0_101 = arith.constant 0 : index
    %c0_102 = arith.constant 0 : index
    %88 = vector.load %arg9[%c0_101, %c0_102] : memref<20x160xf32, #tpu.memory_space<vmem>>, vector<20x144xf32>
    %c0_103 = arith.constant 0 : index
    %c1_104 = arith.constant 1 : index
    %89 = vector.load %arg9[%c0_103, %c1_104] : memref<20x160xf32, #tpu.memory_space<vmem>>, vector<20x144xf32>
    %90 = arith.maximumf %88, %89 : vector<20x144xf32>
    %c0_105 = arith.constant 0 : index
    %c12_106 = arith.constant 12 : index
    %91 = vector.load %arg9[%c0_105, %c12_106] : memref<20x160xf32, #tpu.memory_space<vmem>>, vector<20x144xf32>
    %92 = arith.maximumf %90, %91 : vector<20x144xf32>
    %c0_107 = arith.constant 0 : index
    %c13_108 = arith.constant 13 : index
    %93 = vector.load %arg9[%c0_107, %c13_108] : memref<20x160xf32, #tpu.memory_space<vmem>>, vector<20x144xf32>
    %94 = arith.maximumf %92, %93 : vector<20x144xf32>
    %c0_109 = arith.constant 0 : index
    %c0_110 = arith.constant 0 : index
    %c0_111 = arith.constant 0 : index
    %95 = vector.load %arg6[%c0_109, %c0_110, %c0_111] : memref<1x20x144xf32, #tpu.memory_space<vmem>>, vector<1x20x144xf32>
    %96 = vector.shape_cast %95 : vector<1x20x144xf32> to vector<20x144xf32>
    %97 = vector.shape_cast %94 : vector<20x144xf32> to vector<1x20x144xf32>
    tpu.vector_store %arg6[%c0_109, %c0_110, %c0_111], %97 {strides = array<i32>} : memref<1x20x144xf32, #tpu.memory_space<vmem>>, vector<1x20x144xf32>,
    return
  }
  func.func @transform_0(%arg0: i32) -> (i32, i32, i32, i32) {
    %c0_i32 = arith.constant 0 : i32
    %c0_i32_0 = arith.constant 0 : i32
    %c0_i32_1 = arith.constant 0 : i32
    %c0_i32_2 = arith.constant 0 : i32
    return %arg0, %c0_i32, %c0_i32_0, %c0_i32_1 : i32, i32, i32, i32
  }
  func.func @transform_1(%arg0: i32) -> (i32, i32) {
    %c0_i32 = arith.constant 0 : i32
    %c0_i32_0 = arith.constant 0 : i32
    %c0_i32_1 = arith.constant 0 : i32
    return %c0_i32, %c0_i32_0 : i32, i32
  }
  func.func @transform_2(%arg0: i32) -> (i32, i32) {
    %c0_i32 = arith.constant 0 : i32
    %c0_i32_0 = arith.constant 0 : i32
    %c0_i32_1 = arith.constant 0 : i32
    return %c0_i32, %c0_i32_0 : i32, i32
  }
  func.func @transform_3(%arg0: i32) -> (i32, i32) {
    %c0_i32 = arith.constant 0 : i32
    %c0_i32_0 = arith.constant 0 : i32
    %c0_i32_1 = arith.constant 0 : i32
    return %c0_i32, %c0_i32_0 : i32, i32
  }
  func.func @transform_4(%arg0: i32) -> (i32, i32) {
    %c0_i32 = arith.constant 0 : i32
    %c0_i32_0 = arith.constant 0 : i32
    %c0_i32_1 = arith.constant 0 : i32
    return %c0_i32, %c0_i32_0 : i32, i32
  }
  func.func @transform_5(%arg0: i32) -> (i32, i32, i32) {
    %c0_i32 = arith.constant 0 : i32
    %c0_i32_0 = arith.constant 0 : i32
    %c0_i32_1 = arith.constant 0 : i32
    return %arg0, %c0_i32, %c0_i32_0 : i32, i32, i32
  }
}

module attributes {stable_mosaic.version = 11 : i64} {
  func.func @fc_stage_kernel(%arg0: i32, %arg1: memref<1x1x320xf32, #tpu.memory_space<vmem>>, %arg2: memref<320x50xf32, #tpu.memory_space<vmem>>, %arg3: memref<1x50xf32, #tpu.memory_space<vmem>>, %arg4: memref<50x128xf32, #tpu.memory_space<vmem>>, %arg5: memref<1x128xf32, #tpu.memory_space<vmem>>, %arg6: memref<1x1x128xf32, #tpu.memory_space<vmem>>) attributes {dimension_semantics = [#tpu.dimension_semantics<parallel>], iteration_bounds = array<i64: 2>, scalar_prefetch = 0 : i64, scratch_operands = 0 : i64, tpu.core_type = #tpu.core_type<tc>, window_params = [{transform_indices = @transform_0, window_bounds = array<i64: 1, 1, 320>}, {pipeline_mode = #tpu.pipeline_mode<synchronous>, transform_indices = @transform_1, window_bounds = array<i64: 320, 50>}, {pipeline_mode = #tpu.pipeline_mode<synchronous>, transform_indices = @transform_2, window_bounds = array<i64: 1, 50>}, {pipeline_mode = #tpu.pipeline_mode<synchronous>, transform_indices = @transform_3, window_bounds = array<i64: 50, 128>}, {pipeline_mode = #tpu.pipeline_mode<synchronous>, transform_indices = @transform_4, window_bounds = array<i64: 1, 128>}, {transform_indices = @transform_5, window_bounds = array<i64: 1, 1, 128>}]} {
    %c0 = arith.constant 0 : index
    %c0_0 = arith.constant 0 : index
    %c0_1 = arith.constant 0 : index
    %0 = vector.load %arg1[%c0, %c0_0, %c0_1] : memref<1x1x320xf32, #tpu.memory_space<vmem>>, vector<1x1x320xf32>
    %1 = vector.shape_cast %0 : vector<1x1x320xf32> to vector<1x320xf32>
    %c0_2 = arith.constant 0 : index
    %c0_3 = arith.constant 0 : index
    %2 = vector.load %arg2[%c0_2, %c0_3] : memref<320x50xf32, #tpu.memory_space<vmem>>, vector<320x50xf32>
    %cst = arith.constant dense<0.000000e+00> : vector<1x50xf32>
    %3 = tpu.matmul %1, %2, %cst {dimension_numbers = #tpu.dot_dimension_numbers<[1], [0], [0], [1], [0, 0, 1, 1], [], []>, precision = #tpu.contract_precision<fp32>} : vector<1x320xf32>, vector<320x50xf32>, vector<1x50xf32> -> vector<1x50xf32>
    %c0_4 = arith.constant 0 : index
    %c0_5 = arith.constant 0 : index
    %4 = vector.load %arg3[%c0_4, %c0_5] : memref<1x50xf32, #tpu.memory_space<vmem>>, vector<1x50xf32>
    %5 = arith.addf %3, %4 : vector<1x50xf32>
    %c0_6 = arith.constant 0 : index
    %c0_7 = arith.constant 0 : index
    %6 = vector.load %arg4[%c0_6, %c0_7] : memref<50x128xf32, #tpu.memory_space<vmem>>, vector<50x128xf32>
    %cst_8 = arith.constant dense<0.000000e+00> : vector<1x128xf32>
    %7 = tpu.matmul %5, %6, %cst_8 {dimension_numbers = #tpu.dot_dimension_numbers<[1], [0], [0], [1], [0, 0, 1, 1], [], []>, precision = #tpu.contract_precision<fp32>} : vector<1x50xf32>, vector<50x128xf32>, vector<1x128xf32> -> vector<1x128xf32>
    %c0_9 = arith.constant 0 : index
    %c0_10 = arith.constant 0 : index
    %8 = vector.load %arg5[%c0_9, %c0_10] : memref<1x128xf32, #tpu.memory_space<vmem>>, vector<1x128xf32>
    %9 = arith.addf %7, %8 : vector<1x128xf32>
    %c0_11 = arith.constant 0 : index
    %c0_12 = arith.constant 0 : index
    %c0_13 = arith.constant 0 : index
    %10 = vector.load %arg6[%c0_11, %c0_12, %c0_13] : memref<1x1x128xf32, #tpu.memory_space<vmem>>, vector<1x1x128xf32>
    %11 = vector.shape_cast %10 : vector<1x1x128xf32> to vector<1x128xf32>
    %12 = vector.shape_cast %9 : vector<1x128xf32> to vector<1x1x128xf32>
    tpu.vector_store %arg6[%c0_11, %c0_12, %c0_13], %12 {strides = array<i32>} : memref<1x1x128xf32, #tpu.memory_space<vmem>>, vector<1x1x128xf32>,
    return
  }
  func.func @transform_0(%arg0: i32) -> (i32, i32, i32) {
    %c0_i32 = arith.constant 0 : i32
    %c0_i32_0 = arith.constant 0 : i32
    %c0_i32_1 = arith.constant 0 : i32
    return %arg0, %c0_i32, %c0_i32_0 : i32, i32, i32
  }
  func.func @transform_1(%arg0: i32) -> (i32, i32) {
    %c0_i32 = arith.constant 0 : i32
    %c0_i32_0 = arith.constant 0 : i32
    %c0_i32_1 = arith.constant 0 : i32
    return %c0_i32, %c0_i32_0 : i32, i32
  }
  func.func @transform_2(%arg0: i32) -> (i32, i32) {
    %c0_i32 = arith.constant 0 : i32
    %c0_i32_0 = arith.constant 0 : i32
    %c0_i32_1 = arith.constant 0 : i32
    return %c0_i32, %c0_i32_0 : i32, i32
  }
  func.func @transform_3(%arg0: i32) -> (i32, i32) {
    %c0_i32 = arith.constant 0 : i32
    %c0_i32_0 = arith.constant 0 : i32
    %c0_i32_1 = arith.constant 0 : i32
    return %c0_i32, %c0_i32_0 : i32, i32
  }
  func.func @transform_4(%arg0: i32) -> (i32, i32) {
    %c0_i32 = arith.constant 0 : i32
    %c0_i32_0 = arith.constant 0 : i32
    %c0_i32_1 = arith.constant 0 : i32
    return %c0_i32, %c0_i32_0 : i32, i32
  }
  func.func @transform_5(%arg0: i32) -> (i32, i32, i32) {
    %c0_i32 = arith.constant 0 : i32
    %c0_i32_0 = arith.constant 0 : i32
    %c0_i32_1 = arith.constant 0 : i32
    return %arg0, %c0_i32, %c0_i32_0 : i32, i32, i32
  }
}

</mosaic_0001>

<bundles_post_ra>
// kernel: net_forward.3
= control target key start
LH: loop header
LB: loop body
LE: loop exit
PB: predicated region body
PF: predicated region fallthrough
CT: control target
= control target key end

     0   :  { %10 = vsyncpa [#allocation3], 0  ;;  %s4193_s0 = inlined_call_operand.vmem [shape: f32[2,1,320], index: 0, kind: input, shape index: {}]   ;;  %s4194_s1 = inlined_call_operand.vmem [shape: f32[320,50], index: 1, kind: input, shape index: {}]   ;;  %s4195_s2 = inlined_call_operand.vmem [shape: f32[1,50], index: 2, kind: input, shape index: {}]   ;;  %s4196_s3 = inlined_call_operand.vmem [shape: f32[50,128], index: 3, kind: input, shape index: {}]   ;;  %s4197_s4 = inlined_call_operand.vmem [shape: f32[1,128], index: 4, kind: input, shape index: {}]   ;;  %s4198_s5 = inlined_call_operand.hbm [shape: f32[2,1,128], index: 5, kind: output, shape index: {}]  }
   0x1   :  { %12 = vsyncpa [#allocation3 + $0x1], 0  ;;  %s3303_s18 = smov 0   ;;  %s3305_s19 = smov 0  }
   0x2   :  { %s3307_s20 = smov 0   ;;  %s3309_s21 = smov 0  }
   0x3 LB: > { %s3324_s22 = sadd.s32 4294967295, %s3267_s21   ;;  %s2287_s23 = sadd.s32 4294967294, %s3267_s21   ;;  %s3267_s21 = sphi %s3309_s21, %s4303_s21   ;;  %s3263_s20 = sphi %s3307_s20, %s4302_s20   ;;  %s3259_s19 = sphi %s3305_s19, %s4301_s19   ;;  %s3255_s18 = sphi %s3303_s18, %s4300_s18  }
   0x4   : > { %s3328_s24 = sadd.s32 1, %s3267_s21   ;;  %s135_s25 = sadd.s32 1, %s3263_s20 }
   0x5   : > { %s132_s26 = ssub.s32 %s3267_s21, %s3328_s24  ;;  %p145_p0 = scmp.ne.s32.totalorder %s3263_s20, %s3259_s19 }
   0x6   : > { %p133_p1 = scmp.eq.s32.totalorder %s132_s26, 0  ;;  %p146_p2 = scmp.eq.s32.totalorder %s3324_s22, 1 }
   0x7   : > { %p151_p3 = scmp.ne.s32.totalorder %s3259_s19, %s3255_s18  ;;  %p152_p4 = scmp.eq.s32.totalorder %s2287_s23, 1 }
   0x8   : > { %s3339_s27 = scalar_select %p133_p1, %s3263_s20, %s135_s25  }
   0x9   : > { %p3341_p5 = por %p146_p2, %p145_p0  ;;  %p3345_p6 = por %p152_p4, %p151_p3 }
   0xa   : > { %p2290_p7 = scmp.ge.s32.totalorder %s3267_s21, 1  ;;  %p189_p8 = scmp.lt.s32.totalorder %s3267_s21, 3 }
   0xc   : > { %p190_p9 = pnand %p2290_p7, %p189_p8 }
   0xe   : > { %193 = sbr.rel (%p190_p9) target bundleno = 763 (0x2fb), region = 40 }
  0x15   : > { %v236_v0 = vld [vmem:[%s4194_s1 + $0x80] sm:$0xff]  ;;  %v237_v1 = vld [vmem:[%s4194_s1 + $0x88] sm:$0xff]  ;;  %v238_v7 = vld [vmem:[%s4194_s1 + $0x90] sm:$0xff]  ;;  %p215_p10 = scmp.lt.s32.totalorder %s3324_s22, 1  ;;  %vm276_vm0 = vcmask 523264   ;;  %vm3270_vm1 = vmmov 0  }
  0x16   : > { %v220_v2 = vld [vmem:[%s4194_s1] sm:$0xff]  ;;  %v328_v3 = vand.u32 4294901760, %v236_v0  ;;  %v331_v4 = vand.u32 4294901760, %v237_v1  ;;  %v221_v5 = vld [vmem:[%s4194_s1 + $0x8] sm:$0xff]  ;;  %v239_v8 = vld [vmem:[%s4194_s1 + $0x98] sm:$0xff]  ;;  %v334_v10 = vand.u32 4294901760, %v238_v7 }
  0x17   : > { %v280_v6 = vand.u32 4294901760, %v220_v2  ;;  %v283_v9 = vand.u32 4294901760, %v221_v5  ;;  %v337_v11 = vand.u32 4294901760, %v239_v8  ;;  %v222_v12 = vld [vmem:[%s4194_s1 + $0x10] sm:$0xff]  ;;  %v223_v13 = vld [vmem:[%s4194_s1 + $0x18] sm:$0xff]  ;;  %v240_v18 = vld [vmem:[%s4194_s1 + $0xa0] sm:$0xff] }
  0x18   : > { %v3375_v14 = vpack.c.bf16 %v331_v4, %v328_v3  ;;  %v286_v16 = vand.u32 4294901760, %v222_v12  ;;  %v289_v17 = vand.u32 4294901760, %v223_v13  ;;  %v241_v19 = vld [vmem:[%s4194_s1 + $0xa8] sm:$0xff]  ;;  %v224_v23 = vld [vmem:[%s4194_s1 + $0x20] sm:$0xff]  ;;  %v3398_v26 = vsub.f32 %v238_v7, %v334_v10  ;;  %v242_v38 = vld [vmem:[%s4194_s1 + $0xb0] sm:$0xff]  ;;  %s3591_s13 = scalar_select %p215_p10, %s3324_s22, 1 }
  0x19   : > { %v3377_v15 = vsub.f32 %v220_v2, %v280_v6  ;;  %v3385_v20 = vpack.c.bf16 %v283_v9, %v280_v6  ;;  %v3387_v21 = vsub.f32 %v221_v5, %v283_v9  ;;  %v3389_v22 = vpack.c.bf16 %v337_v11, %v334_v10  ;;  %v225_v24 = vld [vmem:[%s4194_s1 + $0x28] sm:$0xff]  ;;  %v243_v43 = vld [vmem:[%s4194_s1 + $0xb8] sm:$0xff]  ;;  %v226_v56 = vld [vmem:[%s4194_s1 + $0x30] sm:$0xff]  ;;  %s213_s10 = sand.u32 1, %s3259_s19  }
  0x1a   : > { %2823 = vmatprep.subr.bf16.mxu0 %v3375_v14  ;;  %v3400_v27 = vsub.f32 %v239_v8, %v337_v11  ;;  %v3402_v28 = vpack.c.bf16 %v289_v17, %v286_v16  ;;  %v3404_v29 = vsub.f32 %v222_v12, %v286_v16  ;;  %v340_v30 = vand.u32 4294901760, %v240_v18  ;;  %v227_v57 = vld [vmem:[%s4194_s1 + $0x38] sm:$0xff]  ;;  %v244_v6 = vld [vmem:[%s4194_s1 + $0xc0] sm:$0xff]  ;;  %v245_v7 = vld [vmem:[%s4194_s1 + $0xc8] sm:$0xff]  ;;  %s3162_s6 = smul.u32 3, %s3591_s13  ;;  %s2291_s13 = sshll.u32 %s3324_s22, 4 }
  0x1b   : > { %2825 = vmatpush3.bf16.msra.mxu0 %v3385_v20  ;;  %v343_v31 = vand.u32 4294901760, %v241_v19  ;;  %v3407_v32 = vsub.f32 %v236_v0, %v328_v3  ;;  %v3409_v33 = vsub.f32 %v237_v1, %v331_v4  ;;  %v292_v34 = vand.u32 4294901760, %v224_v23  ;;  %v228_v12 = vld [vmem:[%s4194_s1 + $0x40] sm:$0xff]  ;;  %s214_s14 = scalar_lea.vmem [#allocation2], %s213_s10  ;;  %s4151_s23 = scalar_lea.hbm %s4198_s5, %s2291_s13 }
  0x1c   : > { %2827 = vmatprep.subr.bf16.mxu0 %v3389_v22  ;;  %v295_v35 = vand.u32 4294901760, %v225_v24  ;;  %v4215_v36 = vand.u32 4294901760, %v3377_v15  ;;  %v4214_v37 = vand.u32 4294901760, %v3387_v21  ;;  %v3417_v39 = vsub.f32 %v223_v13, %v289_v17  ;;  %s218_s9 = scalar_lea.vmem %s4193_s0, %s3162_s6  ;;  %s2232_s15 = sshll.u32 %s214_s14, 4  ;;  %s4153_s15 = int_to_ptr.vmem [resolvable:$true] %s2232_s15 }
  0x1d   : > { %v3419_v40 = vpack.c.bf16 %v343_v31, %v340_v30  ;;  %v3421_v41 = vsub.f32 %v240_v18, %v340_v30  ;;  %v4218_v42 = vand.u32 4294901760, %v3407_v32  ;;  %v3427_v44 = vsub.f32 %v241_v19, %v343_v31  ;;  %v229_v31 = vld [vmem:[%s4194_s1 + $0x48] sm:$0xff]  ;;  %s2220_s25 = scalar_lea.sflag [#allocation3], %s213_s10  ;;  %s3205_s26 = scalar_lea.vmem %s4153_s15, 16 }
  0x1e   : > { %v4217_v45 = vand.u32 4294901760, %v3409_v33  ;;  %v3430_v46 = vpack.c.bf16 %v295_v35, %v292_v34  ;;  %v3432_v47 = vsub.f32 %v224_v23, %v292_v34  ;;  %v395_v49 = vsub.f32 %v3377_v15, %v4215_v36  ;;  %p3206_p11 = scmp.ne.s32.totalorder %s4153_s15, %s3205_s26  ;;  %s3272_s22 = smov [#allocation2]  }
  0x1f   : > { %2829 = vmatpush3.bf16.msra.mxu0 %v3402_v28  ;;  %v507_v48 = vsub.f32 %v3407_v32, %v4218_v42  ;;  %v402_v50 = vsub.f32 %v3387_v21, %v4214_v37  ;;  %v346_v51 = vand.u32 4294901760, %v242_v38  ;;  %v349_v53 = vand.u32 4294901760, %v243_v43  ;;  %s3209_s30 = sshll.u32 %s3272_s22, 4  ;;  %s3210_s30 = int_to_ptr.vmem [resolvable:$false] %s3209_s30 }
  0x20   : > { %2831 = vmatprep.subr.bf16.mxu0 %v3419_v40  ;;  %v514_v52 = vsub.f32 %v3409_v33, %v4217_v45  ;;  %v4212_v54 = vand.u32 4294901760, %v3398_v26  ;;  %v4211_v55 = vand.u32 4294901760, %v3400_v27  ;;  %v3456_v59 = vsub.f32 %v225_v24, %v295_v35  ;;  %p3207_p12 = pnand %p3206_p11, %p3341_p5  ;;  %s3211_s6 = scalar_lea.vmem %s3210_s30, 32 }
  0x21   : > { %v508_v58 = vand.u32 4294901760, %v507_v48  ;;  %v396_v60 = vand.u32 4294901760, %v395_v49  ;;  %v403_v61 = vand.u32 4294901760, %v402_v50  ;;  %v3458_v63 = vpack.c.bf16 %v349_v53, %v346_v51  ;;  %p3212_p0 = scmp.lt.s32.totalorder %s4153_s15, %s3210_s30  ;;  %p3213_p1 = scmp.lt.s32.totalorder %s3211_s6, %s3205_s26 }
  0x22   : > { %v515_v62 = vand.u32 4294901760, %v514_v52  ;;  %v3460_v0 = vsub.f32 %v242_v38, %v346_v51  ;;  %v521_v1 = vsub.f32 %v3398_v26, %v4212_v54  ;;  %v528_v3 = vsub.f32 %v3400_v27, %v4211_v55  ;;  %p3208_p13 = pneg %p3207_p12 }
  0x23   : > { %2833 = vmatpush3.bf16.msra.mxu0 %v3430_v46  ;;  %v2856_v2 = vpack.c.bf16 %v403_v61, %v396_v60  ;;  %v298_v4 = vand.u32 4294901760, %v226_v56  ;;  %v301_v5 = vand.u32 4294901760, %v227_v57  ;;  %v4210_v10 = vand.u32 4294901760, %v3404_v29  ;;  %v247_v60 = vld [vmem:[%s4194_s1 + $0xd8] sm:$0xff]  ;;  %p3214_p2 = por %p3213_p1, %p3212_p0 }
  0x24   : > { %v2854_v8 = vpack.c.bf16 %v515_v62, %v508_v58  ;;  %2835 = vmatprep.subr.bf16.mxu0 %v3458_v63  ;;  %v522_v9 = vand.u32 4294901760, %v521_v1  ;;  %v4206_v11 = vand.u32 4294901760, %v3417_v39  ;;  %v3481_v13 = vsub.f32 %v243_v43, %v349_v53 }
  0x25   : > { %v529_v16 = vand.u32 4294901760, %v528_v3  ;;  %v3483_v17 = vpack.c.bf16 %v301_v5, %v298_v4  ;;  %v3485_v18 = vsub.f32 %v226_v56, %v298_v4  ;;  %v409_v19 = vsub.f32 %v3404_v29, %v4210_v10  ;;  %v230_v3 = vld [vmem:[%s4194_s1 + $0x50] sm:$0xff]  ;;  %p3215_p3 = pnand %p3214_p2, %p3208_p13 }
  0x26   : > { %2855 = vmatprep.subr.bf16.mxu1 %v2854_v8  ;;  %v416_v23 = vsub.f32 %v3417_v39, %v4206_v11  ;;  %v352_v24 = vand.u32 4294901760, %v244_v6  ;;  %v355_v30 = vand.u32 4294901760, %v245_v7  ;;  %v4205_v35 = vand.u32 4294901760, %v3421_v41 }
  0x27   : > { %2857 = vmatpush3.bf16.msra.mxu1 %v2856_v2  ;;  %v2858_v34 = vpack.c.bf16 %v529_v16, %v522_v9  ;;  %2837 = vmatpush3.bf16.msra.mxu0 %v3483_v17  ;;  %v4203_v38 = vand.u32 4294901760, %v3427_v44  ;;  %v304_v43 = vand.u32 4294901760, %v228_v12  ;;  %v3499_v48 = vsub.f32 %v227_v57, %v301_v5  ;;  %v246_v57 = vld [vmem:[%s4194_s1 + $0xd0] sm:$0xff] }
  0x28   : > { %v410_v49 = vand.u32 4294901760, %v409_v19  ;;  %v417_v50 = vand.u32 4294901760, %v416_v23  ;;  %v3501_v51 = vpack.c.bf16 %v355_v30, %v352_v24  ;;  %v3503_v52 = vsub.f32 %v244_v6, %v352_v24  ;;  %v231_v23 = vld [vmem:[%s4194_s1 + $0x58] sm:$0xff] }
  0x29   : > { %2859 = vmatprep.subr.bf16.mxu1 %v2858_v34  ;;  %v535_v53 = vsub.f32 %v3421_v41, %v4205_v35  ;;  %v542_v56 = vsub.f32 %v3427_v44, %v4203_v38  ;;  %v307_v58 = vand.u32 4294901760, %v229_v31  ;;  %v3518_v62 = vsub.f32 %v245_v7, %v355_v30 }
  0x2a   : > { %v2860_v61 = vpack.c.bf16 %v417_v50, %v410_v49  ;;  %2839 = vmatprep.subr.bf16.mxu0 %v3501_v51  ;;  %v4202_v1 = vand.u32 4294901760, %v3432_v47  ;;  %v4201_v2 = vand.u32 4294901760, %v3456_v59  ;;  %v3527_v8 = vsub.f32 %v228_v12, %v304_v43 }
  0x2b   : > { %v536_v4 = vand.u32 4294901760, %v535_v53  ;;  %v543_v5 = vand.u32 4294901760, %v542_v56  ;;  %v3525_v6 = vpack.c.bf16 %v307_v58, %v304_v43  ;;  %v358_v16 = vand.u32 4294901760, %v246_v57 }
  0x2c   : > { %2861 = vmatpush3.bf16.msra.mxu1 %v2860_v61  ;;  %v423_v7 = vsub.f32 %v3432_v47, %v4202_v1  ;;  %v430_v9 = vsub.f32 %v3456_v59, %v4201_v2  ;;  %v361_v19 = vand.u32 4294901760, %v247_v60  ;;  %v4200_v12 = vand.u32 4294901760, %v3460_v0 }
  0x2d   : > { %v2862_v24 = vpack.c.bf16 %v543_v5, %v536_v4  ;;  %2841 = vmatpush3.bf16.msra.mxu0 %v3525_v6  ;;  %v4199_v30 = vand.u32 4294901760, %v3481_v13  ;;  %v310_v34 = vand.u32 4294901760, %v230_v3  ;;  %v3541_v43 = vsub.f32 %v229_v31, %v307_v58  ;;  %v248_v31 = vld [vmem:[%s4194_s1 + $0xe0] sm:$0xff]  ;;  %v249_v58 = vld [vmem:[%s4194_s1 + $0xe8] sm:$0xff] }
  0x2e   : > { %v424_v49 = vand.u32 4294901760, %v423_v7  ;;  %v431_v50 = vand.u32 4294901760, %v430_v9  ;;  %v3543_v53 = vpack.c.bf16 %v361_v19, %v358_v16  ;;  %v3545_v56 = vsub.f32 %v246_v57, %v358_v16 }
  0x2f   : > { %2863 = vmatprep.subr.bf16.mxu1 %v2862_v24  ;;  %v549_v61 = vsub.f32 %v3460_v0, %v4200_v12  ;;  %v556_v4 = vsub.f32 %v3481_v13, %v4199_v30  ;;  %v313_v5 = vand.u32 4294901760, %v231_v23  ;;  %v3560_v57 = vsub.f32 %v247_v60, %v361_v19  ;;  %v232_v24 = vld [vmem:[%s4194_s1 + $0x60] sm:$0xff] }
  0x30   : > { %4248 = vst [vmem:[#allocation5_spill] sm:$0xff] %v3543_v53  ;;  %v2864_v7 = vpack.c.bf16 %v431_v50, %v424_v49  ;;  %2843 = vmatprep.subr.bf16.mxu0 %v3543_v53  ;;  %v4204_v9 = vand.u32 4294901760, %v3485_v18  ;;  %v4207_v16 = vand.u32 4294901760, %v3499_v48  ;;  %v3570_v1 = vsub.f32 %v230_v3, %v310_v34 }
  0x31   : > { %v550_v30 = vand.u32 4294901760, %v549_v61  ;;  %v557_v12 = vand.u32 4294901760, %v556_v4  ;;  %v3568_v2 = vpack.c.bf16 %v313_v5, %v310_v34  ;;  %v364_v49 = vand.u32 4294901760, %v248_v31  ;;  %v233_v61 = vld [vmem:[%s4194_s1 + $0x68] sm:$0xff] }
  0x32   : > { %2865 = vmatpush3.bf16.msra.mxu1 %v2864_v7  ;;  %v437_v60 = vsub.f32 %v3485_v18, %v4204_v9  ;;  %v444_v19 = vsub.f32 %v3499_v48, %v4207_v16  ;;  %v367_v50 = vand.u32 4294901760, %v249_v58  ;;  %v4209_v3 = vand.u32 4294901760, %v3503_v52 }
  0x33   : > { %4249 = vst [vmem:[#allocation6_spill] sm:$0xff] %v3568_v2  ;;  %v2866_v4 = vpack.c.bf16 %v557_v12, %v550_v30  ;;  %2845 = vmatpush3.bf16.msra.mxu0 %v3568_v2  ;;  %v4208_v34 = vand.u32 4294901760, %v3518_v62  ;;  %v316_v7 = vand.u32 4294901760, %v232_v24  ;;  %v3584_v38 = vsub.f32 %v231_v23, %v313_v5  ;;  %v250_v5 = vld [vmem:[%s4194_s1 + $0xf0] sm:$0xff] }
  0x34   : > { %v438_v9 = vand.u32 4294901760, %v437_v60  ;;  %v445_v35 = vand.u32 4294901760, %v444_v19  ;;  %v3586_v11 = vpack.c.bf16 %v367_v50, %v364_v49  ;;  %v3593_v16 = vsub.f32 %v248_v31, %v364_v49  ;;  %v251_v60 = vld [vmem:[%s4194_s1 + $0xf8] sm:$0xff] }
  0x35   : > { %2867 = vmatprep.subr.bf16.mxu1 %v2866_v4  ;;  %v563_v12 = vsub.f32 %v3503_v52, %v4209_v3  ;;  %v570_v30 = vsub.f32 %v3518_v62, %v4208_v34  ;;  %v319_v23 = vand.u32 4294901760, %v233_v61  ;;  %v3608_v31 = vsub.f32 %v249_v58, %v367_v50  ;;  %v234_v34 = vld [vmem:[%s4194_s1 + $0x70] sm:$0xff] }
  0x36   : > { %4250 = vst [vmem:[#allocation7_spill] sm:$0xff] %v3586_v11  ;;  %v2868_v19 = vpack.c.bf16 %v445_v35, %v438_v9  ;;  %2847 = vmatprep.subr.bf16.mxu0 %v3586_v11  ;;  %v4213_v49 = vand.u32 4294901760, %v3527_v8  ;;  %v4216_v4 = vand.u32 4294901760, %v3541_v43  ;;  %v3617_v54 = vsub.f32 %v232_v24, %v316_v7 }
  0x37   : > { %v564_v3 = vand.u32 4294901760, %v563_v12  ;;  %v571_v10 = vand.u32 4294901760, %v570_v30  ;;  %v3615_v55 = vpack.c.bf16 %v319_v23, %v316_v7  ;;  %v370_v9 = vand.u32 4294901760, %v250_v5  ;;  %v235_v12 = vld [vmem:[%s4194_s1 + $0x78] sm:$0xff] }
  0x38   : > { %2869 = vmatpush3.bf16.msra.mxu1 %v2868_v19  ;;  %v451_v35 = vsub.f32 %v3527_v8, %v4213_v49  ;;  %v458_v58 = vsub.f32 %v3541_v43, %v4216_v4  ;;  %v373_v50 = vand.u32 4294901760, %v251_v60  ;;  %v4220_v24 = vand.u32 4294901760, %v3545_v56 }
  0x39   : > { %4251 = vst [vmem:[#allocation8_spill] sm:$0xff] %v3615_v55  ;;  %v2870_v30 = vpack.c.bf16 %v571_v10, %v564_v3  ;;  %2849 = vmatpush3.bf16.msra.mxu0 %v3615_v55  ;;  %v4219_v7 = vand.u32 4294901760, %v3560_v57  ;;  %v322_v19 = vand.u32 4294901760, %v234_v34  ;;  %v3632_v49 = vsub.f32 %v233_v61, %v319_v23 }
  0x3a   : > { %v452_v37 = vand.u32 4294901760, %v451_v35  ;;  %v459_v36 = vand.u32 4294901760, %v458_v58  ;;  %v3634_v4 = vpack.c.bf16 %v373_v50, %v370_v9  ;;  %v3636_v45 = vsub.f32 %v250_v5, %v370_v9 }
  0x3b   : > { %2871 = vmatprep.subr.bf16.mxu1 %v2870_v30  ;;  %v577_v10 = vsub.f32 %v3545_v56, %v4220_v24  ;;  %v584_v3 = vsub.f32 %v3560_v57, %v4219_v7  ;;  %v325_v42 = vand.u32 4294901760, %v235_v12  ;;  %v3645_v61 = vsub.f32 %v251_v60, %v373_v50 }
  0x3c   : > { %4252 = vst [vmem:[#allocation9_spill] sm:$0xff] %v3634_v4  ;;  %4253 = vst [vmem:[#allocation10_spill] sm:$0xff] %v3636_v45  ;;  %v2872_v25 = vpack.c.bf16 %v459_v36, %v452_v37  ;;  %2851 = vmatprep.subr.bf16.mxu0 %v3634_v4  ;;  %v4221_v23 = vand.u32 4294901760, %v3570_v1  ;;  %v4226_v35 = vand.u32 4294901760, %v3584_v38  ;;  %v3654_v30 = vsub.f32 %v234_v34, %v322_v19 }
  0x3d   : > { %4254 = vst [vmem:[#allocation11_spill] sm:$0xff] %v3645_v61  ;;  %v578_v5 = vand.u32 4294901760, %v577_v10  ;;  %v585_v58 = vand.u32 4294901760, %v584_v3  ;;  %v3652_v9 = vpack.c.bf16 %v325_v42, %v322_v19  ;;  %v4256_v60 = vlaneseq  ;;  %v219_v10 = vld [vmem:[%s218_s9] sm:$0x7] }
  0x3e   : > { %2873 = vmatpush3.bf16.msra.mxu1 %v2872_v25  ;;  %v465_v36 = vsub.f32 %v3570_v1, %v4221_v23  ;;  %v472_v37 = vsub.f32 %v3584_v38, %v4226_v35  ;;  %v4233_v7 = vand.u32 4294901760, %v3593_v16  ;;  %v4236_v34 = vand.u32 4294901760, %v3608_v31 }
  0x3f   : > { %4255 = vst [vmem:[#allocation12_spill] sm:$0xff] %v3652_v9  ;;  %v263_v50 = vshrl.u32 %v4256_v60, 7  ;;  %v2874_v24 = vpack.c.bf16 %v585_v58, %v578_v5  ;;  %2853 = vmatpush3.bf16.msra.mxu0 %v3652_v9  ;;  %v2886_v25 = vpack.c.bf16 %v3409_v33, %v3407_v32  ;;  %v4238_v19 = vand.u32 4294901760, %v3617_v54 }
  0x40   : > { %v466_v3 = vand.u32 4294901760, %v465_v36  ;;  %v473_v23 = vand.u32 4294901760, %v472_v37  ;;  %v591_v5 = vsub.f32 %v3593_v16, %v4233_v7  ;;  %v598_v58 = vsub.f32 %v3608_v31, %v4236_v34 }
  0x41   : > { %v268_v4 = vsub.s32 1, %v263_v50  ;;  %v272_v55 = vsub.s32 2, %v263_v50  ;;  %2875 = vmatprep.subr.bf16.mxu1 %v2874_v24  ;;  %v264_v35 = vsub.s32 0, %v263_v50  ;;  %2887 = vmatprep.subr.bf16.mxu0 %v2886_v25  ;;  %v479_v60 = vsub.f32 %v3617_v54, %v4238_v19 }
  0x42   : > { %v2876_v9 = vpack.c.bf16 %v473_v23, %v466_v3  ;;  %v4237_v24 = vand.u32 4294901760, %v3632_v49  ;;  %v3681_v50 = vsub.f32 %v235_v12, %v325_v42  ;;  %v592_v2 = vand.u32 4294901760, %v591_v5 }
  0x43   : > { %v269_v36 = vrot.slane %v219_v10, %v268_v4  ;;  %v3678_v37 = vrot.slane %v219_v10, %v272_v55  ;;  %v265_v11 = vrot.slane %v219_v10, %v264_v35  ;;  %v599_v7 = vand.u32 4294901760, %v598_v58 }
  0x44   : > { %2877 = vmatpush3.bf16.msra.mxu1 %v2876_v9  ;;  %v480_v34 = vand.u32 4294901760, %v479_v60  ;;  %v486_v25 = vsub.f32 %v3632_v49, %v4237_v24  ;;  %v604_v23 = vand.u32 4294901760, %v3636_v45  ;;  %v611_v3 = vand.u32 4294901760, %v3645_v61 }
  0x45   : > { %4257 = vst [vmem:[#allocation13_spill] sm:$0xff] %v3678_v37  ;;  %v3683_v53 = vand.u32 4294901760, %v269_v36  ;;  %v3689_v4 = vand.u32 4294901760, %v265_v11  ;;  %v2878_v55 = vpack.c.bf16 %v599_v7, %v592_v2  ;;  %v492_v9 = vand.u32 4294901760, %v3654_v30 }
  0x46   : > { %v487_v12 = vand.u32 4294901760, %v486_v25  ;;  %v605_v35 = vsub.f32 %v3636_v45, %v604_v23  ;;  %v612_v5 = vsub.f32 %v3645_v61, %v611_v3  ;;  %v499_v58 = vand.u32 4294901760, %v3681_v50 }
  0x47   : > { %4258 = vst [vmem:[#allocation14_spill] sm:$0xff] %v3683_v53  ;;  %v376_v42 = vsub.f32 %v269_v36, %v3683_v53  ;;  %616 = vmatprep.mubr.f32.mxu1 %v3683_v53  ;;  %v3697_v10 = vsub.f32 %v265_v11, %v3689_v4  ;;  %2879 = vmatprep.subr.bf16.mxu1 %v2878_v55  ;;  %vm1690_vm2 = vcmask 1041408   ;;  %vm1686_vm3 = vcmask 408576  }
  0x48   : > { %v2880_v7 = vpack.c.bf16 %v487_v12, %v480_v34  ;;  %v606_v60 = vand.u32 4294901760, %v605_v35  ;;  %v493_v36 = vsub.f32 %v3654_v30, %v492_v9  ;;  %v613_v24 = vand.u32 4294901760, %v612_v5 }
  0x49   : > { %4259 = vst [vmem:[#allocation15_spill] sm:$0xff] %v3697_v10  ;;  %v377_v2 = vand.u32 4294901760, %v376_v42  ;;  %v4243_v25 = vand.u32 4294901760, %v3697_v10  ;;  %v500_v19 = vsub.f32 %v3681_v50, %v499_v58  ;;  %v2888_v34 = vpack.c.bf16 %v3387_v21, %v3377_v15 }
  0x4a   : > { %2881 = vmatpush3.bf16.msra.mxu1 %v2880_v7  ;;  %v494_v53 = vand.u32 4294901760, %v493_v36  ;;  %v2882_v55 = vpack.c.bf16 %v613_v24, %v606_v60  ;;  %v2890_v35 = vpack.c.bf16 %v3400_v27, %v3398_v26  ;;  %v2892_v7 = vpack.c.bf16 %v3417_v39, %v3404_v29 }
  0x4b   : > { %v378_v37 = vsub.f32 %v376_v42, %v377_v2  ;;  %v384_v11 = vsub.f32 %v3697_v10, %v4243_v25  ;;  %v501_v61 = vand.u32 4294901760, %v500_v19  ;;  %v2894_v36 = vpack.c.bf16 %v3427_v44, %v3421_v41 }
  0x4c   : > { %2883 = vmatprep.subr.bf16.mxu1 %v2882_v55  ;;  %v4260_v24 = vand.u32 4294901760, %v3407_v32  ;;  %v4261_v19 = vand.u32 4294901760, %v3409_v33  ;;  %v4262_v60 = vand.u32 4294901760, %v3377_v15  ;;  %v4266_v25 = vand.u32 4294901760, %v3404_v29 }
  0x4d   : > { %v379_v45 = vand.u32 4294901760, %v378_v37  ;;  %v385_v12 = vand.u32 4294901760, %v384_v11  ;;  %v2884_v5 = vpack.c.bf16 %v501_v61, %v494_v53  ;;  %v4263_v11 = vand.u32 4294901760, %v3387_v21 }
  0x4e   : > { %v2950_v37 = vpack.c.bf16 %v4261_v19, %v4260_v24  ;;  %v4265_v53 = vand.u32 4294901760, %v3400_v27  ;;  %v4267_v10 = vand.u32 4294901760, %v3417_v39  ;;  %v4268_v33 = vand.u32 4294901760, %v3421_v41 }
  0x4f   : > { %380 = vmatprep.mubr.f32.mxu0 %v379_v45  ;;  %2885 = vmatpush3.bf16.msra.mxu1 %v2884_v5  ;;  %v2952_v55 = vpack.c.bf16 %v4263_v11, %v4262_v60  ;;  %v4264_v45 = vand.u32 4294901760, %v3398_v26  ;;  %v4269_v15 = vand.u32 4294901760, %v3427_v44  ;;  %v4270_v26 = vand.u32 4294901760, %v3432_v47 }
  0x50   : > { %386 = vmatmul.mubr.f32.vlgmr.msra.gmra.mrb[0].mxu0 %v385_v12  ;;  %v3731_v32 = vpack.c.bf16 %v4267_v10, %v4266_v25  ;;  %2919 = vmatprep.subr.bf16.mxu1 %v3375_v14  ;;  %v4271_v27 = vand.u32 4294901760, %v3456_v59  ;;  %v4272_v29 = vand.u32 4294901760, %v3460_v0  ;;  %v4273_v39 = vand.u32 4294901760, %v3481_v13 }
  0x51   : > { %v2954_v61 = vpack.c.bf16 %v4265_v53, %v4264_v45  ;;  %2889 = vmatpush3.bf16.msra.mxu0 %v2888_v34  ;;  %v3738_v21 = vpack.c.bf16 %v4269_v15, %v4268_v33  ;;  %753 = vmatprep.mubr.f32.mxu0 %v376_v42  ;;  %v4274_v41 = vand.u32 4294901760, %v3485_v18  ;;  %v4275_v44 = vand.u32 4294901760, %v3499_v48 }
  0x52   : > { %v3744_v12 = vpack.c.bf16 %v4271_v27, %v4270_v26  ;;  %v3750_v10 = vpack.c.bf16 %v4273_v39, %v4272_v29  ;;  %2891 = vmatprep.subr.bf16.mxu0 %v2890_v35  ;;  %v4276_v34 = vand.u32 4294901760, %v3503_v52  ;;  %v4277_v5 = vand.u32 4294901760, %v3518_v62  ;;  %618 = vmatmul.mubr.f32.vlgmr.msra.gmra.mrb[0].mxu1 %v3689_v4 }
  0x53   : > { %v3756_v25 = vpack.c.bf16 %v4275_v44, %v4274_v41  ;;  %v4278_v19 = vand.u32 4294901760, %v3527_v8  ;;  %v4279_v60 = vand.u32 4294901760, %v3541_v43  ;;  %v4280_v42 = vand.u32 4294901760, %v3545_v56  ;;  %2921 = vmatpush3.bf16.msra.mxu1 %v3385_v20  ;;  %860 = vmatprep.mubr.f32.mxu1 %v377_v2 }
  0x54   : > { %v3762_v24 = vpack.c.bf16 %v4277_v5, %v4276_v34  ;;  %v4281_v35 = vand.u32 4294901760, %v3560_v57  ;;  %v4282_v53 = vand.u32 4294901760, %v3570_v1  ;;  %v4283_v33 = vand.u32 4294901760, %v3584_v38  ;;  %2923 = vmatprep.subr.bf16.mxu1 %v3389_v22 }
  0x55   : > { %v3768_v11 = vpack.c.bf16 %v4279_v60, %v4278_v19  ;;  %v4284_v26 = vand.u32 4294901760, %v3593_v16  ;;  %v4285_v27 = vand.u32 4294901760, %v3608_v31  ;;  %v4286_v39 = vand.u32 4294901760, %v3617_v54  ;;  %2893 = vmatpush3.bf16.msra.mxu0 %v2892_v7  ;;  %v257_v7 = vld [vmem:[%s4194_s1 + $0x128] sm:$0xff] }
  0x56   : > { %v3775_v45 = vpack.c.bf16 %v4281_v35, %v4280_v42  ;;  %v3781_v15 = vpack.c.bf16 %v4283_v33, %v4282_v53  ;;  %v4287_v41 = vand.u32 4294901760, %v3632_v49  ;;  %v3796_v34 = vpack.c.bf16 %v611_v3, %v604_v23  ;;  %2895 = vmatprep.subr.bf16.mxu0 %v2894_v36 }
  0x57   : > { %v3787_v29 = vpack.c.bf16 %v4285_v27, %v4284_v26  ;;  %v3798_v5 = vpack.c.bf16 %v499_v58, %v492_v9  ;;  %v2896_v19 = vpack.c.bf16 %v3456_v59, %v3432_v47  ;;  %v2898_v60 = vpack.c.bf16 %v3481_v13, %v3460_v0  ;;  %2925 = vmatpush3.bf16.msra.mxu1 %v3402_v28  ;;  %v256_v58 = vld [vmem:[%s4194_s1 + $0x120] sm:$0xff] }
  0x58   : > { %v3793_v44 = vpack.c.bf16 %v4287_v41, %v4286_v39  ;;  %v2900_v2 = vpack.c.bf16 %v3499_v48, %v3485_v18  ;;  %2927 = vmatprep.subr.bf16.mxu1 %v3419_v40  ;;  %v2902_v23 = vpack.c.bf16 %v3518_v62, %v3503_v52  ;;  %v2904_v47 = vpack.c.bf16 %v3541_v43, %v3527_v8  ;;  %v4288_v48 = vld [vmem:[#allocation5_spill] sm:$0xff]  ;;  %v4289_v52 = vld [vmem:[#allocation10_spill] sm:$0xff]  ;;  %v4290_v62 = vld [vmem:[#allocation11_spill] sm:$0xff] }
  0x59   : > { %2897 = vmatpush3.bf16.msra.mxu0 %v2896_v19  ;;  %v2906_v59 = vpack.c.bf16 %v3560_v57, %v3545_v56  ;;  %v2908_v0 = vpack.c.bf16 %v3584_v38, %v3570_v1  ;;  %v2910_v13 = vpack.c.bf16 %v3608_v31, %v3593_v16  ;;  %v2912_v18 = vpack.c.bf16 %v3632_v49, %v3617_v54  ;;  %v4291_v43 = vld [vmem:[#allocation6_spill] sm:$0xff]  ;;  %v4292_v1 = vld [vmem:[#allocation7_spill] sm:$0xff]  ;;  %v4293_v56 = vld [vmem:[#allocation8_spill] sm:$0xff] }
  0x5a   : > { %2899 = vmatprep.subr.bf16.mxu0 %v2898_v60  ;;  %v2914_v8 = vpack.c.bf16 %v4290_v62, %v4289_v52  ;;  %v2916_v38 = vpack.c.bf16 %v3681_v50, %v3654_v30  ;;  %v4294_v57 = vld [vmem:[#allocation9_spill] sm:$0xff]  ;;  %v4295_v54 = vld [vmem:[#allocation15_spill] sm:$0xff]  ;;  %v4296_v16 = vld [vmem:[#allocation12_spill] sm:$0xff]  ;;  %v3269_v36 = vmov 0.0|0.0  }
  0x5b   : > { %2929 = vmatpush3.bf16.msra.mxu1 %v3430_v46  ;;  %v4297_v31 = vld [vmem:[#allocation14_spill] sm:$0xff]  ;;  %v4298_v49 = vand.u32 4294901760, %v4295_v54 }
  0x5c   : > { %2931 = vmatprep.subr.bf16.mxu1 %v3458_v63 }
  0x5d   : > { %2901 = vmatpush3.bf16.msra.mxu0 %v2900_v2 }
  0x5e   : > { %2903 = vmatprep.subr.bf16.mxu0 %v2902_v23 }
  0x5f   : > { %2933 = vmatpush3.bf16.msra.mxu1 %v3483_v17 }
  0x60   : > { %2935 = vmatprep.subr.bf16.mxu1 %v3501_v51 }
  0x61   : > { %2905 = vmatpush3.bf16.msra.mxu0 %v2904_v47 }
  0x62   : > { %2907 = vmatprep.subr.bf16.mxu0 %v2906_v59 }
  0x63   : > { %2937 = vmatpush3.bf16.msra.mxu1 %v3525_v6 }
  0x64   : > { %2939 = vmatprep.subr.bf16.mxu1 %v4288_v48 }
  0x65   : > { %2909 = vmatpush3.bf16.msra.mxu0 %v2908_v0 }
  0x66   : > { %2911 = vmatprep.subr.bf16.mxu0 %v2910_v13 }
  0x67   : > { %2941 = vmatpush3.bf16.msra.mxu1 %v4291_v43 }
  0x68   : > { %2943 = vmatprep.subr.bf16.mxu1 %v4292_v1 }
  0x69   : > { %2913 = vmatpush3.bf16.msra.mxu0 %v2912_v18 }
  0x6a   : > { %2915 = vmatprep.subr.bf16.mxu0 %v2914_v8 }
  0x6b   : > { %2945 = vmatpush3.bf16.msra.mxu1 %v4293_v56 }
  0x6c   : > { %2947 = vmatprep.subr.bf16.mxu1 %v4294_v57 }
  0x6d   : > { %2917 = vmatpush3.bf16.msra.mxu0 %v2916_v38 }
  0x6e   : > { %2951 = vmatprep.subr.bf16.mxu0 %v2950_v37 }
  0x6f   : > { %2949 = vmatpush3.bf16.msra.mxu1 %v4296_v16 }
  0x70   : > { %756 = vmatmul.mubr.f32.vlgmr.msra.gmra.mrb[2].mxu0 %v4295_v54  ;;  %2983 = vmatprep.subr.bf16.mxu1 %v3375_v14  ;;  %v252_v14 = vld [vmem:[%s4194_s1 + $0x100] sm:$0xff] }
  0x71   : > { %2953 = vmatpush3.bf16.msra.mxu0 %v2952_v55  ;;  %1030 = vmatprep.mubr.f32.mxu0 %v4297_v31  ;;  %v1154_v55 = vand.u32 4294901760, %v256_v58 }
  0x72   : > { %2955 = vmatprep.subr.bf16.mxu0 %v2954_v61  ;;  %864 = vmatmul.mubr.f32.vlgmr.msra.gmra.mrb[2].mxu1 %v4298_v49  ;;  %v1157_v61 = vand.u32 4294901760, %v257_v7 }
  0x73   : > { %2985 = vmatpush3.bf16.msra.mxu1 %v3385_v20  ;;  %1134 = vmatprep.mubr.f32.mxu1 %v4297_v31  ;;  %v253_v20 = vld [vmem:[%s4194_s1 + $0x108] sm:$0xff]  ;;  %v3924_v33 = vsub.f32 %v256_v58, %v1154_v55 }
  0x74   : > { %2987 = vmatprep.subr.bf16.mxu1 %v3389_v22  ;;  %v1142_v22 = vand.u32 4294901760, %v252_v14  ;;  %v3922_v53 = vpack.c.bf16 %v1157_v61, %v1154_v55 }
  0x75   : > { %2957 = vmatpush3.bf16.msra.mxu0 %v3731_v32  ;;  %v258_v32 = vld [vmem:[%s4194_s1 + $0x130] sm:$0xff]  ;;  %v1255_v19 = vand.u32 4294901760, %v3924_v33 }
  0x76   : > { %2959 = vmatprep.subr.bf16.mxu0 %v3738_v21  ;;  %v3885_v50 = vsub.f32 %v252_v14, %v1142_v22  ;;  %v259_v21 = vld [vmem:[%s4194_s1 + $0x138] sm:$0xff]  ;;  %v1160_v35 = vand.u32 4294901760, %v258_v32 }
  0x77   : > { %2989 = vmatpush3.bf16.msra.mxu1 %v3402_v28  ;;  %v1145_v28 = vand.u32 4294901760, %v253_v20  ;;  %v1256_v13 = vsub.f32 %v3924_v33, %v1255_v19 }
  0x78   : > { %2991 = vmatprep.subr.bf16.mxu1 %v3419_v40  ;;  %v254_v40 = vld [vmem:[%s4194_s1 + $0x110] sm:$0xff] }
  0x79   : > { %2961 = vmatpush3.bf16.msra.mxu0 %v3744_v12  ;;  %v3883_v30 = vpack.c.bf16 %v1145_v28, %v1142_v22  ;;  %v3887_v3 = vsub.f32 %v253_v20, %v1145_v28 }
  0x7a   : > { %2963 = vmatprep.subr.bf16.mxu0 %v3750_v10 }
  0x7b   : > { %2993 = vmatpush3.bf16.msra.mxu1 %v3430_v46  ;;  %v4299_v46 = vld [vmem:[#allocation13_spill] sm:$0xff]  ;;  %v1234_v42 = vand.u32 4294901760, %v3887_v3  ;;  %v3039_v20 = vpack.c.bf16 %v3887_v3, %v3885_v50 }
  0x7c   : > { %2995 = vmatprep.subr.bf16.mxu1 %v3458_v63  ;;  %v277_v63 = vsel %vm276_vm0, %v4299_v46, 0 }
  0x7d   : > { %2965 = vmatpush3.bf16.msra.mxu0 %v3756_v25 }
  0x7e   : > { %2967 = vmatprep.subr.bf16.mxu0 %v3762_v24  ;;  %v3271_v24 = vmov 0.0  }
  0x7f   : > { %2997 = vmatpush3.bf16.msra.mxu1 %v3483_v17  ;;  %v255_v17 = vld [vmem:[%s4194_s1 + $0x118] sm:$0xff] }
  0x80   : > { %2999 = vmatprep.subr.bf16.mxu1 %v3501_v51  ;;  %v1148_v51 = vand.u32 4294901760, %v254_v40  ;;  %v1151_v9 = vand.u32 4294901760, %v255_v17 }
  0x81   : > { %2969 = vmatpush3.bf16.msra.mxu0 %v3768_v11  ;;  %v1227_v11 = vand.u32 4294901760, %v3885_v50 }
  0x82   : > { %2971 = vmatprep.subr.bf16.mxu0 %v3775_v45  ;;  %v3899_v37 = vsub.f32 %v254_v40, %v1148_v51  ;;  %v3911_v10 = vpack.c.bf16 %v1151_v9, %v1148_v51  ;;  %v3913_v25 = vsub.f32 %v255_v17, %v1151_v9  ;;  %v1163_v45 = vand.u32 4294901760, %v259_v21 }
  0x83   : > { %3001 = vmatpush3.bf16.msra.mxu1 %v3525_v6  ;;  %v3880_v6 = vand.u32 4294901760, %v277_v63  ;;  %v1228_v27 = vsub.f32 %v3885_v50, %v1227_v11  ;;  %v3063_v46 = vpack.c.bf16 %v1234_v42, %v1227_v11  ;;  %v1681_v11 = vld [vmem:[%s4196_s3 + $0x18] sm:$0xff] }
  0x84   : > { %3003 = vmatprep.subr.bf16.mxu1 %v4288_v48  ;;  %v1248_v39 = vand.u32 4294901760, %v3913_v25  ;;  %v3941_v41 = vpack.c.bf16 %v1163_v45, %v1160_v35  ;;  %v3042_v22 = vpack.c.bf16 %v3913_v25, %v3899_v37 }
  0x85   : > { %2973 = vmatpush3.bf16.msra.mxu0 %v3781_v15  ;;  %v3908_v12 = vsub.f32 %v277_v63, %v3880_v6  ;;  %v3926_v15 = vsub.f32 %v257_v7, %v1157_v61  ;;  %v1229_v2 = vand.u32 4294901760, %v1228_v27  ;;  %v1682_v27 = vld [vmem:[%s4196_s3 + $0x20] sm:$0xff] }
  0x86   : > { %2975 = vmatprep.subr.bf16.mxu0 %v3787_v29  ;;  %v1241_v29 = vand.u32 4294901760, %v3899_v37  ;;  %v1249_v59 = vsub.f32 %v3913_v25, %v1248_v39  ;;  %v1680_v25 = vld [vmem:[%s4196_s3 + $0x10] sm:$0xff] }
  0x87   : > { %3005 = vmatpush3.bf16.msra.mxu1 %v4291_v43  ;;  %v1216_v26 = vand.u32 4294901760, %v3908_v12  ;;  %v1262_v60 = vand.u32 4294901760, %v3926_v15  ;;  %v3045_v28 = vpack.c.bf16 %v3926_v15, %v3924_v33 }
  0x88   : > { %3007 = vmatprep.subr.bf16.mxu1 %v4292_v1  ;;  %v1242_v47 = vsub.f32 %v3899_v37, %v1241_v29  ;;  %v1250_v8 = vand.u32 4294901760, %v1249_v59  ;;  %v3066_v63 = vpack.c.bf16 %v1248_v39, %v1241_v29 }
  0x89   : > { %2977 = vmatpush3.bf16.msra.mxu0 %v3793_v44  ;;  %v3943_v44 = vsub.f32 %v258_v32, %v1160_v35  ;;  %v1263_v18 = vsub.f32 %v3926_v15, %v1262_v60  ;;  %v3069_v17 = vpack.c.bf16 %v1262_v60, %v1255_v19  ;;  %v1678_v32 = vld [vmem:[%s4196_s3] sm:$0xff]  ;;  %v1701_v35 = vand.u32 4294901760, %v1680_v25 }
  0x8a   : > { %2979 = vmatprep.subr.bf16.mxu0 %v3796_v34  ;;  %v3945_v34 = vsub.f32 %v259_v21, %v1163_v45  ;;  %v1243_v62 = vand.u32 4294901760, %v1242_v47  ;;  %v1695_v21 = vand.u32 4294901760, %v1678_v32  ;;  %v1704_v45 = vand.u32 4294901760, %v1681_v11 }
  0x8b   : > { %3009 = vmatpush3.bf16.msra.mxu1 %v4293_v56  ;;  %v1269_v48 = vand.u32 4294901760, %v3943_v44  ;;  %v1257_v56 = vand.u32 4294901760, %v1256_v13  ;;  %v4072_v59 = vsub.f32 %v1680_v25, %v1701_v35 }
  0x8c   : > { %3011 = vmatprep.subr.bf16.mxu1 %v4294_v57  ;;  %v1276_v43 = vand.u32 4294901760, %v3945_v34  ;;  %v3030_v1 = vpack.c.bf16 %v1250_v8, %v1243_v62  ;;  %v1264_v57 = vand.u32 4294901760, %v1263_v18  ;;  %v3048_v40 = vpack.c.bf16 %v3945_v34, %v3943_v44 }
  0x8d   : > { %2981 = vmatpush3.bf16.msra.mxu0 %v3798_v5  ;;  %v1217_v5 = vsub.f32 %v3908_v12, %v1216_v26  ;;  %v1270_v38 = vsub.f32 %v3943_v44, %v1269_v48  ;;  %v4054_v15 = vpack.c.bf16 %v1704_v45, %v1701_v35 }
  0x8e   : > { %3014 = vmatprep.subr.bf16.mxu0 %v3269_v36  ;;  %v1277_v54 = vsub.f32 %v3945_v34, %v1276_v43  ;;  %v3072_v51 = vpack.c.bf16 %v1276_v43, %v1269_v48  ;;  %v1707_v34 = vand.u32 4294901760, %v1682_v27  ;;  %v1684_v48 = vld [vmem:[%s4196_s3 + $0x30] sm:$0x3] }
  0x8f   : > { %3013 = vmatpush3.bf16.msra.mxu1 %v4296_v16  ;;  %v1218_v0 = vand.u32 4294901760, %v1217_v5  ;;  %v3033_v16 = vpack.c.bf16 %v1264_v57, %v1257_v56  ;;  %v1271_v31 = vand.u32 4294901760, %v1270_v38  ;;  %v1692_v8 = vsel %vm1690_vm2, %v1684_v48, 0 }
  0x90   : > { %1032 = vmatmul.mubr.f32.vlgmr.msra.gmra.mrb[4].mxu0 %v3689_v4  ;;  %3086 = vmatprep.subr.bf16.mxu1 %v3269_v36  ;;  %v1278_v49 = vand.u32 4294901760, %v1277_v54  ;;  %v4076_v13 = vsub.f32 %v1682_v27, %v1707_v34  ;;  %v4087_v43 = vand.u32 4294901760, %v1692_v8  ;;  %v1793_v56 = vand.u32 4294901760, %v4072_v59 }
  0x91   : > { %3016 = vmatpush3.bf16.msra.mxu0 %v3883_v30  ;;  %2622 = vmatprep.mubr.msk.f32.mxu0 %vm3270_vm1, %v3271_v24 }
  0x92   : > { %3017 = vmatprep.subr.bf16.mxu0 %v3269_v36  ;;  %1136 = vmatmul.mubr.f32.vlgmr.msra.gmra.mrb[4].mxu1 %v3689_v4  ;;  %v1235_v4 = vsub.f32 %v3887_v3, %v1234_v42  ;;  %v3036_v14 = vpack.c.bf16 %v1278_v49, %v1271_v31 }
  0x93   : > { %2734 = vmatprep.mubr.msk.f32.mxu1 %vm3270_vm1, %v3271_v24 }
  0x94   : > { %v1236_v23 = vand.u32 4294901760, %v1235_v4  ;;  %v1683_v4 = vld [vmem:[%s4196_s3 + $0x28] sm:$0xff] }
  0x95   : > { %3019 = vmatpush3.bf16.msra.mxu0 %v3911_v10  ;;  %v1710_v19 = vand.u32 4294901760, %v1683_v4 }
  0x96   : > { %3020 = vmatprep.subr.bf16.mxu0 %v3269_v36  ;;  %v3027_v52 = vpack.c.bf16 %v1236_v23, %v1229_v2 }
  0x97   : > { %v4070_v47 = vpack.c.bf16 %v1710_v19, %v1707_v34  ;;  %v4078_v18 = vsub.f32 %v1683_v4, %v1710_v19  ;;  %v1820_v4 = vsub.f32 %v1692_v8, %v4087_v43 }
  0x99   : > { %3022 = vmatpush3.bf16.msra.mxu0 %v3922_v53 }
  0x9a   : > { %3023 = vmatprep.subr.bf16.mxu0 %v3269_v36 }
  0x9d   : > { %3025 = vmatpush3.bf16.msra.mxu0 %v3941_v41 }
  0x9e   : > { %3026 = vmatprep.subr.bf16.mxu0 %v3269_v36 }
  0xa0   : > { %2623 = vmatmul.mubr.f32.vlgmr.msra.gmra.mrb[6].mxu0 %v1218_v0  ;;  %v4074_v0 = vsub.f32 %v1681_v11, %v1704_v45 }
  0xa1   : > { %3028 = vmatpush3.bf16.msra.mxu0 %v3027_v52  ;;  %2641 = vmatprep.mubr.msk.f32.mxu0 %vm3270_vm1, %v3271_v24 }
  0xa2   : > { %3029 = vmatprep.subr.bf16.mxu0 %v3269_v36  ;;  %v1800_v57 = vand.u32 4294901760, %v4074_v0 }
  0xa4   : > { %v1801_v31 = vsub.f32 %v4074_v0, %v1800_v57 }
  0xa5   : > { %3031 = vmatpush3.bf16.msra.mxu0 %v3030_v1 }
  0xa6   : > { %3032 = vmatprep.subr.bf16.mxu0 %v3269_v36 }
  0xa9   : > { %3034 = vmatpush3.bf16.msra.mxu0 %v3033_v16  ;;  %v1794_v16 = vsub.f32 %v4072_v59, %v1793_v56 }
  0xaa   : > { %3035 = vmatprep.subr.bf16.mxu0 %v3269_v36 }
  0xab   : > { %v1795_v49 = vand.u32 4294901760, %v1794_v16 }
  0xad   : > { %3037 = vmatpush3.bf16.msra.mxu0 %v3036_v14  ;;  %v1807_v14 = vand.u32 4294901760, %v4076_v13 }
  0xae   : > { %3038 = vmatprep.subr.bf16.mxu0 %v3269_v36 }
  0xb0   : > { %2642 = vmatmul.mubr.f32.vlgmr.msra.gmra.mrb[6].mxu0 %v3880_v6 }
  0xb1   : > { %3040 = vmatpush3.bf16.msra.mxu0 %v3039_v20  ;;  %2660 = vmatprep.mubr.msk.f32.mxu0 %vm3270_vm1, %v3271_v24  ;;  %v1814_v20 = vand.u32 4294901760, %v4078_v18 }
  0xb2   : > { %3041 = vmatprep.subr.bf16.mxu0 %v3269_v36 }
  0xb3   : > { %v3129_v25 = vpack.c.bf16 %v1814_v20, %v1807_v14 }
  0xb5   : > { %3043 = vmatpush3.bf16.msra.mxu0 %v3042_v22  ;;  %v1802_v22 = vand.u32 4294901760, %v1801_v31 }
  0xb6   : > { %3044 = vmatprep.subr.bf16.mxu0 %v3269_v36 }
  0xb9   : > { %3046 = vmatpush3.bf16.msra.mxu0 %v3045_v28  ;;  %v1808_v28 = vsub.f32 %v4076_v13, %v1807_v14 }
  0xba   : > { %3047 = vmatprep.subr.bf16.mxu0 %v3269_v36 }
  0xbd   : > { %3049 = vmatpush3.bf16.msra.mxu0 %v3048_v40  ;;  %v1815_v40 = vsub.f32 %v4078_v18, %v1814_v20 }
  0xbe   : > { %3050 = vmatprep.subr.bf16.mxu0 %v3269_v36 }
  0xc0   : > { %2661 = vmatmul.mubr.f32.vlgmr.msra.gmra.mrb[6].mxu0 %v3908_v12 }
  0xc1   : > { %3052 = vmatpush3.bf16.msra.mxu0 %v3883_v30  ;;  %2679 = vmatprep.mubr.msk.f32.mxu0 %vm3270_vm1, %v3271_v24 }
  0xc2   : > { %3053 = vmatprep.subr.bf16.mxu0 %v3269_v36 }
  0xc5   : > { %3055 = vmatpush3.bf16.msra.mxu0 %v3911_v10 }
  0xc6   : > { %3056 = vmatprep.subr.bf16.mxu0 %v3269_v36 }
  0xc9   : > { %3058 = vmatpush3.bf16.msra.mxu0 %v3922_v53 }
  0xca   : > { %3059 = vmatprep.subr.bf16.mxu0 %v3269_v36 }
  0xcd   : > { %3061 = vmatpush3.bf16.msra.mxu0 %v3941_v41 }
  0xce   : > { %3062 = vmatprep.subr.bf16.mxu0 %v3269_v36 }
  0xd0   : > { %2680 = vmatmul.mubr.f32.vlgmr.msra.gmra.mrb[6].mxu0 %v1216_v26 }
  0xd1   : > { %3064 = vmatpush3.bf16.msra.mxu0 %v3063_v46  ;;  %2698 = vmatprep.mubr.msk.f32.mxu0 %vm3270_vm1, %v3271_v24  ;;  %v3099_v46 = vpack.c.bf16 %v1802_v22, %v1795_v49 }
  0xd2   : > { %3065 = vmatprep.subr.bf16.mxu0 %v3269_v36 }
  0xd5   : > { %3067 = vmatpush3.bf16.msra.mxu0 %v3066_v63  ;;  %v1809_v63 = vand.u32 4294901760, %v1808_v28 }
  0xd6   : > { %3068 = vmatprep.subr.bf16.mxu0 %v3269_v36 }
  0xd9   : > { %3070 = vmatpush3.bf16.msra.mxu0 %v3069_v17  ;;  %v1816_v17 = vand.u32 4294901760, %v1815_v40 }
  0xda   : > { %3071 = vmatprep.subr.bf16.mxu0 %v3269_v36 }
  0xdd   : > { %3073 = vmatpush3.bf16.msra.mxu0 %v3072_v51  ;;  %v3102_v51 = vpack.c.bf16 %v1816_v17, %v1809_v63 }
  0xde   : > { %3074 = vmatprep.subr.bf16.mxu0 %v3269_v36 }
  0xe0   : > { %2699 = vmatmul.mubr.f32.vlgmr.msra.gmra.mrb[6].mxu0 %v3880_v6 }
  0xe1   : > { %3076 = vmatpush3.bf16.msra.mxu0 %v3883_v30  ;;  %2717 = vmatprep.mubr.msk.f32.mxu0 %vm3270_vm1, %v3271_v24  ;;  %v260_v30 = vld [vmem:[%s4195_s2] sm:$0x1] }
  0xe2   : > { %3077 = vmatprep.subr.bf16.mxu0 %v3269_v36 }
  0xe5   : > { %3079 = vmatpush3.bf16.msra.mxu0 %v3911_v10 }
  0xe6   : > { %3080 = vmatprep.subr.bf16.mxu0 %v3269_v36 }
  0xe9   : > { %3082 = vmatpush3.bf16.msra.mxu0 %v3922_v53 }
  0xea   : > { %3083 = vmatprep.subr.bf16.mxu0 %v3269_v36 }
  0xed   : > { %3085 = vmatpush3.bf16.msra.mxu0 %v3941_v41  ;;  %v4062_v41 = vsub.f32 %v1678_v32, %v1695_v21 }
  0xef   : > { %v1779_v60 = vand.u32 4294901760, %v4062_v41 }
  0xf0   : > { %2718 = vmatmul.mubr.f32.vlgmr.msra.gmra.mrb[6].mxu0 %v3880_v6  ;;  %v1679_v6 = vld [vmem:[%s4196_s3 + $0x8] sm:$0xff] }
  0xf1   : > { %v1698_v12 = vand.u32 4294901760, %v1679_v6  ;;  %v1780_v52 = vsub.f32 %v4062_v41, %v1779_v60 }
  0xf3   : > { %v4044_v10 = vpack.c.bf16 %v1698_v12, %v1695_v21  ;;  %v4064_v44 = vsub.f32 %v1679_v6, %v1698_v12  ;;  %v1781_v38 = vand.u32 4294901760, %v1780_v52  ;;  %v3126_v12 = vpack.c.bf16 %v1800_v57, %v1793_v56 }
  0xf5   : > { %3088 = vmatpush3.bf16.msra.mxu1 %v4044_v10  ;;  %v1786_v2 = vand.u32 4294901760, %v4064_v44 }
  0xf6   : > { %3089 = vmatprep.subr.bf16.mxu1 %v3269_v36 }
  0xf7   : > { %v1787_v62 = vsub.f32 %v4064_v44, %v1786_v2  ;;  %v3123_v21 = vpack.c.bf16 %v1786_v2, %v1779_v60 }
  0xf9   : > { %3091 = vmatpush3.bf16.msra.mxu1 %v4054_v15  ;;  %v1788_v1 = vand.u32 4294901760, %v1787_v62 }
  0xfa   : > { %3092 = vmatprep.subr.bf16.mxu1 %v3269_v36 }
  0xfb   : > { %v3096_v54 = vpack.c.bf16 %v1788_v1, %v1781_v38 }
  0xfd   : > { %3094 = vmatpush3.bf16.msra.mxu1 %v4070_v47 }
  0xfe   : > { %2732 = vmatprep.subr.mxu1 %v3271_v24 }
 0x101   : > { %2733 = vmatpush3.msra.mxu1 %v4087_v43 }
 0x102   : > { %3095 = vmatprep.subr.bf16.mxu1 %v3269_v36 }
 0x123   : > { %v2326_v50 = vpop.f32.mrb[0].mxu0 }
 0x124   : > { %v2327_v3 = vpop.f32.mrb[1].mxu0 }
 0x125   : > { %v2328_v9 = vadd.f32 %v2327_v3, %v2326_v50  ;;  %v2361_v58 = vpop.f32.mrb[0].mxu1  ;;  %v3105_v50 = vpack.c.bf16 %v4064_v44, %v4062_v41  ;;  %v3108_v3 = vpack.c.bf16 %v4074_v0, %v4072_v59 }
 0x126   : > { %v2362_v7 = vpop.f32.mrb[1].mxu1 }
 0x127   : > { %v388_v37 = vadd.f32 %v2328_v9, %v260_v30  ;;  %v2363_v55 = vadd.f32 %v2362_v7, %v2361_v58  ;;  %v3111_v7 = vpack.c.bf16 %v4078_v18, %v4076_v13 }
 0x129   : > { %v620_v61 = vadd.f32 %v2363_v55, %v388_v37 }
 0x143   : > { %v2396_v42 = vpop.f32.mrb[2].mxu0 }
 0x144   : > { %v2397_v53 = vpop.f32.mrb[3].mxu0 }
 0x145   : > { %v2398_v33 = vadd.f32 %v2397_v53, %v2396_v42  ;;  %v2431_v26 = vpop.f32.mrb[2].mxu1 }
 0x146   : > { %v2432_v39 = vpop.f32.mrb[3].mxu1 }
 0x147   : > { %v758_v29 = vadd.f32 %v2398_v33, %v620_v61  ;;  %v2433_v5 = vadd.f32 %v2432_v39, %v2431_v26  ;;  %v1821_v39 = vand.u32 4294901760, %v1820_v4 }
 0x149   : > { %v866_v23 = vadd.f32 %v2433_v5, %v758_v29  ;;  %v1822_v41 = vsub.f32 %v1820_v4, %v1821_v39 }
 0x14b   : > { %v1823_v44 = vand.u32 4294901760, %v1822_v41 }
 0x163   : > { %v2466_v30 = vpop.f32.mrb[4].mxu0 }
 0x164   : > { %v2467_v9 = vpop.f32.mrb[5].mxu0 }
 0x165   : > { %v2468_v58 = vadd.f32 %v2467_v9, %v2466_v30  ;;  %v2501_v37 = vpop.f32.mrb[4].mxu1 }
 0x166   : > { %v2502_v61 = vpop.f32.mrb[5].mxu1 }
 0x167   : > { %v1034_v55 = vadd.f32 %v2468_v58, %v866_v23  ;;  %v2503_v32 = vadd.f32 %v2502_v61, %v2501_v37 }
 0x169   : > { %v1138_v6 = vadd.f32 %v2503_v32, %v1034_v55 }
 0x1c3   : > { %v1674_v11 = vpop.f32.mrb[6].mxu0 }
 0x1c4   : > { %v3140_v42 = vadd.f32 %v1674_v11, %v1138_v6  ;;  %v2719_v35 = vpop.f32.mrb[7].mxu0 }
 0x1c6   : > { %v1688_v45 = vsel %vm1686_vm3, %v3140_v42, 0 }
 0x1c7   : > { %v1766_v53 = vand.u32 4294901760, %v1688_v45 }
 0x1c9   : > { %v1767_v33 = vsub.f32 %v1688_v45, %v1766_v53 }
 0x1cb   : > { %v1768_v26 = vand.u32 4294901760, %v1767_v33 }
 0x1cd   : > { %v1769_v27 = vsub.f32 %v1767_v33, %v1768_v26 }
 0x1cf   : > { %v1770_v29 = vand.u32 4294901760, %v1769_v27 }
 0x1d1   : > { %2735 = vmatmul.mubr.f32.vlgmr.msra.gmra.mrb[6].mxu1 %v1770_v29 }
 0x1d2   : > { %3097 = vmatpush3.bf16.msra.mxu1 %v3096_v54  ;;  %2751 = vmatprep.mubr.msk.f32.mxu1 %vm3270_vm1, %v3271_v24 }
 0x1d3   : > { %3098 = vmatprep.subr.bf16.mxu1 %v3269_v36 }
 0x1d6   : > { %3100 = vmatpush3.bf16.msra.mxu1 %v3099_v46 }
 0x1d7   : > { %3101 = vmatprep.subr.bf16.mxu1 %v3269_v36 }
 0x1da   : > { %3103 = vmatpush3.bf16.msra.mxu1 %v3102_v51 }
 0x1db   : > { %2749 = vmatprep.subr.mxu1 %v3271_v24 }
 0x1de   : > { %2750 = vmatpush3.msra.mxu1 %v1823_v44 }
 0x1df   : > { %2752 = vmatmul.mubr.f32.vlgmr.msra.gmra.mrb[6].mxu1 %v1766_v53  ;;  %3104 = vmatprep.subr.bf16.mxu1 %v3269_v36 }
 0x1e0   : > { %3106 = vmatpush3.bf16.msra.mxu1 %v3105_v50  ;;  %2768 = vmatprep.mubr.msk.f32.mxu1 %vm3270_vm1, %v3271_v24 }
 0x1e1   : > { %3107 = vmatprep.subr.bf16.mxu1 %v3269_v36 }
 0x1e4   : > { %3109 = vmatpush3.bf16.msra.mxu1 %v3108_v3 }
 0x1e5   : > { %3110 = vmatprep.subr.bf16.mxu1 %v3269_v36 }
 0x1e8   : > { %3112 = vmatpush3.bf16.msra.mxu1 %v3111_v7 }
 0x1e9   : > { %2766 = vmatprep.subr.mxu1 %v3271_v24 }
 0x1ec   : > { %2767 = vmatpush3.msra.mxu1 %v1820_v4 }
 0x1ed   : > { %2769 = vmatmul.mubr.f32.vlgmr.msra.gmra.mrb[6].mxu1 %v1767_v33  ;;  %3113 = vmatprep.subr.bf16.mxu1 %v3269_v36 }
 0x1ee   : > { %3115 = vmatpush3.bf16.msra.mxu1 %v4044_v10  ;;  %2785 = vmatprep.mubr.msk.f32.mxu1 %vm3270_vm1, %v3271_v24 }
 0x1ef   : > { %3116 = vmatprep.subr.bf16.mxu1 %v3269_v36 }
 0x1f2   : > { %3118 = vmatpush3.bf16.msra.mxu1 %v4054_v15 }
 0x1f3   : > { %3119 = vmatprep.subr.bf16.mxu1 %v3269_v36 }
 0x1f6   : > { %3121 = vmatpush3.bf16.msra.mxu1 %v4070_v47 }
 0x1f7   : > { %2783 = vmatprep.subr.mxu1 %v3271_v24 }
 0x1fa   : > { %2784 = vmatpush3.msra.mxu1 %v4087_v43 }
 0x1fb   : > { %2786 = vmatmul.mubr.f32.vlgmr.msra.gmra.mrb[6].mxu1 %v1768_v26  ;;  %3122 = vmatprep.subr.bf16.mxu1 %v3269_v36 }
 0x1fc   : > { %3124 = vmatpush3.bf16.msra.mxu1 %v3123_v21  ;;  %2802 = vmatprep.mubr.msk.f32.mxu1 %vm3270_vm1, %v3271_v24 }
 0x1fd   : > { %3125 = vmatprep.subr.bf16.mxu1 %v3269_v36 }
 0x200   : > { %3127 = vmatpush3.bf16.msra.mxu1 %v3126_v12 }
 0x201   : > { %3128 = vmatprep.subr.bf16.mxu1 %v3269_v36 }
 0x204   : > { %3130 = vmatpush3.bf16.msra.mxu1 %v3129_v25 }
 0x205   : > { %2800 = vmatprep.subr.mxu1 %v3271_v24 }
 0x208   : > { %2801 = vmatpush3.msra.mxu1 %v1821_v39 }
 0x209   : > { %2803 = vmatmul.mubr.f32.vlgmr.msra.gmra.mrb[6].mxu1 %v1766_v53  ;;  %3131 = vmatprep.subr.bf16.mxu1 %v3269_v36 }
 0x20a   : > { %3133 = vmatpush3.bf16.msra.mxu1 %v4044_v10  ;;  %2819 = vmatprep.mubr.msk.f32.mxu1 %vm3270_vm1, %v3271_v24  ;;  %v1685_v10 = vld [vmem:[%s4197_s4] sm:$0x1] }
 0x20b   : > { %3134 = vmatprep.subr.bf16.mxu1 %v3269_v36 }
 0x20e   : > { %3136 = vmatpush3.bf16.msra.mxu1 %v4054_v15 }
 0x20f   : > { %3137 = vmatprep.subr.bf16.mxu1 %v3269_v36 }
 0x212   : > { %3139 = vmatpush3.bf16.msra.mxu1 %v4070_v47 }
 0x213   : > { %2817 = vmatprep.subr.mxu1 %v3271_v24 }
 0x216   : > { %2818 = vmatpush3.msra.mxu1 %v4087_v43 }
 0x217   : > { %2820 = vmatmul.mubr.f32.vlgmr.msra.gmra.mrb[6].mxu1 %v1766_v53 }
 0x2ea   : > { %v2214_v34 = vpop.f32.mrb[6].mxu1 }
 0x2eb   : > { %v3141_v15 = vadd.f32 %v2214_v34, %v1685_v10  ;;  %v2821_v5 = vpop.f32.mrb[7].mxu1 }
 0x2ed   : > { %2218 = vst [vmem:[%s214_s14] sm:$0x1] %v3141_v15 }
 0x2ee   : > { %3218 = shalt.err (!%p3215_p3)
}
 0x2ef   : > { %s3219_s7 = scalar_lea.hbm %s4151_s23, 16  ;;  %s3223_s10 = scalar_lea.hbm %s4198_s5, 32 }
 0x2f0   : > { %p3220_p4 = scmp.ne.s32.totalorder %s4151_s23, %s3219_s7  ;;  %p3224_p9 = scmp.lt.u32.totalorder %s4151_s23, %s4198_s5 }
 0x2f1   : > { %p3225_p10 = scmp.lt.u32.totalorder %s3223_s10, %s3219_s7  ;;  %p3227_p12 = scmp.lt.u32.totalorder %s3219_s7, %s4151_s23 }
 0x2f2   : > { %p3221_p7 = pnand %p3220_p4, %p3341_p5 }
 0x2f3   : > { %p3226_p11 = por %p3225_p10, %p3224_p9 }
 0x2f4   : > { %p3222_p8 = pneg %p3221_p7 }
 0x2f5   : > { %p3228_p13 = por %p3227_p12, %p3226_p11 }
 0x2f7   : > { %p3229_p0 = pnand %p3228_p13, %p3222_p8 }
 0x2f9   : > { %3232 = shalt.err (!%p3229_p0)
}
 0x2fa   : > { %3163 = dma.vmem_to_hbm [thread:$0]  (%p3341_p5), %s4153_s15, 16, %s4151_s23, %s2220_s25  }
 0x2fb PF: > { %p3169_p1 = scmp.ge.s32.totalorder %s3267_s21, 2  ;;  %s2244_s13 = sand.u32 1, %s3255_s18  }
 0x2fc   : > { %s2245_s14 = scalar_lea.sflag [#allocation3], %s2244_s13 }
 0x2fd   : > { %p3166_p2 = pnand %p3169_p1, %p3345_p6 }
 0x2ff   : > { %3250 = dma.done.wait (!%p3166_p2), %s2245_s14, 16  }
 0x300   : > { %3252 = vsyncadd (!%p3166_p2), %s2245_s14, 4294967280  ;;  %p15_p3 = scmp.ge.s32.totalorder %s3328_s24, 4   ;;  %s4300_s18 = smov %s3259_s19 }
 0x301   : > { %s4301_s19 = smov %s3263_s20  ;;  %s4302_s20 = smov %s3339_s27 }
 0x302   : > { %s4303_s21 = smov %s3328_s24  ;;  %17 = sbr.rel (!%p15_p3) target bundleno = 3 (0x3), region = 75 }
 0x309   :  { %2249 = vsyncpa [#allocation3], 1 }
 0x30a   :  { %2251 = vsyncpa [#allocation3 + $0x1], 1 }

// kernel: net_forward.2
= control target key start
LH: loop header
LB: loop body
LE: loop exit
PB: predicated region body
PF: predicated region fallthrough
CT: control target
= control target key end

     0   :  { %s5993_s18 = smov 0   ;;  %s8135_s0 = inlined_call_operand.vmem [shape: f32[2,4,25,144], index: 0, kind: input, shape index: {}]   ;;  %s8136_s1 = inlined_call_operand.vmem [shape: f32[10,25], index: 1, kind: input, shape index: {}]   ;;  %s8137_s2 = inlined_call_operand.vmem [shape: f32[10,1], index: 2, kind: input, shape index: {}]   ;;  %s8138_s3 = inlined_call_operand.vmem [shape: f32[20,250], index: 3, kind: input, shape index: {}]   ;;  %s8139_s4 = inlined_call_operand.vmem [shape: f32[20,1], index: 4, kind: input, shape index: {}]   ;;  %s8140_s5 = inlined_call_operand.vmem [shape: f32[2,20,144], index: 5, kind: output, shape index: {}]  }
   0x1 LB: > { %s5163_s19 = sadd.s32 4294967295, %s5935_s18   ;;  %p5167_p0 = scmp.ge.s32.totalorder %s5935_s18, 1  ;;  %s5935_s18 = sphi %s5993_s18, %s15_s18  }
   0x2   : > { %p187_p1 = scmp.lt.s32.totalorder %s5935_s18, 3 }
   0x4   : > { %p188_p2 = pnand %p5167_p0, %p187_p1 }
   0x6   : > { %191 = sbr.rel (%p188_p2) target bundleno = 1202 (0x4b2), region = 40 }
   0xd   : > { %p215_p3 = scmp.lt.s32.totalorder %s5163_s19, 1  ;;  %v225_v0 = vld [vmem:[%s8136_s1] sm:$0xff]  ;;  %vm235_vm0 = vcmask 203776   ;;  %v8169_v1 = vmov 0.0   ;;  %v226_v3 = vld [vmem:[%s8136_s1 + $0x8] sm:$0x3] }
   0xe   : > { %321 = vmatprep.mubr.f32.mxu0 %v8169_v1  ;;  %2677 = vst [vmem:[#allocation2 + $0x10] sm:$0x3] %v8169_v1  ;;  %3552 = vst [vmem:[#allocation4 + $0x20] sm:$0xf] %v8169_v1  ;;  %928 = vmatprep.mubr.f32.mxu1 %v8169_v1  ;;  %v237_v2 = vsel %vm235_vm0, %v225_v0, 0  ;;  %v2680_v4 = vld [vmem:[%s8137_s2] sm:$0xff] }
   0xf   : > { %s8715_s19 = smov (!%p215_p3, %s5163_s19), 1  ;;  %v6016_v5 = vand.u32 4294901760, %v237_v2  ;;  %v240_v6 = vsel %vm235_vm0, %v226_v3, 0  ;;  %v5938_v7 = vmov 0   ;;  %v2681_v10 = vld [vmem:[%s8137_s2 + $0x8] sm:$0x3] }
  0x10   : > { %5925 = vset.pattern.permute.xlu0 %v5938_v7  ;;  %5926 = vset.pattern.permute.xlu1 %v5938_v7  ;;  %v6018_v8 = vand.u32 4294901760, %v240_v6  ;;  %s5197_s26 = sshll.u32 %s8715_s19, 8  ;;  %vm242_vm1 = vcmask 1040384   ;;  %vm2675_vm2 = vcmask 654336   ;;  %vm2678_vm3 = vcmask 648192   ;;  %s5939_s7 = smov 124  }
  0x11   : > { %2684 = vperm.xlu0 %5925, %v2680_v4   ;;  %v6022_v9 = vsub.f32 %v237_v2, %v6016_v5  ;;  %s6030_s6 = scalar_lea.vmem %s8135_s0, %s5197_s26  ;;  %2676 = vst.msk [vmem:[#allocation2 + $0x8] sm:$0xff] %vm2675_vm2, %v8169_v1  ;;  %vm8155_vm4 = vcmask 130048   ;;  %vm2704_vm5 = vcmask 123904   ;;  %s5940_s8 = smov 113   ;;  %vm8164_vm6 = vcmask 1041408  }
  0x12   : > { %v228_v11 = vld [vmem:[%s6030_s6 + $0x8] sm:$0xff]  ;;  %v230_v12 = vld [vmem:[%s6030_s6 + $0x18] sm:$0xff]  ;;  %v227_v19 = vld [vmem:[%s6030_s6] sm:$0xff]  ;;  %v6042_v21 = vsub.f32 %v240_v6, %v6018_v8  ;;  %2679 = vst.msk [vmem:[#allocation2 + $0x18] sm:$0x3] %vm2678_vm3, %v8169_v1  ;;  %s5941_s9 = smov 102  }
  0x13   : > { %v5172_v13 = vld [vmem:[%s6030_s6 + $0x48] sm:$0xff]  ;;  %v6036_v14 = vand.u32 4294901760, %v6022_v9  ;;  %v249_v15 = vand.u32 4294901760, %v228_v11  ;;  %v253_v16 = vand.u32 4294901760, %v230_v12  ;;  %v5174_v17 = vld [vmem:[%s6030_s6 + $0x58] sm:$0xff]  ;;  %v229_v20 = vld [vmem:[%s6030_s6 + $0x10] sm:$0xff] }
  0x14   : > { %v856_v18 = vand.u32 4294901760, %v5172_v13  ;;  %v860_v22 = vand.u32 4294901760, %v5174_v17  ;;  %v251_v23 = vand.u32 4294901760, %v227_v19  ;;  %v255_v24 = vand.u32 4294901760, %v229_v20  ;;  %v5171_v25 = vld [vmem:[%s6030_s6 + $0x40] sm:$0xff]  ;;  %v5173_v26 = vld [vmem:[%s6030_s6 + $0x50] sm:$0xff] }
  0x15   : > { %2689 = vperm.xlu0 %5925, %v2681_v10   ;;  %v232_v27 = vld [vmem:[%s6030_s6 + $0x28] sm:$0xff]  ;;  %v325_v28 = vsub.f32 %v6022_v9, %v6036_v14  ;;  %v6049_v29 = vpack.c.bf16 %v253_v16, %v249_v15  ;;  %v6051_v30 = vsub.f32 %v228_v11, %v249_v15  ;;  %v6053_v31 = vsub.f32 %v230_v12, %v253_v16  ;;  %v234_v33 = vld [vmem:[%s6030_s6 + $0x38] sm:$0x1]  ;;  %v231_v44 = vld [vmem:[%s6030_s6 + $0x20] sm:$0xff]  ;;  %s5942_s10 = smov 91   ;;  %s5943_s11 = smov 80  }
  0x16   : > { %v6055_v32 = vsub.f32 %v5172_v13, %v856_v18  ;;  %v5176_v34 = vld [vmem:[%s6030_s6 + $0x68] sm:$0xff]  ;;  %v5178_v35 = vld [vmem:[%s6030_s6 + $0x78] sm:$0x1]  ;;  %v6060_v36 = vpack.c.bf16 %v860_v22, %v856_v18  ;;  %v6062_v37 = vsub.f32 %v5174_v17, %v860_v22  ;;  %v6064_v38 = vpack.c.bf16 %v255_v24, %v251_v23  ;;  %v233_v49 = vld [vmem:[%s6030_s6 + $0x30] sm:$0x1]  ;;  %s5944_s12 = smov 126  }
  0x17   : > { %v6066_v39 = vsub.f32 %v227_v19, %v251_v23  ;;  %5199 = vmatprep.subr.bf16.mxu0 %v6049_v29  ;;  %v6069_v40 = vsub.f32 %v229_v20, %v255_v24  ;;  %v858_v41 = vand.u32 4294901760, %v5171_v25  ;;  %v862_v42 = vand.u32 4294901760, %v5173_v26  ;;  %v5175_v54 = vld [vmem:[%s6030_s6 + $0x60] sm:$0xff]  ;;  %v5177_v55 = vld [vmem:[%s6030_s6 + $0x70] sm:$0x1]  ;;  %s5945_s13 = smov 125  }
  0x18   : > { %v247_v43 = vsel %vm242_vm1, %v234_v33, 0  ;;  %5247 = vmatprep.subr.bf16.mxu1 %v6060_v36  ;;  %5201 = vmatpush1.bf16.msra.mxu0 %v6064_v38  ;;  %v257_v45 = vand.u32 4294901760, %v232_v27  ;;  %v854_v47 = vsel %vm242_vm1, %v5178_v35, 0  ;;  %v864_v48 = vand.u32 4294901760, %v5176_v34  ;;  %s5946_s14 = smov 116   ;;  %s5947_s15 = smov 127  }
  0x19   : > { %v261_v46 = vand.u32 4294901760, %v247_v43  ;;  %v6077_v50 = vpack.c.bf16 %v862_v42, %v858_v41  ;;  %v6079_v51 = vsub.f32 %v5171_v25, %v858_v41  ;;  %v6081_v52 = vsub.f32 %v5173_v26, %v862_v42  ;;  %s5948_s16 = smov 115   ;;  %s5949_s17 = smov 114  }
  0x1a   : > { %v868_v53 = vand.u32 4294901760, %v854_v47  ;;  %v6087_v57 = vsub.f32 %v232_v27, %v257_v45  ;;  %v6091_v59 = vsub.f32 %v5176_v34, %v864_v48  ;;  %v244_v62 = vsel %vm242_vm1, %v233_v49, 0  ;;  %s5950_s20 = smov 112   ;;  %s5951_s21 = smov 104  }
  0x1b   : > { %v6085_v56 = vpack.c.bf16 %v261_v46, %v257_v45  ;;  %v6089_v58 = vsub.f32 %v247_v43, %v261_v46  ;;  %5249 = vmatpush1.bf16.msra.mxu1 %v6077_v50  ;;  %v259_v63 = vand.u32 4294901760, %v231_v44  ;;  %v263_v0 = vand.u32 4294901760, %v244_v62  ;;  %s5952_s22 = smov 103   ;;  %s5953_s23 = smov 101  }
  0x1c   : > { %v6094_v60 = vpack.c.bf16 %v868_v53, %v864_v48  ;;  %v6096_v61 = vsub.f32 %v854_v47, %v868_v53  ;;  %v851_v2 = vsel %vm242_vm1, %v5177_v55, 0  ;;  %v866_v3 = vand.u32 4294901760, %v5175_v54  ;;  %s5954_s24 = smov 100   ;;  %s5955_s25 = smov 92  }
  0x1d   : > { %5203 = vmatprep.subr.bf16.mxu0 %v6085_v56  ;;  %v6101_v4 = vand.u32 4294901760, %v325_v28  ;;  %v6104_v6 = vsub.f32 %v231_v44, %v259_v63  ;;  %v870_v7 = vand.u32 4294901760, %v851_v2  ;;  %v346_v10 = vand.u32 4294901760, %v6051_v30  ;;  %s5956_s26 = smov 90   ;;  %s5957_s27 = smov 89  }
  0x1e   : > { %5251 = vmatprep.subr.bf16.mxu1 %v6094_v60  ;;  %v358_v11 = vand.u32 4294901760, %v6053_v31  ;;  %v6108_v12 = vpack.c.bf16 %v263_v0, %v259_v63  ;;  %v6110_v13 = vsub.f32 %v244_v62, %v263_v0  ;;  %v6112_v15 = vsub.f32 %v5175_v54, %v866_v3  ;;  %s5958_s28 = smov 88   ;;  %s8153_s29 = smov 79  }
  0x1f   : > { %v953_v16 = vand.u32 4294901760, %v6055_v32  ;;  %v6115_v17 = vpack.c.bf16 %v870_v7, %v866_v3  ;;  %v6117_v18 = vsub.f32 %v851_v2, %v870_v7  ;;  %v347_v19 = vsub.f32 %v6051_v30, %v346_v10  ;;  %s5960_s30 = smov 78  }
  0x20   : > { %v359_v20 = vsub.f32 %v6053_v31, %v358_v11  ;;  %5205 = vmatpush1.bf16.msra.mxu0 %v6108_v12  ;;  %v965_v23 = vand.u32 4294901760, %v6062_v37  ;;  %v352_v24 = vand.u32 4294901760, %v6066_v39  ;;  %v364_v25 = vand.u32 4294901760, %v6069_v40 }
  0x21   : > { %v954_v22 = vsub.f32 %v6055_v32, %v953_v16  ;;  %5253 = vmatpush1.bf16.msra.mxu1 %v6115_v17  ;;  %v348_v26 = vand.u32 4294901760, %v347_v19  ;;  %v959_v28 = vand.u32 4294901760, %v6079_v51  ;;  %v971_v33 = vand.u32 4294901760, %v6081_v52 }
  0x22   : > { %v360_v27 = vand.u32 4294901760, %v359_v20  ;;  %v966_v35 = vsub.f32 %v6062_v37, %v965_v23  ;;  %v353_v41 = vsub.f32 %v6066_v39, %v352_v24  ;;  %v365_v42 = vsub.f32 %v6069_v40, %v364_v25 }
  0x23   : > { %v955_v34 = vand.u32 4294901760, %v954_v22  ;;  %327 = vmatmul.mubr.f32.vlgmr.msra.gmra.mrb[0].mxu0 %v6101_v4  ;;  %v960_v44 = vsub.f32 %v6079_v51, %v959_v28  ;;  %v972_v45 = vsub.f32 %v6081_v52, %v971_v33  ;;  %v6152_v46 = vand.u32 4294901760, %v6042_v21 }
  0x24   : > { %v5206_v43 = vpack.c.bf16 %v360_v27, %v348_v26  ;;  %934 = vmatmul.mubr.f32.vlgmr.msra.gmra.mrb[0].mxu1 %v6101_v4  ;;  %v967_v47 = vand.u32 4294901760, %v966_v35  ;;  %v354_v48 = vand.u32 4294901760, %v353_v41  ;;  %v366_v49 = vand.u32 4294901760, %v365_v42  ;;  %332 = vmatprep.mubr.f32.mxu0 %v8169_v1 }
  0x25   : > { %v370_v53 = vand.u32 4294901760, %v6087_v57  ;;  %v961_v54 = vand.u32 4294901760, %v960_v44  ;;  %v973_v55 = vand.u32 4294901760, %v972_v45  ;;  %939 = vmatprep.mubr.f32.mxu1 %v8169_v1  ;;  %v336_v62 = vsub.f32 %v6042_v21, %v6152_v46 }
  0x26   : > { %5207 = vmatprep.subr.bf16.mxu0 %v5206_v43  ;;  %v382_v63 = vand.u32 4294901760, %v6089_v58  ;;  %v5254_v0 = vpack.c.bf16 %v967_v47, %v955_v34  ;;  %v5208_v2 = vpack.c.bf16 %v366_v49, %v354_v48  ;;  %v977_v7 = vand.u32 4294901760, %v6091_v59 }
  0x27   : > { %v371_v3 = vsub.f32 %v6087_v57, %v370_v53  ;;  %v5256_v19 = vpack.c.bf16 %v973_v55, %v961_v54  ;;  %v6165_v20 = vand.u32 4294901760, %v336_v62  ;;  %v989_v26 = vand.u32 4294901760, %v6096_v61 }
  0x28   : > { %v383_v22 = vsub.f32 %v6089_v58, %v382_v63  ;;  %5255 = vmatprep.subr.bf16.mxu1 %v5254_v0  ;;  %5209 = vmatpush1.bf16.msra.mxu0 %v5208_v2  ;;  %v978_v34 = vsub.f32 %v6091_v59, %v977_v7  ;;  %v376_v35 = vand.u32 4294901760, %v6104_v6  ;;  %v388_v41 = vand.u32 4294901760, %v6110_v13 }
  0x29   : > { %v372_v27 = vand.u32 4294901760, %v371_v3  ;;  %5257 = vmatpush1.bf16.msra.mxu1 %v5256_v19  ;;  %338 = vmatmul.mubr.f32.gmra.mrb[2].mxu0 %v6165_v20  ;;  %v990_v43 = vsub.f32 %v6096_v61, %v989_v26  ;;  %v8141_v44 = vand.u32 4294901760, %v6112_v15  ;;  %v8142_v45 = vand.u32 4294901760, %v6117_v18 }
  0x2a   : > { %v384_v42 = vand.u32 4294901760, %v383_v22  ;;  %945 = vmatmul.mubr.f32.gmra.mrb[2].mxu1 %v6165_v20  ;;  %v979_v47 = vand.u32 4294901760, %v978_v34  ;;  %v377_v48 = vsub.f32 %v6104_v6, %v376_v35  ;;  %v389_v49 = vsub.f32 %v6110_v13, %v388_v41  ;;  %448 = vmatprep.mubr.f32.mxu0 %v8169_v1 }
  0x2b   : > { %v991_v55 = vand.u32 4294901760, %v990_v43  ;;  %v984_v62 = vsub.f32 %v6112_v15, %v8141_v44  ;;  %v996_v0 = vsub.f32 %v6117_v18, %v8142_v45  ;;  %1055 = vmatprep.mubr.f32.mxu1 %v8169_v1  ;;  %v5262_v43 = vpack.c.bf16 %v6062_v37, %v6055_v32 }
  0x2c   : > { %v5210_v54 = vpack.c.bf16 %v384_v42, %v372_v27  ;;  %v378_v2 = vand.u32 4294901760, %v377_v48  ;;  %v390_v3 = vand.u32 4294901760, %v389_v49  ;;  %v5214_v27 = vpack.c.bf16 %v6053_v31, %v6051_v30  ;;  %v5179_v31 = vld [vmem:[%s6030_s6 + $0x80] sm:$0xff] }
  0x2d   : > { %v5258_v19 = vpack.c.bf16 %v991_v55, %v979_v47  ;;  %v985_v22 = vand.u32 4294901760, %v984_v62  ;;  %v997_v34 = vand.u32 4294901760, %v996_v0  ;;  %v5216_v45 = vpack.c.bf16 %v6069_v40, %v6066_v39  ;;  %v5182_v55 = vld [vmem:[%s6030_s6 + $0x98] sm:$0xff]  ;;  %v5188_v62 = vld [vmem:[%s6030_s6 + $0xc8] sm:$0xff] }
  0x2e   : > { %5211 = vmatprep.subr.bf16.mxu0 %v5210_v54  ;;  %v5212_v42 = vpack.c.bf16 %v390_v3, %v378_v2  ;;  %v5264_v47 = vpack.c.bf16 %v6081_v52, %v6079_v51  ;;  %v5218_v48 = vpack.c.bf16 %v6089_v58, %v6087_v57  ;;  %v5266_v49 = vpack.c.bf16 %v6096_v61, %v6091_v59  ;;  %v5190_v0 = vld [vmem:[%s6030_s6 + $0xd8] sm:$0xff] }
  0x2f   : > { %5259 = vmatprep.subr.bf16.mxu1 %v5258_v19  ;;  %v5260_v44 = vpack.c.bf16 %v997_v34, %v985_v22  ;;  %v5220_v54 = vpack.c.bf16 %v6110_v13, %v6104_v6  ;;  %v5230_v2 = vpack.c.bf16 %v358_v11, %v346_v10  ;;  %v1471_v19 = vand.u32 4294901760, %v5182_v55  ;;  %v5181_v10 = vld [vmem:[%s6030_s6 + $0x90] sm:$0xff]  ;;  %v5186_v11 = vld [vmem:[%s6030_s6 + $0xb8] sm:$0x1]  ;;  %v5192_v13 = vld [vmem:[%s6030_s6 + $0xe8] sm:$0xff] }
  0x30   : > { %5213 = vmatpush1.bf16.msra.mxu0 %v5212_v42  ;;  %v5278_v22 = vpack.c.bf16 %v965_v23, %v953_v16  ;;  %v5232_v30 = vpack.c.bf16 %v364_v25, %v352_v24  ;;  %v5280_v32 = vpack.c.bf16 %v971_v33, %v959_v28  ;;  %v5234_v37 = vpack.c.bf16 %v382_v63, %v370_v53  ;;  %v5187_v16 = vld [vmem:[%s6030_s6 + $0xc0] sm:$0xff]  ;;  %v5189_v23 = vld [vmem:[%s6030_s6 + $0xd0] sm:$0xff]  ;;  %v5194_v24 = vld [vmem:[%s6030_s6 + $0xf8] sm:$0x1] }
  0x31   : > { %5261 = vmatpush1.bf16.msra.mxu1 %v5260_v44  ;;  %5215 = vmatprep.subr.bf16.mxu0 %v5214_v27  ;;  %v5268_v44 = vpack.c.bf16 %v6117_v18, %v6112_v15  ;;  %v2078_v39 = vand.u32 4294901760, %v5188_v62  ;;  %v2082_v40 = vand.u32 4294901760, %v5190_v0  ;;  %v5282_v51 = vpack.c.bf16 %v989_v26, %v977_v7  ;;  %v5184_v28 = vld [vmem:[%s6030_s6 + $0xa8] sm:$0xff]  ;;  %v5185_v33 = vld [vmem:[%s6030_s6 + $0xb0] sm:$0x1]  ;;  %v5183_v27 = vld [vmem:[%s6030_s6 + $0xa0] sm:$0xff] }
  0x32   : > { %5263 = vmatprep.subr.bf16.mxu1 %v5262_v43  ;;  %v5236_v52 = vpack.c.bf16 %v388_v41, %v376_v35  ;;  %v8322_v57 = vand.u32 4294901760, %v6112_v15  ;;  %v8323_v58 = vand.u32 4294901760, %v6117_v18  ;;  %v1469_v61 = vand.u32 4294901760, %v5179_v31  ;;  %v5193_v26 = vld [vmem:[%s6030_s6 + $0xf0] sm:$0x1] }
  0x33   : > { %450 = vmatmul.mubr.f32.vlgmr.msra.gmra.mrb[0].mxu0 %v6016_v5  ;;  %v1473_v53 = vand.u32 4294901760, %v5181_v10  ;;  %v1465_v6 = vsel %vm242_vm1, %v5186_v11, 0  ;;  %v2080_v18 = vand.u32 4294901760, %v5187_v16  ;;  %v2084_v63 = vand.u32 4294901760, %v5189_v23 }
  0x34   : > { %1057 = vmatmul.mubr.f32.vlgmr.msra.gmra.mrb[0].mxu1 %v6016_v5  ;;  %5217 = vmatpush1.bf16.msra.mxu0 %v5216_v45  ;;  %v5180_v45 = vld [vmem:[%s6030_s6 + $0x88] sm:$0xff]  ;;  %v5284_v25 = vpack.c.bf16 %v8323_v58, %v8322_v57  ;;  %v2076_v7 = vsel %vm242_vm1, %v5194_v24, 0  ;;  %v6291_v35 = vsub.f32 %v5182_v55, %v1471_v19  ;;  %v6293_v41 = vpack.c.bf16 %v2082_v40, %v2078_v39 }
  0x35   : > { %5265 = vmatpush1.bf16.msra.mxu1 %v5264_v47  ;;  %455 = vmatprep.mubr.f32.mxu0 %v8169_v1  ;;  %v1467_v3 = vand.u32 4294901760, %v5180_v45  ;;  %v1475_v34 = vand.u32 4294901760, %v5184_v28  ;;  %v1462_v42 = vsel %vm242_vm1, %v5185_v33, 0  ;;  %v6298_v43 = vsub.f32 %v5188_v62, %v2078_v39 }
  0x36   : > { %1062 = vmatprep.mubr.f32.mxu1 %v8169_v1  ;;  %5219 = vmatprep.subr.bf16.mxu0 %v5218_v48  ;;  %v6300_v47 = vsub.f32 %v5190_v0, %v2082_v40  ;;  %v1479_v48 = vand.u32 4294901760, %v1465_v6  ;;  %v2090_v55 = vand.u32 4294901760, %v2076_v7  ;;  %v6310_v62 = vsub.f32 %v5181_v10, %v1473_v53 }
  0x37   : > { %457 = vmatmul.mubr.f32.gmra.mrb[2].mxu0 %v6018_v8  ;;  %5267 = vmatprep.subr.bf16.mxu1 %v5266_v49  ;;  %v6281_v59 = vpack.c.bf16 %v1471_v19, %v1467_v3  ;;  %v6286_v15 = vsub.f32 %v5180_v45, %v1467_v3  ;;  %v2086_v49 = vand.u32 4294901760, %v5192_v13  ;;  %v6306_v45 = vsub.f32 %v5179_v31, %v1469_v61 }
  0x38   : > { %1064 = vmatmul.mubr.f32.gmra.mrb[2].mxu1 %v6018_v8  ;;  %5221 = vmatpush1.bf16.msra.mxu0 %v5220_v54  ;;  %v5191_v54 = vld [vmem:[%s6030_s6 + $0xe0] sm:$0xff]  ;;  %v6312_v0 = vpack.c.bf16 %v2084_v63, %v2080_v18  ;;  %v1477_v3 = vand.u32 4294901760, %v5183_v27  ;;  %v1481_v19 = vand.u32 4294901760, %v1462_v42  ;;  %v6319_v31 = vsub.f32 %v5184_v28, %v1475_v34  ;;  %s5961_s6 = smov 77  }
  0x39   : > { %5269 = vmatpush1.bf16.msra.mxu1 %v5268_v44  ;;  %543 = vmatprep.mubr.f32.mxu0 %v8169_v1  ;;  %v6304_v44 = vpack.c.bf16 %v1473_v53, %v1469_v61  ;;  %v2088_v11 = vand.u32 4294901760, %v5191_v54  ;;  %v6324_v10 = vsub.f32 %v1465_v6, %v1479_v48  ;;  %v6330_v40 = vpack.c.bf16 %v2090_v55, %v2086_v49 }
  0x3a   : > { %1150 = vmatprep.mubr.f32.mxu1 %v8169_v1  ;;  %5223 = vmatprep.subr.bf16.mxu0 %v6049_v29  ;;  %v1576_v24 = vand.u32 4294901760, %v6291_v35  ;;  %v2175_v57 = vand.u32 4294901760, %v6298_v43  ;;  %v6346_v58 = vsub.f32 %v1462_v42, %v1481_v19  ;;  %v1570_v28 = vand.u32 4294901760, %v6306_v45 }
  0x3b   : > { %546 = vmatmul.mubr.f32.vlgmr.msra.gmra.mrb[0].mxu0 %v6022_v9  ;;  %5271 = vmatprep.subr.bf16.mxu1 %v6060_v36  ;;  %vm2758_vm7 = vcmask 1043456   ;;  %vm2794_vm8 = vcmask 1045504   ;;  %vm2837_vm9 = vcmask 1014784   ;;  %vm2963_vm10 = vcmask 924672  }
  0x3c   : > { %1153 = vmatmul.mubr.f32.vlgmr.msra.gmra.mrb[0].mxu1 %v6022_v9  ;;  %5225 = vmatpush1.bf16.msra.mxu0 %v6064_v38  ;;  %v8147_v42 = vand.u32 4294901760, %v6346_v58  ;;  %vm3089_vm11 = vcmask 834560   ;;  %vm3215_vm12 = vcmask 744448   ;;  %vm2737_vm13 = vcmask 1039360  }
  0x3d   : > { %5273 = vmatpush1.bf16.msra.mxu1 %v6077_v50  ;;  %551 = vmatprep.mubr.f32.mxu0 %v8169_v1  ;;  %vm2745_vm14 = vcmask 130050   ;;  %vm2773_vm15 = vcmask 1031168   ;;  %vm2781_vm0 = vcmask 130052   ;;  %vm2817_vm3 = vcmask 130054  }
  0x3e   : > { %1158 = vmatprep.mubr.f32.mxu1 %v8169_v1  ;;  %5227 = vmatprep.subr.bf16.mxu0 %v6085_v56 }
  0x3f   : > { %554 = vmatmul.mubr.f32.gmra.mrb[2].mxu0 %v6042_v21  ;;  %5275 = vmatprep.subr.bf16.mxu1 %v6094_v60 }
  0x40   : > { %1161 = vmatmul.mubr.f32.gmra.mrb[2].mxu1 %v6042_v21  ;;  %5229 = vmatpush1.bf16.msra.mxu0 %v6108_v12 }
  0x41   : > { %5277 = vmatpush1.bf16.msra.mxu1 %v6115_v17  ;;  %632 = vmatprep.mubr.f32.mxu0 %v8169_v1 }
  0x42   : > { %1239 = vmatprep.mubr.f32.mxu1 %v8169_v1  ;;  %5231 = vmatprep.subr.bf16.mxu0 %v5230_v2  ;;  %v2073_v2 = vsel %vm242_vm1, %v5193_v26, 0  ;;  %vm8156_vm1 = vcmask 1022976  }
  0x43   : > { %636 = vmatmul.mubr.f32.vlgmr.msra.gmra.mrb[0].mxu0 %v6036_v14  ;;  %5279 = vmatprep.subr.bf16.mxu1 %v5278_v22  ;;  %v6315_v22 = vsub.f32 %v5187_v16, %v2080_v18  ;;  %v2092_v39 = vand.u32 4294901760, %v2073_v2  ;;  %v6332_v16 = vsub.f32 %v2076_v7, %v2090_v55  ;;  %v8143_v18 = vand.u32 4294901760, %v6324_v10 }
  0x44   : > { %1243 = vmatmul.mubr.f32.vlgmr.msra.gmra.mrb[0].mxu1 %v6036_v14  ;;  %5233 = vmatpush1.bf16.msra.mxu0 %v5232_v30  ;;  %v6317_v30 = vsub.f32 %v5189_v23, %v2084_v63  ;;  %v1564_v23 = vand.u32 4294901760, %v6286_v15 }
  0x45   : > { %5281 = vmatpush1.bf16.msra.mxu1 %v5280_v32  ;;  %641 = vmatprep.mubr.f32.mxu0 %v8169_v1  ;;  %v6322_v32 = vpack.c.bf16 %v1479_v48, %v1475_v34  ;;  %v6354_v33 = vpack.c.bf16 %v2092_v39, %v2088_v11  ;;  %v6356_v61 = vsub.f32 %v2073_v2, %v2092_v39  ;;  %v8152_v53 = vand.u32 4294901760, %v6315_v22 }
  0x46   : > { %1248 = vmatprep.mubr.f32.mxu1 %v8169_v1  ;;  %5235 = vmatprep.subr.bf16.mxu0 %v5234_v37  ;;  %v6326_v37 = vsub.f32 %v5192_v13, %v2086_v49  ;;  %v1565_v6 = vsub.f32 %v6286_v15, %v1564_v23  ;;  %v8144_v13 = vand.u32 4294901760, %v6319_v31  ;;  %v8145_v26 = vand.u32 4294901760, %v6332_v16 }
  0x47   : > { %645 = vmatmul.mubr.f32.gmra.mrb[2].mxu0 %v6152_v46  ;;  %5283 = vmatprep.subr.bf16.mxu1 %v5282_v51  ;;  %v6338_v51 = vpack.c.bf16 %v1481_v19, %v1477_v3 }
  0x48   : > { %1252 = vmatmul.mubr.f32.gmra.mrb[2].mxu1 %v6152_v46  ;;  %5237 = vmatpush1.bf16.msra.mxu0 %v5236_v52  ;;  %v6340_v52 = vsub.f32 %v5183_v27, %v1477_v3  ;;  %v8146_v7 = vand.u32 4294901760, %v6326_v37  ;;  %v1566_v55 = vand.u32 4294901760, %v1565_v6  ;;  %v1589_v2 = vsub.f32 %v6319_v31, %v8144_v13 }
  0x49   : > { %5285 = vmatpush1.bf16.msra.mxu1 %v5284_v25  ;;  %739 = vmatprep.mubr.f32.mxu0 %v8169_v1  ;;  %v6348_v25 = vsub.f32 %v5191_v54, %v2088_v11  ;;  %v8151_v54 = vand.u32 4294901760, %v6356_v61  ;;  %v1601_v3 = vsub.f32 %v6324_v10, %v8143_v18  ;;  %v2212_v6 = vsub.f32 %v6332_v16, %v8145_v26 }
  0x4a   : > { %1346 = vmatprep.mubr.f32.mxu1 %v8169_v1  ;;  %5239 = vmatprep.subr.bf16.mxu0 %v6049_v29  ;;  %v2187_v29 = vand.u32 4294901760, %v6300_v47  ;;  %v8148_v27 = vand.u32 4294901760, %v6340_v52  ;;  %v2200_v39 = vsub.f32 %v6326_v37, %v8146_v7 }
  0x4b   : > { %741 = vmatmul.mubr.f32.vlgmr.msra.gmra.mrb[0].mxu0 %v6016_v5  ;;  %5287 = vmatprep.subr.bf16.mxu1 %v6060_v36  ;;  %v1582_v36 = vand.u32 4294901760, %v6310_v62  ;;  %v8150_v49 = vand.u32 4294901760, %v6348_v25 }
  0x4c   : > { %1348 = vmatmul.mubr.f32.vlgmr.msra.gmra.mrb[0].mxu1 %v6016_v5  ;;  %5241 = vmatpush1.bf16.msra.mxu0 %v6064_v38  ;;  %v8149_v38 = vand.u32 4294901760, %v6317_v30  ;;  %v2188_v63 = vsub.f32 %v6300_v47, %v2187_v29  ;;  %v1595_v13 = vsub.f32 %v6340_v52, %v8148_v27  ;;  %v1602_v27 = vand.u32 4294901760, %v1601_v3 }
  0x4d   : > { %5289 = vmatpush1.bf16.msra.mxu1 %v6077_v50  ;;  %746 = vmatprep.mubr.f32.mxu0 %v8169_v1  ;;  %v1577_v50 = vsub.f32 %v6291_v35, %v1576_v24  ;;  %v1583_v34 = vsub.f32 %v6310_v62, %v1582_v36  ;;  %v2206_v7 = vsub.f32 %v6348_v25, %v8150_v49 }
  0x4e   : > { %1353 = vmatprep.mubr.f32.mxu1 %v8169_v1  ;;  %5243 = vmatprep.subr.bf16.mxu0 %v6085_v56  ;;  %v2176_v56 = vsub.f32 %v6298_v43, %v2175_v57  ;;  %v2194_v48 = vsub.f32 %v6317_v30, %v8149_v38  ;;  %v2189_v11 = vand.u32 4294901760, %v2188_v63  ;;  %v2213_v38 = vand.u32 4294901760, %v2212_v6 }
  0x4f   : > { %748 = vmatmul.mubr.f32.gmra.mrb[2].mxu0 %v6018_v8  ;;  %5291 = vmatprep.subr.bf16.mxu1 %v6094_v60  ;;  %v1571_v60 = vsub.f32 %v6306_v45, %v1570_v28  ;;  %v1584_v18 = vand.u32 4294901760, %v1583_v34 }
  0x50   : > { %1355 = vmatmul.mubr.f32.gmra.mrb[2].mxu1 %v6018_v8  ;;  %5245 = vmatpush1.bf16.msra.mxu0 %v6108_v12  ;;  %v2182_v12 = vsub.f32 %v6315_v22, %v8152_v53  ;;  %v2177_v19 = vand.u32 4294901760, %v2176_v56  ;;  %v1607_v56 = vsub.f32 %v6346_v58, %v8147_v42  ;;  %v2195_v26 = vand.u32 4294901760, %v2194_v48 }
  0x51   : > { %5293 = vmatpush1.bf16.msra.mxu1 %v6115_v17  ;;  %826 = vmatprep.mubr.f32.mxu0 %v8169_v1  ;;  %v1578_v17 = vand.u32 4294901760, %v1577_v50  ;;  %v1572_v50 = vand.u32 4294901760, %v1571_v60  ;;  %v2218_v60 = vsub.f32 %v6356_v61, %v8151_v54  ;;  %v1590_v42 = vand.u32 4294901760, %v1589_v2 }
  0x52   : > { %1433 = vmatprep.mubr.f32.mxu1 %v8169_v1  ;;  %5295 = vmatprep.subr.bf16.mxu0 %v6281_v59  ;;  %v2183_v63 = vand.u32 4294901760, %v2182_v12  ;;  %v5350_v12 = vpack.c.bf16 %v2189_v11, %v2177_v19  ;;  %v2201_v48 = vand.u32 4294901760, %v2200_v39  ;;  %v1596_v54 = vand.u32 4294901760, %v1595_v13 }
  0x53   : > { %828 = vmatmul.mubr.f32.vlgmr.msra.gmra.mrb[0].mxu0 %v6016_v5  ;;  %5343 = vmatprep.subr.bf16.mxu1 %v6293_v41  ;;  %v5302_v34 = vpack.c.bf16 %v1578_v17, %v1566_v55  ;;  %v5304_v49 = vpack.c.bf16 %v1584_v18, %v1572_v50  ;;  %v1608_v53 = vand.u32 4294901760, %v1607_v56  ;;  %v2207_v17 = vand.u32 4294901760, %v2206_v7 }
  0x54   : > { %1435 = vmatmul.mubr.f32.vlgmr.msra.gmra.mrb[0].mxu1 %v6016_v5  ;;  %5297 = vmatpush1.bf16.msra.mxu0 %v6304_v44  ;;  %v5352_v55 = vpack.c.bf16 %v2195_v26, %v2183_v63  ;;  %v2219_v2 = vand.u32 4294901760, %v2218_v60  ;;  %v5306_v3 = vpack.c.bf16 %v1602_v27, %v1590_v42  ;;  %v5354_v19 = vpack.c.bf16 %v2213_v38, %v2201_v48 }
  0x55   : > { %5345 = vmatpush1.bf16.msra.mxu1 %v6312_v0  ;;  %833 = vmatprep.mubr.f32.mxu0 %v8169_v1  ;;  %v5308_v13 = vpack.c.bf16 %v1608_v53, %v1596_v54  ;;  %v5310_v7 = vpack.c.bf16 %v6291_v35, %v6286_v15  ;;  %v5358_v38 = vpack.c.bf16 %v6300_v47, %v6298_v43  ;;  %v8324_v35 = vand.u32 4294901760, %v6315_v22 }
  0x56   : > { %1440 = vmatprep.mubr.f32.mxu1 %v8169_v1  ;;  %5299 = vmatprep.subr.bf16.mxu0 %v6322_v32  ;;  %v5356_v18 = vpack.c.bf16 %v2219_v2, %v2207_v17  ;;  %v5360_v53 = vpack.c.bf16 %v6317_v30, %v6315_v22  ;;  %v5314_v26 = vpack.c.bf16 %v6324_v10, %v6319_v31  ;;  %v8325_v43 = vand.u32 4294901760, %v6317_v30 }
  0x57   : > { %835 = vmatmul.mubr.f32.gmra.mrb[2].mxu0 %v6018_v8  ;;  %5347 = vmatprep.subr.bf16.mxu1 %v6330_v40  ;;  %v5316_v27 = vpack.c.bf16 %v6346_v58, %v6340_v52  ;;  %v5364_v42 = vpack.c.bf16 %v6356_v61, %v6348_v25  ;;  %v5328_v15 = vpack.c.bf16 %v1582_v36, %v1570_v28  ;;  %v8327_v47 = vand.u32 4294901760, %v6324_v10 }
  0x58   : > { %1442 = vmatmul.mubr.f32.gmra.mrb[2].mxu1 %v6018_v8  ;;  %5301 = vmatpush1.bf16.msra.mxu0 %v6338_v51  ;;  %v8330_v22 = vand.u32 4294901760, %v6340_v52  ;;  %v8331_v30 = vand.u32 4294901760, %v6346_v58  ;;  %v8333_v10 = vand.u32 4294901760, %v6356_v61 }
  0x59   : > { %5349 = vmatpush1.bf16.msra.mxu1 %v6354_v33  ;;  %1539 = vmatprep.mubr.f32.mxu0 %v8169_v1 }
  0x5a   : > { %2150 = vmatprep.mubr.f32.mxu1 %v8169_v1  ;;  %5303 = vmatprep.subr.bf16.mxu0 %v5302_v34 }
  0x5b   : > { %1545 = vmatmul.mubr.f32.vlgmr.msra.gmra.mrb[4].mxu0 %v6101_v4  ;;  %5351 = vmatprep.subr.bf16.mxu1 %v5350_v12 }
  0x5c   : > { %2156 = vmatmul.mubr.f32.vlgmr.msra.gmra.mrb[4].mxu1 %v6101_v4  ;;  %5305 = vmatpush1.bf16.msra.mxu0 %v5304_v49  ;;  %v5312_v4 = vpack.c.bf16 %v6310_v62, %v6306_v45  ;;  %v5326_v49 = vpack.c.bf16 %v1576_v24, %v1564_v23  ;;  %v5376_v23 = vpack.c.bf16 %v8325_v43, %v8324_v35  ;;  %v8328_v62 = vand.u32 4294901760, %v6326_v37 }
  0x5d   : > { %5353 = vmatpush1.bf16.msra.mxu1 %v5352_v55  ;;  %1550 = vmatprep.mubr.f32.mxu0 %v8169_v1  ;;  %v8329_v24 = vand.u32 4294901760, %v6332_v16 }
  0x5e   : > { %2161 = vmatprep.mubr.f32.mxu1 %v8169_v1  ;;  %5307 = vmatprep.subr.bf16.mxu0 %v5306_v3 }
  0x5f   : > { %1556 = vmatmul.mubr.f32.gmra.mrb[6].mxu0 %v6165_v20  ;;  %5355 = vmatprep.subr.bf16.mxu1 %v5354_v19 }
  0x60   : > { %2167 = vmatmul.mubr.f32.gmra.mrb[6].mxu1 %v6165_v20  ;;  %5309 = vmatpush1.bf16.msra.mxu0 %v5308_v13  ;;  %v5362_v20 = vpack.c.bf16 %v6332_v16, %v6326_v37 }
  0x61   : > { %5357 = vmatpush1.bf16.msra.mxu1 %v5356_v18  ;;  %1666 = vmatprep.mubr.f32.mxu0 %v8169_v1 }
  0x62   : > { %2277 = vmatprep.mubr.f32.mxu1 %v8169_v1  ;;  %5311 = vmatprep.subr.bf16.mxu0 %v5310_v7 }
  0x63   : > { %1668 = vmatmul.mubr.f32.vlgmr.msra.gmra.mrb[4].mxu0 %v6016_v5  ;;  %5359 = vmatprep.subr.bf16.mxu1 %v5358_v38 }
  0x64   : > { %2279 = vmatmul.mubr.f32.vlgmr.msra.gmra.mrb[4].mxu1 %v6016_v5  ;;  %5313 = vmatpush1.bf16.msra.mxu0 %v5312_v4 }
  0x65   : > { %5361 = vmatpush1.bf16.msra.mxu1 %v5360_v53  ;;  %1673 = vmatprep.mubr.f32.mxu0 %v8169_v1 }
  0x66   : > { %2284 = vmatprep.mubr.f32.mxu1 %v8169_v1  ;;  %5315 = vmatprep.subr.bf16.mxu0 %v5314_v26 }
  0x67   : > { %1675 = vmatmul.mubr.f32.gmra.mrb[6].mxu0 %v6018_v8  ;;  %5363 = vmatprep.subr.bf16.mxu1 %v5362_v20 }
  0x68   : > { %2286 = vmatmul.mubr.f32.gmra.mrb[6].mxu1 %v6018_v8  ;;  %5317 = vmatpush1.bf16.msra.mxu0 %v5316_v27 }
  0x69   : > { %5365 = vmatpush1.bf16.msra.mxu1 %v5364_v42  ;;  %1761 = vmatprep.mubr.f32.mxu0 %v8169_v1 }
  0x6a   : > { %2372 = vmatprep.mubr.f32.mxu1 %v8169_v1  ;;  %5319 = vmatprep.subr.bf16.mxu0 %v6281_v59 }
  0x6b   : > { %1764 = vmatmul.mubr.f32.vlgmr.msra.gmra.mrb[4].mxu0 %v6022_v9  ;;  %5367 = vmatprep.subr.bf16.mxu1 %v6293_v41 }
  0x6c   : > { %2375 = vmatmul.mubr.f32.vlgmr.msra.gmra.mrb[4].mxu1 %v6022_v9  ;;  %5321 = vmatpush1.bf16.msra.mxu0 %v6304_v44  ;;  %v5374_v9 = vpack.c.bf16 %v2187_v29, %v2175_v57  ;;  %v5378_v57 = vpack.c.bf16 %v8329_v24, %v8328_v62  ;;  %v5332_v29 = vpack.c.bf16 %v8331_v30, %v8330_v22 }
  0x6d   : > { %5369 = vmatpush1.bf16.msra.mxu1 %v6312_v0  ;;  %1769 = vmatprep.mubr.f32.mxu0 %v8169_v1 }
  0x6e   : > { %2380 = vmatprep.mubr.f32.mxu1 %v8169_v1  ;;  %5323 = vmatprep.subr.bf16.mxu0 %v6322_v32 }
  0x6f   : > { %1772 = vmatmul.mubr.f32.gmra.mrb[6].mxu0 %v6042_v21  ;;  %5371 = vmatprep.subr.bf16.mxu1 %v6330_v40 }
  0x70   : > { %2383 = vmatmul.mubr.f32.gmra.mrb[6].mxu1 %v6042_v21  ;;  %5325 = vmatpush1.bf16.msra.mxu0 %v6338_v51  ;;  %v8326_v21 = vand.u32 4294901760, %v6319_v31  ;;  %v8332_v31 = vand.u32 4294901760, %v6348_v25 }
  0x71   : > { %5373 = vmatpush1.bf16.msra.mxu1 %v6354_v33  ;;  %1850 = vmatprep.mubr.f32.mxu0 %v8169_v1 }
  0x72   : > { %2461 = vmatprep.mubr.f32.mxu1 %v8169_v1  ;;  %5327 = vmatprep.subr.bf16.mxu0 %v5326_v49  ;;  %v5330_v45 = vpack.c.bf16 %v8327_v47, %v8326_v21  ;;  %v5380_v28 = vpack.c.bf16 %v8333_v10, %v8332_v31 }
  0x73   : > { %1854 = vmatmul.mubr.f32.vlgmr.msra.gmra.mrb[4].mxu0 %v6036_v14  ;;  %5375 = vmatprep.subr.bf16.mxu1 %v5374_v9 }
  0x74   : > { %2465 = vmatmul.mubr.f32.vlgmr.msra.gmra.mrb[4].mxu1 %v6036_v14  ;;  %5329 = vmatpush1.bf16.msra.mxu0 %v5328_v15 }
  0x75   : > { %5377 = vmatpush1.bf16.msra.mxu1 %v5376_v23  ;;  %1859 = vmatprep.mubr.f32.mxu0 %v8169_v1 }
  0x76   : > { %2470 = vmatprep.mubr.f32.mxu1 %v8169_v1  ;;  %5331 = vmatprep.subr.bf16.mxu0 %v5330_v45 }
  0x77   : > { %1863 = vmatmul.mubr.f32.gmra.mrb[6].mxu0 %v6152_v46  ;;  %5379 = vmatprep.subr.bf16.mxu1 %v5378_v57 }
  0x78   : > { %2474 = vmatmul.mubr.f32.gmra.mrb[6].mxu1 %v6152_v46  ;;  %5333 = vmatpush1.bf16.msra.mxu0 %v5332_v29 }
  0x79   : > { %5381 = vmatpush1.bf16.msra.mxu1 %v5380_v28  ;;  %1957 = vmatprep.mubr.f32.mxu0 %v8169_v1 }
  0x7a   : > { %2568 = vmatprep.mubr.f32.mxu1 %v8169_v1  ;;  %5335 = vmatprep.subr.bf16.mxu0 %v6281_v59 }
  0x7b   : > { %1959 = vmatmul.mubr.f32.vlgmr.msra.gmra.mrb[4].mxu0 %v6016_v5  ;;  %5383 = vmatprep.subr.bf16.mxu1 %v6293_v41 }
  0x7c   : > { %2570 = vmatmul.mubr.f32.vlgmr.msra.gmra.mrb[4].mxu1 %v6016_v5  ;;  %5337 = vmatpush1.bf16.msra.mxu0 %v6304_v44 }
  0x7d   : > { %5385 = vmatpush1.bf16.msra.mxu1 %v6312_v0  ;;  %1964 = vmatprep.mubr.f32.mxu0 %v8169_v1 }
  0x7e   : > { %2575 = vmatprep.mubr.f32.mxu1 %v8169_v1  ;;  %5339 = vmatprep.subr.bf16.mxu0 %v6322_v32 }
  0x7f   : > { %1966 = vmatmul.mubr.f32.gmra.mrb[6].mxu0 %v6018_v8  ;;  %5387 = vmatprep.subr.bf16.mxu1 %v6330_v40 }
  0x80   : > { %2577 = vmatmul.mubr.f32.gmra.mrb[6].mxu1 %v6018_v8  ;;  %5341 = vmatpush1.bf16.msra.mxu0 %v6338_v51 }
  0x81   : > { %5389 = vmatpush1.bf16.msra.mxu1 %v6354_v33  ;;  %2044 = vmatprep.mubr.f32.mxu0 %v8169_v1 }
  0x82   : > { %2655 = vmatprep.mubr.f32.mxu1 %v8169_v1 }
  0x83   : > { %2046 = vmatmul.mubr.f32.vlgmr.msra.gmra.mrb[4].mxu0 %v6016_v5 }
  0x84   : > { %2657 = vmatmul.mubr.f32.vlgmr.msra.gmra.mrb[4].mxu1 %v6016_v5  ;;  %2051 = vmatprep.mubr.f32.mxu0 %v8169_v1 }
  0x85   : > { %2662 = vmatprep.mubr.f32.mxu1 %v8169_v1 }
  0x87   : > { %2053 = vmatmul.mubr.f32.gmra.mrb[6].mxu0 %v6018_v8 }
  0x88   : > { %2664 = vmatmul.mubr.f32.gmra.mrb[6].mxu1 %v6018_v8 }
  0x90   : > { %v2685_v61 = vpop.permute.xlu0 %2684 }
  0x94   : > { %v2690_v3 = vpop.permute.xlu0 %2689 }
 0x126   : > { %v829_v14 = vpop.f32.mrb[0].mxu0 }
 0x127   : > { %v1436_v46 = vpop.f32.mrb[0].mxu1  ;;  %v831_v59 = vpop.f32.mrb[1].mxu0 }
 0x128   : > { %v1448_v41 = vmax.f32 %v829_v14, %v1436_v46  ;;  %v1438_v5 = vpop.f32.mrb[1].mxu1 }
 0x129   : > { %v1449_v44 = vmax.f32 %v831_v59, %v1438_v5 }
 0x12a   : > { %v836_v0 = vpop.f32.mrb[2].mxu0 }
 0x12b   : > { %v1443_v32 = vpop.f32.mrb[2].mxu1  ;;  %v838_v37 = vpop.f32.mrb[3].mxu0 }
 0x12c   : > { %v1450_v40 = vmax.f32 %v836_v0, %v1443_v32  ;;  %v1445_v16 = vpop.f32.mrb[3].mxu1 }
 0x12d   : > { %v1451_v51 = vmax.f32 %v838_v37, %v1445_v16 }
 0x156   : > { %v2047_v8 = vpop.f32.mrb[4].mxu0 }
 0x157   : > { %v2059_v52 = vmax.f32 %v1448_v41, %v2047_v8  ;;  %v2658_v58 = vpop.f32.mrb[4].mxu1  ;;  %v2049_v25 = vpop.f32.mrb[5].mxu0 }
 0x158   : > { %v2060_v36 = vmax.f32 %v1449_v44, %v2049_v25  ;;  %v2660_v33 = vpop.f32.mrb[5].mxu1 }
 0x159   : > { %v2670_v54 = vmax.f32 %v2059_v52, %v2658_v58 }
 0x15a   : > { %v2671_v11 = vmax.f32 %v2060_v36, %v2660_v33  ;;  %v2054_v39 = vpop.f32.mrb[6].mxu0 }
 0x15b   : > { %v2692_v6 = vadd.f32 %v2685_v61, %v2670_v54  ;;  %v2061_v50 = vmax.f32 %v1450_v40, %v2054_v39  ;;  %v2665_v56 = vpop.f32.mrb[6].mxu1  ;;  %v2056_v63 = vpop.f32.mrb[7].mxu0 }
 0x15c   : > { %v2693_v60 = vadd.f32 %v2685_v61, %v2671_v11  ;;  %v2062_v34 = vmax.f32 %v1451_v51, %v2056_v63  ;;  %v2667_v12 = vpop.f32.mrb[7].mxu1 }
 0x15d   : > { %v6554_v48 = vmax.f32 %v2692_v6, 0.0  ;;  %v2672_v55 = vmax.f32 %v2061_v50, %v2665_v56 }
 0x15e   : > { %v2697_v17 = vmax.f32 %v2693_v60, 0.0  ;;  %v2673_v2 = vmax.f32 %v2062_v34, %v2667_v12 }
 0x15f   : > { %2700 = vst [vmem:[#allocation2] sm:$0xff] %v6554_v48  ;;  %v2694_v19 = vadd.f32 %v2690_v3, %v2672_v55  ;;  %2829 = vrot.lane.b32.xlu0 %v6554_v48, %s5939_s7  ;;  %v6580_v53 = vrot.slane %v6554_v48, 4  ;;  %v6587_v26 = vrot.slane %v6554_v48, 2  ;;  %v6594_v27 = vrot.slane %v6554_v48, 6 }
 0x160   : > { %2702 = vst.msk [vmem:[#allocation2 + $0x8] sm:$0xff] %vm8155_vm4, %v2697_v17  ;;  %v2695_v13 = vadd.f32 %v2690_v3, %v2673_v2 }
 0x161   : > { %v2698_v18 = vmax.f32 %v2694_v19, 0.0 }
 0x162   : > { %v2699_v7 = vmax.f32 %v2695_v13, 0.0 }
 0x163   : > { %2703 = vst [vmem:[#allocation2 + $0x10] sm:$0x3] %v2698_v18  ;;  %2955 = vrot.lane.b32.xlu0 %v6554_v48, %s5940_s8 }
 0x164   : > { %2705 = vst.msk [vmem:[#allocation2 + $0x18] sm:$0x3] %vm2704_vm5, %v2699_v7 }
 0x167   : > { %v6563_v38 = vld [vmem:[#allocation2 + $0x8] sm:$0xff]  ;;  %3081 = vrot.lane.b32.xlu0 %v6554_v48, %s5941_s9 }
 0x168   : > { %2831 = vrot.lane.b32.xlu1 %v6563_v38, %s5939_s7  ;;  %2711 = vst.msk [vmem:[#allocation3 + $0x8] sm:$0xff] %vm8155_vm4, %v6563_v38  ;;  %v6602_v42 = vrot.slane %v6563_v38, 6  ;;  %v6609_v49 = vrot.slane %v6563_v38, 4  ;;  %v6616_v9 = vrot.slane %v6563_v38, 2 }
 0x16a   : > { %v2708_v4 = vld [vmem:[#allocation2 + $0x10] sm:$0x3] }
 0x16b   : > { %2712 = vst [vmem:[#allocation3 + $0x10] sm:$0x3] %v2708_v4  ;;  %3207 = vrot.lane.b32.xlu0 %v6554_v48, %s5942_s10  ;;  %v2709_v20 = vld [vmem:[#allocation2 + $0x18] sm:$0x3]  ;;  %v2823_v15 = vld [vmem:[#allocation2 + $0x10] sm:$0x3] }
 0x16c   : > { %2957 = vrot.lane.b32.xlu1 %v6563_v38, %s5940_s8  ;;  %2713 = vst.msk [vmem:[#allocation3 + $0x18] sm:$0x3] %vm2704_vm5, %v2709_v20  ;;  %v2949_v35 = vld [vmem:[#allocation2 + $0x10] sm:$0x3]  ;;  %v2824_v47 = vld [vmem:[#allocation2 + $0x18] sm:$0x3] }
 0x16d   : > { %v3075_v43 = vld [vmem:[#allocation2 + $0x10] sm:$0x3]  ;;  %v2950_v57 = vld [vmem:[#allocation2 + $0x18] sm:$0x3] }
 0x16e   : > { %v3201_v23 = vld [vmem:[#allocation2 + $0x10] sm:$0x3]  ;;  %v3076_v31 = vld [vmem:[#allocation2 + $0x18] sm:$0x3] }
 0x16f   : > { %3333 = vrot.lane.b32.xlu0 %v6554_v48, %s5943_s11  ;;  %v3327_v21 = vld [vmem:[#allocation2 + $0x10] sm:$0x3]  ;;  %v3202_v59 = vld [vmem:[#allocation2 + $0x18] sm:$0x3] }
 0x170   : > { %3083 = vrot.lane.b32.xlu1 %v6563_v38, %s5941_s9  ;;  %v2716_v45 = vld [vmem:[#allocation2 + $0x10] sm:$0x3]  ;;  %v3328_v32 = vld [vmem:[#allocation2 + $0x18] sm:$0x3] }
 0x171   : > { %v3452_v62 = vld [vmem:[#allocation2 + $0x10] sm:$0x3]  ;;  %v2725_v24 = vrot.slane %v2716_v45, 6  ;;  %v2717_v40 = vld [vmem:[#allocation2 + $0x18] sm:$0x3] }
 0x172   : > { %v2752_v22 = vld [vmem:[#allocation2 + $0x10] sm:$0x3]  ;;  %v3453_v25 = vld [vmem:[#allocation2 + $0x18] sm:$0x3]  ;;  %v2727_v36 = vrot.slane %v2717_v40, 6 }
 0x173   : > { %2765 = vrot.lane.b32.xlu0 %v6580_v53, %s5944_s12  ;;  %v2726_v30 = vsel %vm8164_vm6, %v6594_v27, %v2725_v24  ;;  %v2761_v29 = vrot.slane %v2752_v22, 4  ;;  %v2788_v10 = vld [vmem:[#allocation2 + $0x10] sm:$0x3]  ;;  %v2753_v61 = vld [vmem:[#allocation2 + $0x18] sm:$0x3] }
 0x174   : > { %3209 = vrot.lane.b32.xlu1 %v6563_v38, %s5942_s10  ;;  %v2797_v46 = vrot.slane %v2788_v10, 2  ;;  %v2850_v41 = vld [vmem:[#allocation2 + $0x10] sm:$0x3]  ;;  %v2728_v56 = vsel %vm8164_vm6, %v6602_v42, %v2727_v36  ;;  %v2763_v63 = vrot.slane %v2753_v61, 4  ;;  %v2789_v34 = vld [vmem:[#allocation2 + $0x18] sm:$0x3] }
 0x175   : > { %v2762_v14 = vsel %vm2758_vm7, %v6580_v53, %v2761_v29  ;;  %v2858_v0 = vrot.slane %v2850_v41, 6  ;;  %v2883_v37 = vld [vmem:[#allocation2 + $0x10] sm:$0x3]  ;;  %v2799_v7 = vrot.slane %v2789_v34, 2  ;;  %v2851_v20 = vld [vmem:[#allocation2 + $0x18] sm:$0x3] }
 0x176   : > { %v2798_v44 = vsel %vm2794_vm8, %v6587_v26, %v2797_v46  ;;  %v2891_v52 = vrot.slane %v2883_v37, 4  ;;  %v2916_v33 = vld [vmem:[#allocation2 + $0x10] sm:$0x3]  ;;  %v2764_v18 = vsel %vm2758_vm7, %v6609_v49, %v2763_v63  ;;  %v2884_v29 = vld [vmem:[#allocation2 + $0x18] sm:$0x3] }
 0x177   : > { %2801 = vrot.lane.b32.xlu0 %v6587_v26, %s5945_s13  ;;  %v2859_v8 = vsel %vm8164_vm6, %v6594_v27, %v2858_v0  ;;  %v2924_v6 = vrot.slane %v2916_v33, 2  ;;  %v2976_v60 = vld [vmem:[#allocation2 + $0x10] sm:$0x3]  ;;  %v2800_v24 = vsel %vm2794_vm8, %v6616_v9, %v2799_v7  ;;  %v2917_v0 = vld [vmem:[#allocation2 + $0x18] sm:$0x3]  ;;  %v6788_v7 = vld [vmem:[#allocation3 + $0x8] sm:$0xff] }
 0x178   : > { %3335 = vrot.lane.b32.xlu1 %v6563_v38, %s5943_s11  ;;  %v2892_v39 = vsel %vm2758_vm7, %v6580_v53, %v2891_v52  ;;  %v2984_v3 = vrot.slane %v2976_v60, 6  ;;  %v3009_v4 = vld [vmem:[#allocation2 + $0x10] sm:$0x3]  ;;  %v3010_v63 = vld [vmem:[#allocation2 + $0x18] sm:$0x3] }
 0x179   : > { %v2925_v2 = vsel %vm2794_vm8, %v6587_v26, %v2924_v6  ;;  %v3042_v22 = vld [vmem:[#allocation2 + $0x10] sm:$0x3] }
 0x17a   : > { %v3050_v46 = vrot.slane %v3042_v22, 2  ;;  %v3135_v52 = vld [vmem:[#allocation2 + $0x10] sm:$0x3] }
 0x17b   : > { %2862 = vrot.lane.b32.xlu0 %v6594_v27, %s5946_s14 }
 0x17c   : > { %2729 = vrot.lane.b32.xlu1 %v6594_v27, %s5947_s15  ;;  %v3051_v40 = vsel %vm2794_vm8, %v6587_v26, %v3050_v46 }
 0x17f   : > { %2895 = vrot.lane.b32.xlu0 %v6580_v53, %s5948_s16 }
 0x180   : > { %2731 = vrot.lane.b32.xlu1 %v6602_v42, %s5947_s15 }
 0x183   : > { %2928 = vrot.lane.b32.xlu0 %v6587_v26, %s5949_s17 }
 0x184   : > { %2767 = vrot.lane.b32.xlu1 %v6609_v49, %s5944_s12 }
 0x187   : > { %2988 = vrot.lane.b32.xlu0 %v6594_v27, %s5950_s20 }
 0x188   : > { %2803 = vrot.lane.b32.xlu1 %v6616_v9, %s5945_s13 }
 0x18b   : > { %3021 = vrot.lane.b32.xlu0 %v6580_v53, %s5951_s21 }
 0x18c   : > { %2864 = vrot.lane.b32.xlu1 %v6602_v42, %s5946_s14 }
 0x18f   : > { %3054 = vrot.lane.b32.xlu0 %v6587_v26, %s5952_s22 }
 0x190   : > { %2897 = vrot.lane.b32.xlu1 %v6609_v49, %s5948_s16 }
 0x193   : > { %3114 = vrot.lane.b32.xlu0 %v6594_v27, %s5953_s23 }
 0x194   : > { %2930 = vrot.lane.b32.xlu1 %v6616_v9, %s5949_s17 }
 0x197   : > { %3147 = vrot.lane.b32.xlu0 %v6580_v53, %s5954_s24 }
 0x198   : > { %2990 = vrot.lane.b32.xlu1 %v6602_v42, %s5950_s20 }
 0x19b   : > { %3180 = vrot.lane.b32.xlu0 %v6587_v26, %s5955_s25 }
 0x19c   : > { %3023 = vrot.lane.b32.xlu1 %v6609_v49, %s5951_s21 }
 0x19f   : > { %3240 = vrot.lane.b32.xlu0 %v6594_v27, %s5956_s26 }
 0x1a0   : > { %3056 = vrot.lane.b32.xlu1 %v6616_v9, %s5952_s22 }
 0x1a3   : > { %3273 = vrot.lane.b32.xlu0 %v6580_v53, %s5957_s27 }
 0x1a4   : > { %3116 = vrot.lane.b32.xlu1 %v6602_v42, %s5953_s23 }
 0x1a7   : > { %3306 = vrot.lane.b32.xlu0 %v6587_v26, %s5958_s28 }
 0x1a8   : > { %3149 = vrot.lane.b32.xlu1 %v6609_v49, %s5954_s24 }
 0x1ab   : > { %3365 = vrot.lane.b32.xlu0 %v6594_v27, %s8153_s29 }
 0x1ac   : > { %3182 = vrot.lane.b32.xlu1 %v6616_v9, %s5955_s25 }
 0x1af   : > { %3398 = vrot.lane.b32.xlu0 %v6580_v53, %s5960_s30 }
 0x1b0   : > { %3242 = vrot.lane.b32.xlu1 %v6602_v42, %s5956_s26 }
 0x1b3   : > { %3431 = vrot.lane.b32.xlu0 %v6587_v26, %s5961_s6 }
 0x1b4   : > { %3275 = vrot.lane.b32.xlu1 %v6609_v49, %s5957_s27 }
 0x1b7   : > { %2833 = vrot.lane.b32.xlu0 %v2823_v15, %s5939_s7 }
 0x1b8   : > { %3308 = vrot.lane.b32.xlu1 %v6616_v9, %s5958_s28 }
 0x1bb   : > { %2959 = vrot.lane.b32.xlu0 %v2949_v35, %s5940_s8 }
 0x1bc   : > { %3367 = vrot.lane.b32.xlu1 %v6602_v42, %s8153_s29  ;;  %s5962_s29 = smov 76  }
 0x1bf   : > { %3085 = vrot.lane.b32.xlu0 %v3075_v43, %s5941_s9 }
 0x1c0   : > { %3400 = vrot.lane.b32.xlu1 %v6609_v49, %s5960_s30 }
 0x1c3   : > { %3211 = vrot.lane.b32.xlu0 %v3201_v23, %s5942_s10  ;;  %v2985_v23 = vsel %vm8164_vm6, %v6594_v27, %v2984_v3 }
 0x1c4   : > { %3433 = vrot.lane.b32.xlu1 %v6616_v9, %s5961_s6 }
 0x1c7   : > { %3337 = vrot.lane.b32.xlu0 %v3327_v21, %s5943_s11  ;;  %v3017_v21 = vrot.slane %v3009_v4, 4  ;;  %v3043_v4 = vld [vmem:[#allocation2 + $0x18] sm:$0x3] }
 0x1c8   : > { %2835 = vrot.lane.b32.xlu1 %v2824_v47, %s5939_s7  ;;  %s8341_s7 = smov 79  }
 0x1cb   : > { %3462 = vrot.lane.b32.xlu0 %v3452_v62, %s5962_s29 }
 0x1cc   : > { %2961 = vrot.lane.b32.xlu1 %v2950_v57, %s5940_s8  ;;  %v2860_v57 = vrot.slane %v2851_v20, 6 }
 0x1ce   : > { %v2861_v41 = vsel %vm8164_vm6, %v6602_v42, %v2860_v57 }
 0x1cf   : > { %2733 = vrot.lane.b32.xlu0 %v2726_v30, %s5947_s15 }
 0x1d0   : > { %3087 = vrot.lane.b32.xlu1 %v3076_v31, %s5941_s9 }
 0x1d1   : > { %v2830_v28 = vpop.permute.xlu0 %2829 }
 0x1d3   : > { %2769 = vrot.lane.b32.xlu0 %v2762_v14, %s5944_s12  ;;  %v3018_v14 = vsel %vm2758_vm7, %v6580_v53, %v3017_v21  ;;  %v8173_v21 = vand.u32 4294901760, %v6788_v7 }
 0x1d4   : > { %3213 = vrot.lane.b32.xlu1 %v3202_v59, %s5942_s10 }
 0x1d5   : > { %v2956_v5 = vpop.permute.xlu0 %2955 }
 0x1d7   : > { %2805 = vrot.lane.b32.xlu0 %v2798_v44, %s5945_s13  ;;  %v3102_v44 = vld [vmem:[#allocation2 + $0x10] sm:$0x3] }
 0x1d8   : > { %3339 = vrot.lane.b32.xlu1 %v3328_v32, %s5943_s11 }
 0x1d9   : > { %v3082_v16 = vpop.permute.xlu0 %3081 }
 0x1da   : > { %v2832_v51 = vpop.permute.xlu1 %2831 }
 0x1db   : > { %v6697_v58 = vsel %vm2837_vm9, %v2830_v28, %v2832_v51  ;;  %2845 = vst.msk [vmem:[#allocation3 + $0x58] sm:$0xff] %vm8155_vm4, %v2832_v51  ;;  %2866 = vrot.lane.b32.xlu0 %v2859_v8, %s5946_s14  ;;  %v2926_v8 = vrot.slane %v2917_v0, 2  ;;  %v3261_v0 = vld [vmem:[#allocation2 + $0x10] sm:$0x3] }
 0x1dc   : > { %2844 = vst [vmem:[#allocation3 + $0x50] sm:$0xff] %v6697_v58  ;;  %3464 = vrot.lane.b32.xlu1 %v3453_v25, %s5962_s29  ;;  %v2977_v25 = vld [vmem:[#allocation2 + $0x18] sm:$0x3] }
 0x1dd   : > { %v3208_v54 = vpop.permute.xlu0 %3207  ;;  %v2986_v6 = vrot.slane %v2977_v25, 6 }
 0x1de   : > { %v2958_v11 = vpop.permute.xlu1 %2957 }
 0x1df   : > { %v6706_v50 = vsel %vm2963_vm10, %v2956_v5, %v2958_v11  ;;  %2971 = vst.msk [vmem:[#allocation3 + $0xa8] sm:$0xff] %vm8155_vm4, %v2958_v11  ;;  %2899 = vrot.lane.b32.xlu0 %v2892_v39, %s5948_s16  ;;  %v2893_v5 = vrot.slane %v2884_v29, 4  ;;  %v2927_v39 = vsel %vm2794_vm8, %v6616_v9, %v2926_v8  ;;  %v2987_v3 = vsel %vm8164_vm6, %v6602_v42, %v2986_v6 }
 0x1e0   : > { %2735 = vrot.lane.b32.xlu1 %v2728_v56, %s5947_s15  ;;  %v8178_v12 = vand.u32 4294901760, %v6706_v50  ;;  %v3168_v56 = vld [vmem:[#allocation2 + $0x10] sm:$0x3]  ;;  %v3052_v29 = vrot.slane %v3043_v4, 2 }
 0x1e1   : > { %v3334_v55 = vpop.permute.xlu0 %3333  ;;  %v2894_v51 = vsel %vm2758_vm7, %v6609_v49, %v2893_v5 }
 0x1e2   : > { %v3084_v17 = vpop.permute.xlu1 %3083  ;;  %v6719_v19 = vsub.f32 %v6706_v50, %v8178_v12  ;;  %v3053_v8 = vsel %vm2794_vm8, %v6616_v9, %v3052_v29 }
 0x1e3   : > { %v6722_v13 = vsel %vm3089_vm11, %v3082_v16, %v3084_v17  ;;  %3097 = vst.msk [vmem:[#allocation3 + $0xf8] sm:$0xff] %vm8155_vm4, %v3084_v17  ;;  %2932 = vrot.lane.b32.xlu0 %v2925_v2, %s5949_s17  ;;  %v3110_v16 = vrot.slane %v3102_v44, 6  ;;  %v3176_v17 = vrot.slane %v3168_v56, 2 }
 0x1e4   : > { %8334 = vst [vmem:[#allocation5_spill] sm:$0xff] %v6719_v19  ;;  %2771 = vrot.lane.b32.xlu1 %v2764_v18, %s5944_s12  ;;  %v8176_v15 = vand.u32 4294901760, %v6722_v13  ;;  %v3019_v18 = vrot.slane %v3010_v63, 4 }
 0x1e5   : > { %v2766_v35 = vpop.permute.xlu0 %2765  ;;  %v3111_v61 = vsel %vm8164_vm6, %v6594_v27, %v3110_v16 }
 0x1e6   : > { %v3210_v43 = vpop.permute.xlu1 %3209  ;;  %v6732_v47 = vld [vmem:[#allocation3 + $0xa8] sm:$0xff]  ;;  %v6737_v45 = vsub.f32 %v6722_v13, %v8176_v15  ;;  %v3020_v57 = vsel %vm2758_vm7, %v6609_v49, %v3019_v18 }
 0x1e7   : > { %v3216_v62 = vsel %vm3215_vm12, %v3208_v54, %v3210_v43  ;;  %3223 = vst.msk [vmem:[#allocation3 + $0x148] sm:$0xff] %vm8155_vm4, %v3210_v43  ;;  %2992 = vrot.lane.b32.xlu0 %v2985_v23, %s5950_s20  ;;  %v3629_v30 = vand.u32 4294901760, %v6732_v47  ;;  %v3143_v54 = vrot.slane %v3135_v52, 4  ;;  %v3228_v43 = vld [vmem:[#allocation2 + $0x10] sm:$0x3] }
 0x1e8   : > { %8335 = vst [vmem:[#allocation6_spill] sm:$0xff] %v6737_v45  ;;  %3222 = vst [vmem:[#allocation3 + $0x140] sm:$0xff] %v3216_v62  ;;  %2807 = vrot.lane.b32.xlu1 %v2800_v24, %s5945_s13  ;;  %v3177_v62 = vsel %vm2794_vm8, %v6587_v26, %v3176_v17 }
 0x1e9   : > { %v6746_v31 = vpop.permute.xlu0 %2801  ;;  %v6751_v10 = vsub.f32 %v6732_v47, %v3629_v30  ;;  %v8375_v47 = vand.u32 4294901760, %v6706_v50 }
 0x1ea   : > { %v3336_v28 = vpop.permute.xlu1 %3335 }
 0x1eb   : > { %8336 = vst [vmem:[#allocation7_spill] sm:$0xff] %v6751_v10  ;;  %v3341_v59 = vsel %vm2675_vm2, %v3334_v55, %v3336_v28  ;;  %3348 = vst.msk [vmem:[#allocation3 + $0x198] sm:$0xff] %vm8155_vm4, %v3336_v28  ;;  %3025 = vrot.lane.b32.xlu0 %v3018_v14, %s5951_s21  ;;  %v3144_v55 = vsel %vm2758_vm7, %v6580_v53, %v3143_v54  ;;  %vm8157_vm4 = vcmask 949248   ;;  %v8174_v14 = vand.u32 4294901760, %v6554_v48  ;;  %v3294_v54 = vld [vmem:[#allocation2 + $0x10] sm:$0x3] }
 0x1ec   : > { %3347 = vst [vmem:[#allocation3 + $0x190] sm:$0xff] %v3341_v59  ;;  %2868 = vrot.lane.b32.xlu1 %v2861_v41, %s5946_s14  ;;  %v3103_v59 = vld [vmem:[#allocation2 + $0x18] sm:$0x3]  ;;  %v3236_v41 = vrot.slane %v3228_v43, 6 }
 0x1ed   : > { %v6761_v32 = vpop.permute.xlu0 %2862  ;;  %v3112_v52 = vrot.slane %v3103_v59, 6 }
 0x1ee   : > { %v2730_v37 = vpop.permute.xlu1 %2729  ;;  %v3237_v25 = vsel %vm8164_vm6, %v6594_v27, %v3236_v41 }
 0x1ef   : > { %3058 = vrot.lane.b32.xlu0 %v3051_v40, %s5952_s22  ;;  %v3113_v6 = vsel %vm8164_vm6, %v6602_v42, %v3112_v52  ;;  %v3295_v52 = vld [vmem:[#allocation2 + $0x18] sm:$0x3] }
 0x1f0   : > { %2901 = vrot.lane.b32.xlu1 %v2894_v51, %s5948_s16 }
 0x1f1   : > { %v6769_v36 = vpop.permute.xlu0 %2895 }
 0x1f2   : > { %v2732_v33 = vpop.permute.xlu1 %2731 }
 0x1f3   : > { %v2738_v11 = vsel %vm2737_vm13, %v2730_v37, %v2732_v33  ;;  %2746 = vst.msk [vmem:[#allocation3 + $0x18] sm:$0xfc] %vm2745_vm14, %v2732_v33  ;;  %3118 = vrot.lane.b32.xlu0 %v3111_v61, %s5953_s23  ;;  %v3269_v33 = vrot.slane %v3261_v0, 4  ;;  %v3419_v0 = vld [vmem:[#allocation2 + $0x10] sm:$0x3] }
 0x1f4   : > { %2744 = vst [vmem:[#allocation3 + $0x10] sm:$0xfc] %v2738_v11  ;;  %2934 = vrot.lane.b32.xlu1 %v2927_v39, %s5949_s17 }
 0x1f5   : > { %v6779_v60 = vpop.permute.xlu0 %2928  ;;  %v3270_v63 = vsel %vm2758_vm7, %v6580_v53, %v3269_v33 }
 0x1f6   : > { %v2768_v34 = vpop.permute.xlu1 %2767 }
 0x1f7   : > { %v2774_v2 = vsel %vm2773_vm15, %v2766_v35, %v2768_v34  ;;  %2782 = vst.msk [vmem:[#allocation3 + $0x28] sm:$0xf0] %vm2781_vm0, %v2768_v34  ;;  %3151 = vrot.lane.b32.xlu0 %v3144_v55, %s5954_s24  ;;  %v3169_v34 = vld [vmem:[#allocation2 + $0x18] sm:$0x3]  ;;  %v3302_v55 = vrot.slane %v3294_v54, 2 }
 0x1f8   : > { %2780 = vst [vmem:[#allocation3 + $0x20] sm:$0xf0] %v2774_v2  ;;  %2994 = vrot.lane.b32.xlu1 %v2987_v3, %s5950_s20  ;;  %v3353_v2 = vld [vmem:[#allocation2 + $0x10] sm:$0x3]  ;;  %v3178_v4 = vrot.slane %v3169_v34, 2 }
 0x1f9   : > { %v6791_v20 = vpop.permute.xlu0 %2988  ;;  %v3303_v43 = vsel %vm2794_vm8, %v6587_v26, %v3302_v55  ;;  %v3387_v55 = vld [vmem:[#allocation2 + $0x18] sm:$0x3] }
 0x1fa   : > { %v2804_v35 = vpop.permute.xlu1 %2803  ;;  %v3486_v23 = vld [vmem:[#allocation3 + $0x18] sm:$0xff] }
 0x1fb   : > { %v2810_v24 = vsel %vm8156_vm1, %v6746_v31, %v2804_v35  ;;  %2818 = vst.msk [vmem:[#allocation3 + $0x38] sm:$0xc0] %vm2817_vm3, %v2804_v35  ;;  %v3593_v22 = vand.u32 4294901760, %v3486_v23  ;;  %v3485_v28 = vld [vmem:[#allocation3 + $0x10] sm:$0xff]  ;;  %3184 = vrot.lane.b32.xlu0 %v3177_v62, %s5955_s25  ;;  %vm8158_vm1 = vcmask 941056  }
 0x1fc   : > { %2816 = vst [vmem:[#allocation3 + $0x30] sm:$0xc0] %v2810_v24  ;;  %3027 = vrot.lane.b32.xlu1 %v3020_v57, %s5951_s21  ;;  %v3595_v46 = vand.u32 4294901760, %v3485_v28  ;;  %v3229_v35 = vld [vmem:[#allocation2 + $0x18] sm:$0x3] }
 0x1fd   : > { %v6806_v31 = vpack.c.bf16 %v3593_v22, %v8173_v21  ;;  %v6808_v5 = vsub.f32 %v3486_v23, %v3593_v22  ;;  %v6810_v44 = vpop.permute.xlu0 %3021  ;;  %v3361_v23 = vrot.slane %v3353_v2, 6  ;;  %v3386_v24 = vld [vmem:[#allocation2 + $0x10] sm:$0x3]  ;;  %v3179_v22 = vsel %vm2794_vm8, %v6616_v9, %v3178_v4  ;;  %v3420_v4 = vld [vmem:[#allocation2 + $0x18] sm:$0x3] }
 0x1fe   : > { %v2865_v37 = vpop.permute.xlu1 %2864  ;;  %v6814_v40 = vpack.c.bf16 %v3595_v46, %v8174_v14  ;;  %v6816_v16 = vsub.f32 %v3485_v28, %v3595_v46  ;;  %v3238_v29 = vrot.slane %v3229_v35, 6  ;;  %v3262_v46 = vld [vmem:[#allocation2 + $0x18] sm:$0x3]  ;;  %v3394_v59 = vrot.slane %v3386_v24, 4 }
 0x1ff   : > { %8337 = vst [vmem:[#allocation8_spill] sm:$0xff] %v6806_v31  ;;  %8338 = vst [vmem:[#allocation9_spill] sm:$0xff] %v6808_v5  ;;  %v2871_v51 = vsel %vm8157_vm4, %v6761_v32, %v2865_v37  ;;  %5391 = vmatprep.subr.bf16.mxu1 %v6806_v31  ;;  %5583 = vmatprep.subr.bf16.mxu0 %v6806_v31  ;;  %v3136_v32 = vld [vmem:[#allocation2 + $0x18] sm:$0x3]  ;;  %vm8159_vm4 = vcmask 932864   ;;  %v3362_v28 = vsel %vm8164_vm6, %v6594_v27, %v3361_v23  ;;  %v3429_v24 = vrot.slane %v3420_v4, 2 }
 0x200   : > { %8339 = vst [vmem:[#allocation10_spill] sm:$0xff] %v6814_v40  ;;  %8340 = vst [vmem:[#allocation11_spill] sm:$0xff] %v6816_v16  ;;  %3060 = vrot.lane.b32.xlu1 %v3053_v8, %s5952_s22  ;;  %5393 = vmatpush1.bf16.msra.mxu1 %v6814_v40  ;;  %v3145_v56 = vrot.slane %v3136_v32, 4  ;;  %v3271_v8 = vrot.slane %v3262_v46, 4  ;;  %v3395_v27 = vsel %vm2758_vm7, %v6580_v53, %v3394_v59  ;;  %v3557_v23 = vld [vmem:[%s8139_s4 + $0x10] sm:$0xf] }
 0x201   : > { %2878 = vst.msk [vmem:[#allocation3 + $0x68] sm:$0xfc] %vm2745_vm14, %v2865_v37  ;;  %2877 = vst [vmem:[#allocation3 + $0x60] sm:$0xfc] %v2871_v51  ;;  %5585 = vmatpush1.bf16.msra.mxu0 %v6814_v40  ;;  %3244 = vrot.lane.b32.xlu0 %v3237_v25, %s5956_s26  ;;  %v3055_v61 = vpop.permute.xlu0 %3054  ;;  %v3239_v51 = vsel %vm8164_vm6, %v6602_v42, %v3238_v29  ;;  %v3427_v25 = vrot.slane %v3419_v0, 2  ;;  %v3430_v29 = vsel %vm2794_vm8, %v6616_v9, %v3429_v24 }
 0x202   : > { %v2898_v11 = vpop.permute.xlu1 %2897  ;;  %v3146_v18 = vsel %vm2758_vm7, %v6609_v49, %v3145_v56  ;;  %v3272_v54 = vsel %vm2758_vm7, %v6609_v49, %v3271_v8 }
 0x203   : > { %v2904_v39 = vsel %vm8158_vm1, %v6769_v36, %v2898_v11  ;;  %2911 = vst.msk [vmem:[#allocation3 + $0x78] sm:$0xf0] %vm2781_vm0, %v2898_v11  ;;  %vm8160_vm1 = vcmask 916480   ;;  %v3304_v11 = vrot.slane %v3295_v52, 2  ;;  %v3428_v53 = vsel %vm2794_vm8, %v6587_v26, %v3427_v25 }
 0x204   : > { %2910 = vst [vmem:[#allocation3 + $0x70] sm:$0xf0] %v2904_v39  ;;  %3120 = vrot.lane.b32.xlu1 %v3113_v6, %s5953_s23  ;;  %v3354_v39 = vld [vmem:[#allocation2 + $0x18] sm:$0x3] }
 0x205   : > { %3277 = vrot.lane.b32.xlu0 %v3270_v63, %s5957_s27  ;;  %v3115_v17 = vpop.permute.xlu0 %3114  ;;  %v3305_v63 = vsel %vm2794_vm8, %v6616_v9, %v3304_v11  ;;  %v3363_v34 = vrot.slane %v3354_v39, 6  ;;  %v3478_v9 = vld [vmem:[%s8138_s3 + $0x8] sm:$0xff]  ;;  %vm8167_vm8 = vcmask 998400  }
 0x206   : > { %v2931_v36 = vpop.permute.xlu1 %2930  ;;  %v3575_v0 = vsel %vm8167_vm8, %v3478_v9, 0  ;;  %vm3406_vm8 = vcmask 637952  }
 0x207   : > { %v2937_v3 = vsel %vm8159_vm4, %v6779_v60, %v2931_v36  ;;  %2944 = vst.msk [vmem:[#allocation3 + $0x88] sm:$0xc0] %vm2817_vm3, %v2931_v36  ;;  %vm8161_vm4 = vcmask 850944  }
 0x208   : > { %2943 = vst [vmem:[#allocation3 + $0x80] sm:$0xc0] %v2937_v3  ;;  %3153 = vrot.lane.b32.xlu1 %v3146_v18, %s5954_s24  ;;  %v3364_v3 = vsel %vm8164_vm6, %v6602_v42, %v3363_v34  ;;  %v3396_v18 = vrot.slane %v3387_v55, 4  ;;  %vm3248_vm6 = vcmask 736256  }
 0x209   : > { %3310 = vrot.lane.b32.xlu0 %v3303_v43, %s5958_s28  ;;  %v3148_v62 = vpop.permute.xlu0 %3147 }
 0x20a   : > { %v2991_v60 = vpop.permute.xlu1 %2990  ;;  %v3397_v42 = vsel %vm2758_vm7, %v6609_v49, %v3396_v18  ;;  %vm8168_vm7 = vcmask 719872  }
 0x20b   : > { %v2997_v57 = vsel %vm8160_vm1, %v6791_v20, %v2991_v60  ;;  %3004 = vst.msk [vmem:[#allocation3 + $0xb8] sm:$0xfc] %vm2745_vm14, %v2991_v60  ;;  %vm8162_vm1 = vcmask 842752  }
 0x20c   : > { %3003 = vst [vmem:[#allocation3 + $0xb0] sm:$0xfc] %v2997_v57  ;;  %3186 = vrot.lane.b32.xlu1 %v3179_v22, %s5955_s25 }
 0x20d   : > { %3369 = vrot.lane.b32.xlu0 %v3362_v28, %s8341_s7  ;;  %v3181_v41 = vpop.permute.xlu0 %3180 }
 0x20e   : > { %v3024_v20 = vpop.permute.xlu1 %3023 }
 0x20f   : > { %v3030_v37 = vsel %vm8161_vm4, %v6810_v44, %v3024_v20  ;;  %3037 = vst.msk [vmem:[#allocation3 + $0xc8] sm:$0xf0] %vm2781_vm0, %v3024_v20  ;;  %vm8163_vm4 = vcmask 826368  }
 0x210   : > { %3036 = vst [vmem:[#allocation3 + $0xc0] sm:$0xf0] %v3030_v37  ;;  %3246 = vrot.lane.b32.xlu1 %v3239_v51, %s5956_s26  ;;  %v6913_v37 = vand.u32 4294901760, %v3575_v0 }
 0x211   : > { %3402 = vrot.lane.b32.xlu0 %v3395_v27, %s5960_s30  ;;  %v3241_v32 = vpop.permute.xlu0 %3240 }
 0x212   : > { %v3057_v33 = vpop.permute.xlu1 %3056  ;;  %8342 = vst [vmem:[#allocation12_spill] sm:$0xff] %v6913_v37 }
 0x213   : > { %v3063_v44 = vsel %vm8162_vm1, %v3055_v61, %v3057_v33  ;;  %3070 = vst.msk [vmem:[#allocation3 + $0xd8] sm:$0xc0] %vm2817_vm3, %v3057_v33  ;;  %vm3155_vm1 = vcmask 818176  }
 0x214   : > { %3069 = vst [vmem:[#allocation3 + $0xd0] sm:$0xc0] %v3063_v44  ;;  %3279 = vrot.lane.b32.xlu1 %v3272_v54, %s5957_s27 }
 0x215   : > { %3435 = vrot.lane.b32.xlu0 %v3428_v53, %s5961_s6  ;;  %v3274_v6 = vpop.permute.xlu0 %3273 }
 0x216   : > { %v3117_v56 = vpop.permute.xlu1 %3116 }
 0x217   : > { %v3123_v61 = vsel %vm8163_vm4, %v3115_v17, %v3117_v56  ;;  %3130 = vst.msk [vmem:[#allocation3 + $0x108] sm:$0xfc] %vm2745_vm14, %v3117_v56  ;;  %v3555_v17 = vld [vmem:[%s8139_s4] sm:$0xff]  ;;  %vm8165_vm4 = vcmask 752640  }
 0x218   : > { %3129 = vst [vmem:[#allocation3 + $0x100] sm:$0xfc] %v3123_v61  ;;  %3312 = vrot.lane.b32.xlu1 %v3305_v63, %s5958_s28 }
 0x219   : > { %3458 = vrot.lane.b32.xlu0 %v6554_v48, %s5962_s29  ;;  %v3307_v26 = vpop.permute.xlu0 %3306 }
 0x21a   : > { %v3150_v2 = vpop.permute.xlu1 %3149 }
 0x21b   : > { %v3156_v36 = vsel %vm3155_vm1, %v3148_v62, %v3150_v2  ;;  %3163 = vst.msk [vmem:[#allocation3 + $0x118] sm:$0xf0] %vm2781_vm0, %v3150_v2 }
 0x21c   : > { %3162 = vst [vmem:[#allocation3 + $0x110] sm:$0xf0] %v3156_v36  ;;  %3371 = vrot.lane.b32.xlu1 %v3364_v3, %s8341_s7 }
 0x21d   : > { %3560 = vperm.xlu0 %5925, %v3555_v17   ;;  %v3366_v43 = vpop.permute.xlu0 %3365 }
 0x21e   : > { %v3183_v35 = vpop.permute.xlu1 %3182 }
 0x21f   : > { %v3189_v62 = vsel %vm8165_vm4, %v3181_v41, %v3183_v35  ;;  %3196 = vst.msk [vmem:[#allocation3 + $0x128] sm:$0xc0] %vm2817_vm3, %v3183_v35  ;;  %vm8166_vm4 = vcmask 728064  }
 0x220   : > { %3195 = vst [vmem:[#allocation3 + $0x120] sm:$0xc0] %v3189_v62  ;;  %3404 = vrot.lane.b32.xlu1 %v3397_v42, %s5960_s30 }
 0x221   : > { %3570 = vperm.xlu0 %5925, %v3557_v23   ;;  %v3399_v60 = vpop.permute.xlu0 %3398 }
 0x222   : > { %v3243_v57 = vpop.permute.xlu1 %3242 }
 0x223   : > { %v3249_v22 = vsel %vm3248_vm6, %v3241_v32, %v3243_v57  ;;  %3256 = vst.msk [vmem:[#allocation3 + $0x158] sm:$0xfc] %vm2745_vm14, %v3243_v57 }
 0x224   : > { %3255 = vst [vmem:[#allocation3 + $0x150] sm:$0xfc] %v3249_v22  ;;  %3437 = vrot.lane.b32.xlu1 %v3430_v29, %s5961_s6  ;;  %s5890_s6 = smul.u32 48, %s8715_s19 }
 0x225   : > { %v3432_v49 = vpop.permute.xlu0 %3431 }
 0x226   : > { %v3276_v28 = vpop.permute.xlu1 %3275 }
 0x227   : > { %v3282_v46 = vsel %vm8166_vm4, %v3274_v6, %v3276_v28  ;;  %3289 = vst.msk [vmem:[#allocation3 + $0x168] sm:$0xf0] %vm2781_vm0, %v3276_v28  ;;  %vm3373_vm4 = vcmask 646144  }
 0x228   : > { %3288 = vst [vmem:[#allocation3 + $0x160] sm:$0xf0] %v3282_v46  ;;  %3460 = vrot.lane.b32.xlu1 %v6563_v38, %s5962_s29  ;;  %v6916_v38 = vsub.f32 %v3575_v0, %v6913_v37 }
 0x229   : > { %v2834_v59 = vpop.permute.xlu0 %2833 }
 0x22a   : > { %v3309_v41 = vpop.permute.xlu1 %3308  ;;  %8343 = vst [vmem:[#allocation13_spill] sm:$0xff] %v6916_v38  ;;  %v3719_v52 = vand.u32 4294901760, %v6916_v38 }
 0x22b   : > { %v3315_v20 = vsel %vm8168_vm7, %v3307_v26, %v3309_v41  ;;  %3322 = vst.msk [vmem:[#allocation3 + $0x178] sm:$0xc0] %vm2817_vm3, %v3309_v41  ;;  %vm3439_vm7 = vcmask 629760  }
 0x22c   : > { %3321 = vst [vmem:[#allocation3 + $0x170] sm:$0xc0] %v3315_v20  ;;  %v3720_v32 = vsub.f32 %v6916_v38, %v3719_v52  ;;  %4529 = vmatprep.mubr.f32.mxu0 %v3719_v52 }
 0x22d   : > { %v2960_v51 = vpop.permute.xlu0 %2959 }
 0x22e   : > { %v3368_v8 = vpop.permute.xlu1 %3367  ;;  %v3721_v54 = vand.u32 4294901760, %v3720_v32 }
 0x22f   : > { %v3374_v27 = vsel %vm3373_vm4, %v3366_v43, %v3368_v8  ;;  %3381 = vst.msk [vmem:[#allocation3 + $0x1a8] sm:$0xfc] %vm2745_vm14, %v3368_v8  ;;  %vm8358_vm14 = vcmask 941056  }
 0x230   : > { %3380 = vst [vmem:[#allocation3 + $0x1a0] sm:$0xfc] %v3374_v27  ;;  %3722 = vmatprep.mubr.f32.mxu1 %v3721_v54 }
 0x231   : > { %v3086_v25 = vpop.permute.xlu0 %3085 }
 0x232   : > { %v3401_v33 = vpop.permute.xlu1 %3400 }
 0x233   : > { %v3407_v44 = vsel %vm3406_vm8, %v3399_v60, %v3401_v33  ;;  %3414 = vst.msk [vmem:[#allocation3 + $0x1b8] sm:$0xf0] %vm2781_vm0, %v3401_v33 }
 0x234   : > { %3413 = vst [vmem:[#allocation3 + $0x1b0] sm:$0xf0] %v3407_v44 }
 0x235   : > { %v3212_v11 = vpop.permute.xlu0 %3211 }
 0x236   : > { %v3434_v53 = vpop.permute.xlu1 %3433 }
 0x237   : > { %v3440_v39 = vsel %vm3439_vm7, %v3432_v49, %v3434_v53  ;;  %3447 = vst.msk [vmem:[#allocation3 + $0x1c8] sm:$0xc0] %vm2817_vm3, %v3434_v53  ;;  %vm8367_vm3 = vcmask 916480  }
 0x238   : > { %3446 = vst [vmem:[#allocation3 + $0x1c0] sm:$0xc0] %v3440_v39 }
 0x239   : > { %v3338_v6 = vpop.permute.xlu0 %3337 }
 0x23a   : > { %v2836_v56 = vpop.permute.xlu1 %2835 }
 0x23b   : > { %v2839_v61 = vsel %vm2837_vm9, %v2834_v59, %v2836_v56  ;;  %2847 = vst.msk [vmem:[#allocation3 + $0x68] sm:$0x3] %vm2704_vm5, %v2836_v56  ;;  %vm3466_vm9 = vcmask 621568  }
 0x23c   : > { %2846 = vst [vmem:[#allocation3 + $0x60] sm:$0x3] %v2839_v61 }
 0x23d   : > { %v3463_v63 = vpop.permute.xlu0 %3462 }
 0x23e   : > { %v2962_v34 = vpop.permute.xlu1 %2961 }
 0x23f   : > { %v2965_v55 = vsel %vm2963_vm10, %v2960_v51, %v2962_v34  ;;  %2973 = vst.msk [vmem:[#allocation3 + $0xb8] sm:$0x3] %vm2704_vm5, %v2962_v34  ;;  %vm2784_vm10 = vcmask 128000  }
 0x240   : > { %2972 = vst [vmem:[#allocation3 + $0xb0] sm:$0x3] %v2965_v55 }
 0x241   : > { %v2734_v26 = vpop.permute.xlu0 %2733 }
 0x242   : > { %v3088_v2 = vpop.permute.xlu1 %3087  ;;  %v6930_v17 = vld [vmem:[#allocation3 + $0x68] sm:$0xff] }
 0x243   : > { %v3091_v36 = vsel %vm3089_vm11, %v3086_v25, %v3088_v2  ;;  %3099 = vst.msk [vmem:[#allocation3 + $0x108] sm:$0x3] %vm2704_vm5, %v3088_v2  ;;  %v3613_v3 = vand.u32 4294901760, %v6930_v17  ;;  %v6935_v18 = vld [vmem:[#allocation3 + $0x60] sm:$0xff]  ;;  %vm8349_vm11 = vcmask 130048  }
 0x244   : > { %3098 = vst [vmem:[#allocation3 + $0x100] sm:$0x3] %v3091_v36  ;;  %v3615_v4 = vand.u32 4294901760, %v6935_v18  ;;  %vm8363_vm0 = vmmov %vm8349_vm11 }
 0x245   : > { %v2770_v43 = vpop.permute.xlu0 %2769  ;;  %v6941_v35 = vsub.f32 %v6930_v17, %v3613_v3 }
 0x246   : > { %v3214_v23 = vpop.permute.xlu1 %3213  ;;  %v6946_v62 = vsub.f32 %v6935_v18, %v3615_v4  ;;  %v6948_v42 = vld [vmem:[#allocation3 + $0xb8] sm:$0xff] }
 0x247   : > { %8344 = vst [vmem:[#allocation14_spill] sm:$0xff] %v6941_v35  ;;  %v3217_v24 = vsel %vm3215_vm12, %v3212_v11, %v3214_v23  ;;  %3225 = vst.msk [vmem:[#allocation3 + $0x158] sm:$0x3] %vm2704_vm5, %v3214_v23  ;;  %v3633_v60 = vand.u32 4294901760, %v6948_v42  ;;  %v6953_v57 = vld [vmem:[#allocation3 + $0xb0] sm:$0xff]  ;;  %vm8353_vm12 = vcmask 949248  }
 0x248   : > { %3224 = vst [vmem:[#allocation3 + $0x150] sm:$0x3] %v3217_v24  ;;  %v8177_v22 = vand.u32 4294901760, %v6953_v57 }
 0x249   : > { %v2806_v29 = vpop.permute.xlu0 %2805  ;;  %v6959_v49 = vsub.f32 %v6948_v42, %v3633_v60 }
 0x24a   : > { %v3340_v28 = vpop.permute.xlu1 %3339  ;;  %v6964_v46 = vsub.f32 %v6953_v57, %v8177_v22 }
 0x24b   : > { %8345 = vst [vmem:[#allocation15_spill] sm:$0xff] %v6959_v49  ;;  %v3342_v59 = vsel %vm2675_vm2, %v3338_v6, %v3340_v28  ;;  %3350 = vst.msk [vmem:[#allocation3 + $0x1a8] sm:$0x3] %vm2704_vm5, %v3340_v28  ;;  %v6968_v9 = vld [vmem:[#allocation3 + $0x100] sm:$0xff]  ;;  %vm2748_vm2 = vcmask 125952  }
 0x24c   : > { %8346 = vst [vmem:[#allocation16_spill] sm:$0xff] %v6964_v46  ;;  %3349 = vst [vmem:[#allocation3 + $0x1a0] sm:$0x3] %v3342_v59  ;;  %v8175_v41 = vand.u32 4294901760, %v6968_v9  ;;  %v6996_v59 = vld [vmem:[#allocation3 + $0x58] sm:$0xff] }
 0x24d   : > { %v2867_v0 = vpop.permute.xlu0 %2866 }
 0x24e   : > { %v3465_v20 = vpop.permute.xlu1 %3464  ;;  %v6974_v51 = vsub.f32 %v6968_v9, %v8175_v41 }
 0x24f   : > { %v3468_v8 = vsel %vm3466_vm9, %v3463_v63, %v3465_v20  ;;  %3476 = vst.msk [vmem:[#allocation3 + $0x1f8] sm:$0x3] %vm2704_vm5, %v3465_v20  ;;  %vm8348_vm5 = vcmask 1022976  }
 0x250   : > { %8347 = vst [vmem:[#allocation17_spill] sm:$0xff] %v6974_v51  ;;  %3475 = vst [vmem:[#allocation3 + $0x1f0] sm:$0x3] %v3468_v8 }
 0x251   : > { %v2900_v27 = vpop.permute.xlu0 %2899 }
 0x252   : > { %v2736_v52 = vpop.permute.xlu1 %2735 }
 0x253   : > { %v2739_v25 = vsel %vm2737_vm13, %v2734_v26, %v2736_v52  ;;  %2749 = vst.msk [vmem:[#allocation3 + $0x28] sm:$0xf] %vm2748_vm2, %v2736_v52 }
 0x254   : > { %2747 = vst [vmem:[#allocation3 + $0x20] sm:$0xf] %v2739_v25 }
 0x255   : > { %v2933_v32 = vpop.permute.xlu0 %2932 }
 0x256   : > { %v2772_v33 = vpop.permute.xlu1 %2771 }
 0x257   : > { %v2775_v44 = vsel %vm2773_vm15, %v2770_v43, %v2772_v33  ;;  %2785 = vst.msk [vmem:[#allocation3 + $0x38] sm:$0x3f] %vm2784_vm10, %v2772_v33  ;;  %vm8362_vm15 = vcmask 932864  }
 0x258   : > { %2783 = vst [vmem:[#allocation3 + $0x30] sm:$0x3f] %v2775_v44 }
 0x259   : > { %v6982_v54 = vpop.permute.xlu0 %2992 }
 0x25a   : > { %v2808_v11 = vpop.permute.xlu1 %2807  ;;  %v3488_v53 = vld [vmem:[#allocation3 + $0x28] sm:$0xff] }
 0x25b   : > { %v2811_v39 = vsel %vm8348_vm5, %v2806_v29, %v2808_v11  ;;  %2820 = vst.msk [vmem:[#allocation3 + $0x48] sm:$0xff] %vm8349_vm11, %v2808_v11  ;;  %v3597_v6 = vand.u32 4294901760, %v3488_v53  ;;  %v3487_v56 = vld [vmem:[#allocation3 + $0x20] sm:$0xff]  ;;  %vm8369_vm5 = vcmask 850944   ;;  %vm8373_vm11 = vcmask 842752  }
 0x25c   : > { %v3599_v61 = vand.u32 4294901760, %v3487_v56  ;;  %v3607_v63 = vand.u32 4294901760, %v2811_v39 }
 0x25d   : > { %v6986_v34 = vsub.f32 %v3488_v53, %v3597_v6  ;;  %v6988_v55 = vpop.permute.xlu0 %3025 }
 0x25e   : > { %v2869_v26 = vpop.permute.xlu1 %2868  ;;  %v3490_v2 = vld [vmem:[#allocation3 + $0x38] sm:$0xff]  ;;  %v6990_v36 = vsub.f32 %v3487_v56, %v3599_v61  ;;  %v6992_v43 = vsub.f32 %v2811_v39, %v3607_v63  ;;  %v8171_v39 = vand.u32 4294901760, %v6996_v59 }
 0x25f   : > { %8350 = vst [vmem:[#allocation18_spill] sm:$0xff] %v6986_v34  ;;  %v2872_v23 = vsel %vm8353_vm12, %v2867_v0, %v2869_v26  ;;  %2880 = vst.msk [vmem:[#allocation3 + $0x78] sm:$0xf] %vm2748_vm2, %v2869_v26  ;;  %v3601_v24 = vand.u32 4294901760, %v3490_v2  ;;  %v3489_v29 = vld [vmem:[#allocation3 + $0x30] sm:$0xff] }
 0x260   : > { %8351 = vst [vmem:[#allocation19_spill] sm:$0xff] %v6990_v36  ;;  %8352 = vst [vmem:[#allocation20_spill] sm:$0xff] %v6992_v43  ;;  %v3603_v28 = vand.u32 4294901760, %v3489_v29 }
 0x261   : > { %2879 = vst [vmem:[#allocation3 + $0x70] sm:$0xf] %v2872_v23  ;;  %v6998_v20 = vpack.c.bf16 %v3601_v24, %v3597_v6  ;;  %v7000_v8 = vsub.f32 %v3490_v2, %v3601_v24  ;;  %v7002_v52 = vpop.permute.xlu0 %3058  ;;  %v8172_v6 = vand.u32 4294901760, %v6697_v58  ;;  %vm8374_vm12 = vmmov %vm8363_vm0 }
 0x262   : > { %v2902_v25 = vpop.permute.xlu1 %2901  ;;  %v7004_v33 = vpack.c.bf16 %v3603_v28, %v3599_v61  ;;  %v7006_v44 = vsub.f32 %v3489_v29, %v3603_v28  ;;  %v3492_v0 = vld [vmem:[#allocation3 + $0x48] sm:$0xff] }
 0x263   : > { %8354 = vst [vmem:[#allocation21_spill] sm:$0xff] %v6998_v20  ;;  %8355 = vst [vmem:[#allocation22_spill] sm:$0xff] %v7000_v8  ;;  %v2905_v11 = vsel %vm8358_vm14, %v2900_v27, %v2902_v25  ;;  %5395 = vmatprep.subr.bf16.mxu1 %v6998_v20  ;;  %5587 = vmatprep.subr.bf16.mxu0 %v6998_v20  ;;  %v3605_v53 = vand.u32 4294901760, %v3492_v0  ;;  %v7026_v2 = vpack.c.bf16 %v8172_v6, %v3607_v63  ;;  %vm8383_vm14 = vcmask 826368  }
 0x264   : > { %8356 = vst [vmem:[#allocation23_spill] sm:$0xff] %v7004_v33  ;;  %8357 = vst [vmem:[#allocation24_spill] sm:$0xff] %v7006_v44  ;;  %5397 = vmatpush1.bf16.msra.mxu1 %v7004_v33  ;;  %5589 = vmatpush1.bf16.msra.mxu0 %v7004_v33 }
 0x265   : > { %2913 = vst.msk [vmem:[#allocation3 + $0x88] sm:$0x3f] %vm2784_vm10, %v2902_v25  ;;  %2912 = vst [vmem:[#allocation3 + $0x80] sm:$0x3f] %v2905_v11  ;;  %v7018_v56 = vpack.c.bf16 %v8171_v39, %v3605_v53  ;;  %v7020_v27 = vsub.f32 %v3492_v0, %v3605_v53  ;;  %v7022_v61 = vpop.permute.xlu0 %3118 }
 0x266   : > { %v2935_v26 = vpop.permute.xlu1 %2934  ;;  %8361 = vst [vmem:[#allocation27_spill] sm:$0xff] %v7026_v2  ;;  %v3498_v23 = vld [vmem:[#allocation3 + $0x78] sm:$0xff] }
 0x267   : > { %8359 = vst [vmem:[#allocation25_spill] sm:$0xff] %v7018_v56  ;;  %8360 = vst [vmem:[#allocation26_spill] sm:$0xff] %v7020_v27  ;;  %v2938_v24 = vsel %vm8362_vm15, %v2933_v32, %v2935_v26  ;;  %5399 = vmatprep.subr.bf16.mxu1 %v7018_v56  ;;  %5591 = vmatprep.subr.bf16.mxu0 %v7018_v56  ;;  %v3617_v29 = vand.u32 4294901760, %v3498_v23 }
 0x268   : > { %2946 = vst.msk [vmem:[#allocation3 + $0x98] sm:$0xff] %vm8363_vm0, %v2935_v26  ;;  %v3497_v28 = vld [vmem:[#allocation3 + $0x70] sm:$0xff]  ;;  %5401 = vmatpush1.bf16.msra.mxu1 %v7026_v2  ;;  %5593 = vmatpush1.bf16.msra.mxu0 %v7026_v2  ;;  %v3627_v0 = vand.u32 4294901760, %v2938_v24  ;;  %vm8399_vm15 = vmmov %vm8363_vm0  ;;  %vm8424_vm0 = vcmask 719872  }
 0x269   : > { %v3619_v25 = vand.u32 4294901760, %v3497_v28  ;;  %v7036_v63 = vpack.c.bf16 %v3617_v29, %v3613_v3  ;;  %v7038_v11 = vsub.f32 %v3498_v23, %v3617_v29  ;;  %v7046_v1 = vpop.permute.xlu0 %3151 }
 0x26a   : > { %v2995_v32 = vpop.permute.xlu1 %2994  ;;  %v7048_v6 = vsub.f32 %v2938_v24, %v3627_v0 }
 0x26b   : > { %8364 = vst [vmem:[#allocation28_spill] sm:$0xff] %v7036_v63  ;;  %v7042_v53 = vpack.c.bf16 %v3619_v25, %v3615_v4  ;;  %v7044_v26 = vsub.f32 %v3497_v28, %v3619_v25  ;;  %v2998_v21 = vsel %vm8367_vm3, %v6982_v54, %v2995_v32  ;;  %3006 = vst.msk [vmem:[#allocation3 + $0xc8] sm:$0xf] %vm2748_vm2, %v2995_v32  ;;  %5403 = vmatprep.subr.bf16.mxu1 %v7036_v63 }
 0x26c   : > { %v3500_v39 = vld [vmem:[#allocation3 + $0x88] sm:$0xff]  ;;  %8366 = vst [vmem:[#allocation30_spill] sm:$0xff] %v7048_v6  ;;  %5595 = vmatprep.subr.bf16.mxu0 %v7036_v63  ;;  %v3499_v3 = vld [vmem:[#allocation3 + $0x80] sm:$0xff]  ;;  %3005 = vst [vmem:[#allocation3 + $0xc0] sm:$0xf] %v2998_v21  ;;  %v3882_v4 = vand.u32 4294901760, %v7048_v6 }
 0x26d   : > { %8365 = vst [vmem:[#allocation29_spill] sm:$0xff] %v7042_v53  ;;  %v3621_v17 = vand.u32 4294901760, %v3500_v39  ;;  %5405 = vmatpush1.bf16.msra.mxu1 %v7042_v53  ;;  %5597 = vmatpush1.bf16.msra.mxu0 %v7042_v53  ;;  %v3623_v18 = vand.u32 4294901760, %v3499_v3  ;;  %v7065_v21 = vpop.permute.xlu0 %3184  ;;  %vm8426_vm3 = vmmov %vm8374_vm12 }
 0x26e   : > { %v3028_v24 = vpop.permute.xlu1 %3027 }
 0x26f   : > { %v7058_v23 = vsub.f32 %v3500_v39, %v3621_v17  ;;  %v3502_v54 = vld [vmem:[#allocation3 + $0x98] sm:$0xff]  ;;  %v7060_v29 = vsub.f32 %v3499_v3, %v3623_v18  ;;  %v3031_v28 = vsel %vm8369_vm5, %v6988_v55, %v3028_v24  ;;  %3039 = vst.msk [vmem:[#allocation3 + $0xd8] sm:$0x3f] %vm2784_vm10, %v3028_v24  ;;  %v3883_v39 = vsub.f32 %v7048_v6, %v3882_v4 }
 0x270   : > { %v3625_v25 = vand.u32 4294901760, %v3502_v54  ;;  %3038 = vst [vmem:[#allocation3 + $0xd0] sm:$0x3f] %v3031_v28  ;;  %v7074_v22 = vpack.c.bf16 %v3627_v0, %v3623_v18  ;;  %v7080_v55 = vpack.c.bf16 %v3633_v60, %v3629_v30  ;;  %v8376_v30 = vand.u32 4294901760, %v6953_v57 }
 0x271   : > { %8368 = vst [vmem:[#allocation31_spill] sm:$0xff] %v7060_v29  ;;  %v3864_v32 = vand.u32 4294901760, %v7058_v23  ;;  %v3870_v14 = vand.u32 4294901760, %v7060_v29 }
 0x272   : > { %v7070_v41 = vpack.c.bf16 %v3625_v25, %v3621_v17  ;;  %v7072_v15 = vsub.f32 %v3502_v54, %v3625_v25  ;;  %v3061_v3 = vpop.permute.xlu1 %3060  ;;  %8371 = vst [vmem:[#allocation33_spill] sm:$0xff] %v7074_v22  ;;  %8372 = vst [vmem:[#allocation34_spill] sm:$0xff] %v7080_v55  ;;  %v3508_v24 = vld [vmem:[#allocation3 + $0xc8] sm:$0xff]  ;;  %v7095_v42 = vpack.c.bf16 %v8376_v30, %v8375_v47 }
 0x273   : > { %v3865_v28 = vsub.f32 %v7058_v23, %v3864_v32  ;;  %v3871_v12 = vsub.f32 %v7060_v29, %v3870_v14  ;;  %v7086_v17 = vsel %vm8373_vm11, %v7002_v52, %v3061_v3  ;;  %3072 = vst.msk [vmem:[#allocation3 + $0xe8] sm:$0xff] %vm8374_vm12, %v3061_v3  ;;  %v3637_v60 = vand.u32 4294901760, %v3508_v24  ;;  %v3507_v0 = vld [vmem:[#allocation3 + $0xc0] sm:$0xff] }
 0x274   : > { %8370 = vst [vmem:[#allocation32_spill] sm:$0xff] %v7070_v41  ;;  %5407 = vmatprep.subr.bf16.mxu1 %v7070_v41  ;;  %5599 = vmatprep.subr.bf16.mxu0 %v7070_v41  ;;  %8377 = vst [vmem:[#allocation35_spill] sm:$0xff] %v7095_v42  ;;  %v3876_v18 = vand.u32 4294901760, %v7072_v15  ;;  %v3639_v52 = vand.u32 4294901760, %v3507_v0  ;;  %v3647_v54 = vand.u32 4294901760, %v7086_v17  ;;  %v3884_v3 = vand.u32 4294901760, %v3883_v39  ;;  %v7108_v41 = vpop.permute.xlu0 %3244 }
 0x275   : > { %5409 = vmatpush1.bf16.msra.mxu1 %v7074_v22  ;;  %5601 = vmatpush1.bf16.msra.mxu0 %v7074_v22  ;;  %v3872_v25 = vand.u32 4294901760, %v3871_v12  ;;  %v7103_v50 = vsub.f32 %v3508_v24, %v3637_v60  ;;  %v3866_v12 = vand.u32 4294901760, %v3865_v28  ;;  %v7122_v2 = vpack.c.bf16 %v3882_v4, %v3870_v14 }
 0x276   : > { %5411 = vmatprep.subr.bf16.mxu1 %v7080_v55  ;;  %5603 = vmatprep.subr.bf16.mxu0 %v7080_v55  ;;  %v3877_v57 = vsub.f32 %v7072_v15, %v3876_v18  ;;  %v7106_v47 = vpack.c.bf16 %v3876_v18, %v3864_v32  ;;  %v3121_v30 = vpop.permute.xlu1 %3120  ;;  %v3510_v53 = vld [vmem:[#allocation3 + $0xd8] sm:$0xff]  ;;  %v7110_v22 = vsub.f32 %v3507_v0, %v3639_v52  ;;  %vm3548_vm11 = vcmask 261120  }
 0x277   : > { %8378 = vst [vmem:[#allocation36_spill] sm:$0xff] %v7103_v50  ;;  %v7113_v38 = vsub.f32 %v7086_v17, %v3647_v54  ;;  %v7115_v39 = vpack.c.bf16 %v3884_v3, %v3872_v25  ;;  %v3124_v24 = vsel %vm8383_vm14, %v7022_v61, %v3121_v30  ;;  %3132 = vst.msk [vmem:[#allocation3 + $0x118] sm:$0xf] %vm2748_vm2, %v3121_v30  ;;  %v3641_v55 = vand.u32 4294901760, %v3510_v53  ;;  %v3509_v32 = vld [vmem:[#allocation3 + $0xd0] sm:$0xff]  ;;  %v7120_v18 = vld [vmem:[#allocation3 + $0xf8] sm:$0xff] }
 0x278   : > { %8379 = vst [vmem:[#allocation37_spill] sm:$0xff] %v7106_v47  ;;  %8380 = vst [vmem:[#allocation38_spill] sm:$0xff] %v7110_v22  ;;  %v3878_v63 = vand.u32 4294901760, %v3877_v57  ;;  %v3643_v28 = vand.u32 4294901760, %v3509_v32  ;;  %v3912_v17 = vand.u32 4294901760, %v7103_v50  ;;  %v3918_v0 = vand.u32 4294901760, %v7110_v22 }
 0x279   : > { %8381 = vst [vmem:[#allocation39_spill] sm:$0xff] %v7113_v38  ;;  %8382 = vst [vmem:[#allocation40_spill] sm:$0xff] %v7115_v39  ;;  %5413 = vmatpush1.bf16.msra.mxu1 %v7095_v42  ;;  %5605 = vmatpush1.bf16.msra.mxu0 %v7095_v42  ;;  %v7128_v61 = vpack.c.bf16 %v3641_v55, %v3637_v60  ;;  %v7130_v25 = vsub.f32 %v3510_v53, %v3641_v55  ;;  %v7147_v53 = vld [vmem:[#allocation3 + $0x108] sm:$0xff]  ;;  %vm3553_vm12 = vcmask 257024  }
 0x27a   : > { %8384 = vst [vmem:[#allocation41_spill] sm:$0xff] %v7122_v2  ;;  %3131 = vst [vmem:[#allocation3 + $0x110] sm:$0xf] %v3124_v24  ;;  %v7132_v3 = vpack.c.bf16 %v3878_v63, %v3866_v12  ;;  %v3154_v30 = vpop.permute.xlu1 %3153  ;;  %v7134_v57 = vpack.c.bf16 %v3643_v28, %v3639_v52  ;;  %v7136_v14 = vsub.f32 %v3509_v32, %v3643_v28  ;;  %v7138_v4 = vld [vmem:[#allocation3 + $0xe8] sm:$0xff]  ;;  %v8194_v24 = vand.u32 4294901760, %v7120_v18 }
 0x27b   : > { %8385 = vst [vmem:[#allocation42_spill] sm:$0xff] %v7128_v61  ;;  %8386 = vst [vmem:[#allocation43_spill] sm:$0xff] %v7130_v25  ;;  %v3157_v42 = vsel %vm3155_vm1, %v7046_v1, %v3154_v30  ;;  %5415 = vmatprep.subr.bf16.mxu1 %v7128_v61  ;;  %5607 = vmatprep.subr.bf16.mxu0 %v7128_v61  ;;  %v8193_v63 = vand.u32 4294901760, %v7138_v4  ;;  %v3913_v55 = vsub.f32 %v7103_v50, %v3912_v17  ;;  %v3278_v1 = vpop.permute.xlu0 %3277  ;;  %vm8398_vm1 = vcmask 752640  }
 0x27c   : > { %8387 = vst [vmem:[#allocation44_spill] sm:$0xff] %v7132_v3  ;;  %8388 = vst [vmem:[#allocation45_spill] sm:$0xff] %v7134_v57  ;;  %v3924_v60 = vand.u32 4294901760, %v7130_v25  ;;  %v3919_v52 = vsub.f32 %v7110_v22, %v3918_v0  ;;  %v3930_v12 = vand.u32 4294901760, %v7136_v14  ;;  %v8394_v61 = vand.u32 4294901760, %v6722_v13  ;;  %v3480_v3 = vld [vmem:[%s8138_s3 + $0x18] sm:$0xff] }
 0x27d   : > { %8389 = vst [vmem:[#allocation46_spill] sm:$0xff] %v7136_v14  ;;  %8390 = vst [vmem:[#allocation47_spill] sm:$0xff] %v7138_v4  ;;  %5417 = vmatpush1.bf16.msra.mxu1 %v7134_v57  ;;  %5609 = vmatpush1.bf16.msra.mxu0 %v7134_v57  ;;  %v7159_v32 = vpack.c.bf16 %v8194_v24, %v8193_v63  ;;  %v8198_v33 = vand.u32 4294901760, %v7147_v53 }
 0x27e   : > { %3165 = vst.msk [vmem:[#allocation3 + $0x128] sm:$0x3f] %vm2784_vm10, %v3154_v30  ;;  %8391 = vst [vmem:[#allocation48_spill] sm:$0xff] %v7147_v53  ;;  %v3925_v28 = vsub.f32 %v7130_v25, %v3924_v60  ;;  %v7162_v30 = vpack.c.bf16 %v3924_v60, %v3912_v17  ;;  %v7166_v56 = vpack.c.bf16 %v8394_v61, %v3647_v54  ;;  %v7168_v57 = vld [vmem:[#allocation3 + $0x118] sm:$0xff]  ;;  %v3914_v17 = vand.u32 4294901760, %v3913_v55 }
 0x27f   : > { %3164 = vst [vmem:[#allocation3 + $0x120] sm:$0x3f] %v3157_v42  ;;  %8392 = vst [vmem:[#allocation49_spill] sm:$0xff] %v7159_v32  ;;  %v3187_v42 = vpop.permute.xlu1 %3186  ;;  %v3931_v20 = vsub.f32 %v7136_v14, %v3930_v12  ;;  %v7172_v40 = vpack.c.bf16 %v3930_v12, %v3918_v0  ;;  %5419 = vmatprep.subr.bf16.mxu1 %v7159_v32  ;;  %5611 = vmatprep.subr.bf16.mxu0 %v7159_v32  ;;  %v8199_v13 = vand.u32 4294901760, %v7168_v57  ;;  %v3311_v24 = vpop.permute.xlu0 %3310 }
 0x280   : > { %8393 = vst [vmem:[#allocation50_spill] sm:$0xff] %v7162_v30  ;;  %8395 = vst [vmem:[#allocation51_spill] sm:$0xff] %v7166_v56  ;;  %v7176_v63 = vsel %vm8398_vm1, %v7065_v21, %v3187_v42  ;;  %v3926_v61 = vand.u32 4294901760, %v3925_v28  ;;  %v3920_v60 = vand.u32 4294901760, %v3919_v52  ;;  %v8402_v55 = vand.u32 4294901760, %v6968_v9 }
 0x281   : > { %8396 = vst [vmem:[#allocation52_spill] sm:$0xff] %v7168_v57  ;;  %8397 = vst [vmem:[#allocation53_spill] sm:$0xff] %v7172_v40  ;;  %v3517_v54 = vld [vmem:[#allocation3 + $0x110] sm:$0xff]  ;;  %5421 = vmatpush1.bf16.msra.mxu1 %v7166_v56  ;;  %5613 = vmatpush1.bf16.msra.mxu0 %v7166_v56  ;;  %v3932_v12 = vand.u32 4294901760, %v3931_v20  ;;  %v7188_v21 = vpack.c.bf16 %v8199_v13, %v8198_v33  ;;  %v8202_v13 = vand.u32 4294901760, %v7176_v63  ;;  %v8416_v33 = vand.u32 4294901760, %v6996_v59 }
 0x282   : > { %3198 = vst.msk [vmem:[#allocation3 + $0x138] sm:$0xff] %vm8399_vm15, %v3187_v42  ;;  %v3659_v0 = vand.u32 4294901760, %v3517_v54  ;;  %v7190_v42 = vpack.c.bf16 %v3926_v61, %v3914_v17  ;;  %v5927_v17 = vld [vmem:[#allocation2] sm:$0xff]  ;;  %vm8704_vm14 = vmmov %vm8426_vm3  ;;  %vm8706_vm15 = vcmask 949248  }
 0x283   : > { %8400 = vst [vmem:[#allocation54_spill] sm:$0xff] %v7188_v21  ;;  %v3247_v32 = vpop.permute.xlu1 %3246  ;;  %v7198_v56 = vpack.c.bf16 %v3932_v12, %v3920_v60  ;;  %5423 = vmatprep.subr.bf16.mxu1 %v7188_v21  ;;  %5615 = vmatprep.subr.bf16.mxu0 %v7188_v21  ;;  %v7220_v12 = vld [vmem:[#allocation3 + $0x148] sm:$0xff]  ;;  %v7245_v21 = vsub.f32 %v6996_v59, %v8416_v33  ;;  %vm8705_vm1 = vmmov %vm8426_vm3 }
 0x284   : > { %8401 = vst [vmem:[#allocation55_spill] sm:$0xff] %v7190_v42  ;;  %v7194_v28 = vpack.c.bf16 %v3659_v0, %v8402_v55  ;;  %v7196_v31 = vsub.f32 %v3517_v54, %v3659_v0  ;;  %v3250_v20 = vsel %vm3248_vm6, %v7108_v41, %v3247_v32  ;;  %3258 = vst.msk [vmem:[#allocation3 + $0x168] sm:$0xf] %vm2748_vm2, %v3247_v32  ;;  %v7211_v54 = vld [vmem:[#allocation3 + $0x158] sm:$0xff]  ;;  %v8407_v41 = vand.u32 4294901760, %v6554_v48  ;;  %v7227_v48 = vld [vmem:[#allocation3 + $0x150] sm:$0xff] }
 0x285   : > { %8405 = vst [vmem:[#allocation58_spill] sm:$0xff] %v7198_v56  ;;  %3257 = vst [vmem:[#allocation3 + $0x160] sm:$0xf] %v3250_v20  ;;  %v7209_v9 = vld [vmem:[#allocation3 + $0x128] sm:$0xff]  ;;  %vm8410_vm6 = vcmask 728064   ;;  %v3370_v20 = vpop.permute.xlu0 %3369  ;;  %v8429_v42 = vand.u32 4294901760, %v7227_v48 }
 0x286   : > { %8403 = vst [vmem:[#allocation56_spill] sm:$0xff] %v7194_v28  ;;  %8404 = vst [vmem:[#allocation57_spill] sm:$0xff] %v7196_v31  ;;  %v7205_v52 = vld [vmem:[#allocation3 + $0x120] sm:$0xff]  ;;  %5425 = vmatpush1.bf16.msra.mxu1 %v7194_v28  ;;  %5617 = vmatpush1.bf16.msra.mxu0 %v7194_v28  ;;  %v7215_v61 = vsub.f32 %v5927_v17, %v8407_v41  ;;  %v8412_v41 = vand.u32 4294901760, %v6788_v7  ;;  %v8417_v40 = vand.u32 4294901760, %v7209_v9  ;;  %v8442_v39 = vand.u32 4294901760, %v7245_v21 }
 0x287   : > { %8406 = vst [vmem:[#allocation59_spill] sm:$0xff] %v7211_v54  ;;  %v3280_v32 = vpop.permute.xlu1 %3279  ;;  %8409 = vst [vmem:[#allocation61_spill] sm:$0xff] %v7220_v12  ;;  %v3477_v17 = vld [vmem:[%s8138_s3] sm:$0xff] }
 0x288   : > { %8408 = vst [vmem:[#allocation60_spill] sm:$0xff] %v7215_v61  ;;  %v3283_v55 = vsel %vm8410_vm6, %v3278_v1, %v3280_v32  ;;  %3291 = vst.msk [vmem:[#allocation3 + $0x178] sm:$0x3f] %vm2784_vm10, %v3280_v32  ;;  %v7235_v60 = vsub.f32 %v6788_v7, %v8412_v41  ;;  %v5928_v1 = vld [vmem:[#allocation3 + $0x50] sm:$0xff]  ;;  %v8414_v32 = vand.u32 4294901760, %v6697_v58  ;;  %v8203_v41 = vand.u32 4294901760, %v7220_v12 }
 0x289   : > { %v7217_v0 = vld [vmem:[#allocation3 + $0x138] sm:$0xff]  ;;  %8411 = vst [vmem:[#allocation62_spill] sm:$0xff] %v7227_v48  ;;  %3290 = vst [vmem:[#allocation3 + $0x170] sm:$0x3f] %v3283_v55  ;;  %v7254_v58 = vld [vmem:[#allocation3 + $0x140] sm:$0xff]  ;;  %v8421_v55 = vand.u32 4294901760, %v7205_v52 }
 0x28a   : > { %8413 = vst [vmem:[#allocation63_spill] sm:$0xff] %v7235_v60  ;;  %v7239_v28 = vsub.f32 %v5928_v1, %v8414_v32  ;;  %v8418_v56 = vand.u32 4294901760, %v7217_v0  ;;  %8420 = vst [vmem:[#allocation66_spill] sm:$0xff] %v7254_v58  ;;  %v7263_v33 = vand.u32 4294901760, %v3477_v17  ;;  %vm8707_vm6 = vcmask 941056  }
 0x28b   : > { %v3313_v1 = vpop.permute.xlu1 %3312  ;;  %v7260_v32 = vpack.c.bf16 %v8202_v13, %v8421_v55  ;;  %v7281_v13 = vld [vmem:[#allocation3 + $0x168] sm:$0xff] }
 0x28c   : > { %8415 = vst [vmem:[#allocation64_spill] sm:$0xff] %v7239_v28  ;;  %v7251_v7 = vpack.c.bf16 %v8418_v56, %v8417_v40  ;;  %8423 = vst [vmem:[#allocation68_spill] sm:$0xff] %v7263_v33  ;;  %v7266_v30 = vsel %vm8424_vm0, %v3311_v24, %v3313_v1  ;;  %v8427_v40 = vand.u32 4294901760, %v7211_v54  ;;  %v8209_v24 = vand.u32 4294901760, %v7254_v58 }
 0x28d   : > { %8422 = vst [vmem:[#allocation67_spill] sm:$0xff] %v7260_v32  ;;  %8425 = vst [vmem:[#allocation69_spill] sm:$0xff] %v7266_v30  ;;  %v7300_v59 = vsub.f32 %v3477_v17, %v7263_v33  ;;  %v8435_v55 = vand.u32 4294901760, %v7239_v28  ;;  %v8441_v17 = vand.u32 4294901760, %v6808_v5 }
 0x28e   : > { %8419 = vst [vmem:[#allocation65_spill] sm:$0xff] %v7251_v7  ;;  %3324 = vst.msk [vmem:[#allocation3 + $0x188] sm:$0xff] %vm8426_vm3, %v3313_v1  ;;  %5427 = vmatprep.subr.bf16.mxu1 %v7251_v7  ;;  %5619 = vmatprep.subr.bf16.mxu0 %v7251_v7  ;;  %v7275_v56 = vpack.c.bf16 %v8427_v40, %v8203_v41  ;;  %v7287_v40 = vld [vmem:[#allocation3 + $0x160] sm:$0xff]  ;;  %v3403_v7 = vpop.permute.xlu0 %3402  ;;  %v7295_v31 = vpack.c.bf16 %v8429_v42, %v8209_v24  ;;  %v8432_v42 = vand.u32 4294901760, %v7215_v61 }
 0x28f   : > { %5429 = vmatpush1.bf16.msra.mxu1 %v7260_v32  ;;  %5621 = vmatpush1.bf16.msra.mxu0 %v7260_v32  ;;  %v3372_v32 = vpop.permute.xlu1 %3371  ;;  %v7297_v1 = vld [vmem:[#allocation3 + $0x178] sm:$0xff]  ;;  %8431 = vst [vmem:[#allocation72_spill] sm:$0xff] %v7300_v59  ;;  %v3781_v48 = vsub.f32 %v6808_v5, %v8441_v17  ;;  %v8447_v17 = vand.u32 4294901760, %v6816_v16  ;;  %vm8708_vm0 = vmmov %vm8705_vm1 }
 0x290   : > { %8428 = vst [vmem:[#allocation70_spill] sm:$0xff] %v7275_v56  ;;  %5431 = vmatprep.subr.bf16.mxu1 %v7275_v56  ;;  %5623 = vmatprep.subr.bf16.mxu0 %v7275_v56  ;;  %8430 = vst [vmem:[#allocation71_spill] sm:$0xff] %v7295_v31  ;;  %v3375_v51 = vsel %vm3373_vm4, %v3370_v20, %v3372_v32  ;;  %v7307_v2 = vld [vmem:[#allocation3 + $0x170] sm:$0xff]  ;;  %v7312_v24 = vsub.f32 %v7215_v61, %v8432_v42  ;;  %v8434_v56 = vand.u32 4294901760, %v7235_v60  ;;  %vm8458_vm4 = vcmask 998400  }
 0x291   : > { %3383 = vst.msk [vmem:[#allocation3 + $0x1b8] sm:$0xf] %vm2748_vm2, %v3372_v32  ;;  %3382 = vst [vmem:[#allocation3 + $0x1b0] sm:$0xf] %v3375_v51  ;;  %v7318_v32 = vld [vmem:[#allocation3 + $0x198] sm:$0xff]  ;;  %v7326_v42 = vsub.f32 %v7239_v28, %v8435_v55  ;;  %v8437_v51 = vand.u32 4294901760, %v7281_v13  ;;  %v3787_v58 = vsub.f32 %v6816_v16, %v8447_v17 }
 0x292   : > { %8433 = vst [vmem:[#allocation73_spill] sm:$0xff] %v7318_v32  ;;  %v3769_v41 = vsub.f32 %v7235_v60, %v8434_v56  ;;  %v8438_v33 = vand.u32 4294901760, %v7297_v1  ;;  %v7334_v20 = vld [vmem:[#allocation3 + $0x190] sm:$0xff]  ;;  %v7342_v56 = vsub.f32 %v7245_v21, %v8442_v39  ;;  %v8443_v55 = vand.u32 4294901760, %v7287_v40 }
 0x293   : > { %5433 = vmatpush1.bf16.msra.mxu1 %v7295_v31  ;;  %5625 = vmatpush1.bf16.msra.mxu0 %v7295_v31  ;;  %8436 = vst [vmem:[#allocation74_spill] sm:$0xff] %v7326_v42  ;;  %8440 = vst [vmem:[#allocation76_spill] sm:$0xff] %v7334_v20  ;;  %v3405_v54 = vpop.permute.xlu1 %3404  ;;  %v8444_v38 = vand.u32 4294901760, %v7307_v2  ;;  %v8450_v53 = vand.u32 4294901760, %v7318_v32  ;;  %v3782_v37 = vand.u32 4294901760, %v3781_v48  ;;  %v3578_v48 = vsel %vm8458_vm4, %v3480_v3, 0 }
 0x294   : > { %v7332_v31 = vpack.c.bf16 %v8438_v33, %v8437_v51  ;;  %v3408_v39 = vsel %vm3406_vm8, %v3403_v7, %v3405_v54  ;;  %3416 = vst.msk [vmem:[#allocation3 + $0x1c8] sm:$0x3f] %vm2784_vm10, %v3405_v54  ;;  %v3436_v51 = vpop.permute.xlu0 %3435  ;;  %v7369_v7 = vld [vmem:[#allocation3 + $0x1a8] sm:$0xff]  ;;  %v3770_v17 = vand.u32 4294901760, %v3769_v41  ;;  %v8453_v41 = vand.u32 4294901760, %v7266_v30  ;;  %vm8461_vm8 = vmmov %vm8426_vm3 }
 0x295   : > { %v7348_v47 = vpack.c.bf16 %v8444_v38, %v8443_v55  ;;  %v7350_v33 = vld [vmem:[#allocation3 + $0x188] sm:$0xff]  ;;  %3415 = vst [vmem:[#allocation3 + $0x1c0] sm:$0x3f] %v3408_v39  ;;  %8448 = vst [vmem:[#allocation79_spill] sm:$0xff] %v7369_v7  ;;  %v7379_v39 = vld [vmem:[#allocation3 + $0x1a0] sm:$0xff]  ;;  %v8463_v3 = vand.u32 4294901760, %v7235_v60 }
 0x296   : > { %8439 = vst [vmem:[#allocation75_spill] sm:$0xff] %v7332_v31  ;;  %8446 = vst [vmem:[#allocation78_spill] sm:$0xff] %v7350_v33  ;;  %5435 = vmatprep.subr.bf16.mxu1 %v7332_v31  ;;  %5627 = vmatprep.subr.bf16.mxu0 %v7332_v31  ;;  %v3776_v31 = vand.u32 4294901760, %v7312_v24  ;;  %v8449_v55 = vand.u32 4294901760, %v7350_v33  ;;  %v8454_v24 = vand.u32 4294901760, %v7334_v20  ;;  %v8457_v33 = vand.u32 4294901760, %v7300_v59 }
 0x297   : > { %8445 = vst [vmem:[#allocation77_spill] sm:$0xff] %v7348_v47  ;;  %5437 = vmatpush1.bf16.msra.mxu1 %v7348_v47  ;;  %5629 = vmatpush1.bf16.msra.mxu0 %v7348_v47  ;;  %8452 = vst [vmem:[#allocation81_spill] sm:$0xff] %v7379_v39  ;;  %v3438_v12 = vpop.permute.xlu1 %3437  ;;  %v8459_v47 = vand.u32 4294901760, %v7120_v18  ;;  %v8471_v32 = vand.u32 4294901760, %v7379_v39 }
 0x298   : > { %v7377_v57 = vpack.c.bf16 %v8450_v53, %v8449_v55  ;;  %v7387_v45 = vpack.c.bf16 %v8454_v24, %v8453_v41  ;;  %v7389_v38 = vld [vmem:[#allocation3 + $0x1b8] sm:$0xff]  ;;  %v7394_v53 = vsub.f32 %v7300_v59, %v8457_v33  ;;  %v3788_v55 = vand.u32 4294901760, %v3787_v58  ;;  %3449 = vst.msk [vmem:[#allocation3 + $0x1d8] sm:$0xff] %vm8461_vm8, %v3438_v12  ;;  %v7410_v41 = vld [vmem:[#allocation3 + $0x1b0] sm:$0xff]  ;;  %v3482_v33 = vld [vmem:[%s8138_s3 + $0x28] sm:$0xf]  ;;  %v3459_v60 = vpop.permute.xlu0 %3458 }
 0x299   : > { %8456 = vst [vmem:[#allocation83_spill] sm:$0xff] %v7389_v38  ;;  %v7400_v54 = vsub.f32 %v7120_v18, %v8459_v47  ;;  %v7403_v30 = vsel %vm3439_vm7, %v3436_v51, %v3438_v12  ;;  %8462 = vst [vmem:[#allocation85_spill] sm:$0xff] %v7410_v41  ;;  %v8464_v12 = vand.u32 4294901760, %v6808_v5  ;;  %v3479_v58 = vld [vmem:[%s8138_s3 + $0x10] sm:$0xff]  ;;  %v8465_v47 = vand.u32 4294901760, %v7369_v7 }
 0x29a   : > { %8451 = vst [vmem:[#allocation80_spill] sm:$0xff] %v7377_v57  ;;  %8455 = vst [vmem:[#allocation82_spill] sm:$0xff] %v7387_v45  ;;  %5439 = vmatprep.subr.bf16.mxu1 %v7377_v57  ;;  %5631 = vmatprep.subr.bf16.mxu0 %v7377_v57  ;;  %v8466_v18 = vand.u32 4294901760, %v7389_v38  ;;  %v7435_v57 = vpack.c.bf16 %v3782_v37, %v3770_v17  ;;  %v7443_v5 = vand.u32 4294901760, %v3578_v48  ;;  %v8472_v7 = vand.u32 4294901760, %v7410_v41 }
 0x29b   : > { %8460 = vst [vmem:[#allocation84_spill] sm:$0xff] %v7400_v54  ;;  %5441 = vmatpush1.bf16.msra.mxu1 %v7387_v45  ;;  %5633 = vmatpush1.bf16.msra.mxu0 %v7387_v45  ;;  %v7420_v51 = vpack.c.bf16 %v8464_v12, %v8463_v3  ;;  %v8468_v3 = vand.u32 4294901760, %v7215_v61  ;;  %v8469_v12 = vand.u32 4294901760, %v6816_v16  ;;  %v3461_v20 = vpop.permute.xlu1 %3460  ;;  %v7452_v17 = vpack.c.bf16 %v3788_v55, %v3776_v31  ;;  %vm8474_vm7 = vmmov %vm8426_vm3  ;;  %v3481_v38 = vld [vmem:[%s8138_s3 + $0x20] sm:$0xf] }
 0x29c   : > { %v7433_v45 = vpack.c.bf16 %v8466_v18, %v8465_v47  ;;  %8470 = vst [vmem:[#allocation87_spill] sm:$0xff] %v7443_v5  ;;  %v7449_v54 = vpack.c.bf16 %v8472_v7, %v8471_v32  ;;  %v3546_v47 = vld [vmem:[#allocation3 + $0x1f8] sm:$0x3]  ;;  %v3545_v18 = vld [vmem:[#allocation3 + $0x1f0] sm:$0x3]  ;;  %v3792_v16 = vand.u32 4294901760, %v6986_v34  ;;  %vm8476_vm10 = vmmov %vm8458_vm4  ;;  %v7487_v41 = vsub.f32 %v3578_v48, %v7443_v5 }
 0x29d   : > { %v7441_v24 = vpack.c.bf16 %v8469_v12, %v8468_v3  ;;  %v7456_v3 = vsel %vm3466_vm9, %v3459_v60, %v3461_v20  ;;  %3474 = vst.msk [vmem:[#allocation3 + $0x1e8] sm:$0xff] %vm8474_vm7, %v3461_v20  ;;  %v7461_v12 = vld [vmem:[#allocation3 + $0x1c0] sm:$0xff]  ;;  %v3804_v32 = vand.u32 4294901760, %v7000_v8  ;;  %v7464_v7 = vand.u32 4294901760, %v3479_v58  ;;  %v7469_v60 = vld [vmem:[#allocation3 + $0x1c8] sm:$0xff]  ;;  %vm8709_vm3 = vmmov %vm8706_vm15 }
 0x29e   : > { %8467 = vst [vmem:[#allocation86_spill] sm:$0xff] %v7433_v45  ;;  %8473 = vst [vmem:[#allocation88_spill] sm:$0xff] %v7449_v54  ;;  %5443 = vmatprep.subr.bf16.mxu1 %v7433_v45  ;;  %5635 = vmatprep.subr.bf16.mxu0 %v7433_v45  ;;  %v3581_v31 = vsel %vm8476_vm10, %v3482_v33, 0  ;;  %v3810_v20 = vand.u32 4294901760, %v7006_v44  ;;  %v3816_v55 = vand.u32 4294901760, %v7020_v27  ;;  %v8477_v37 = vand.u32 4294901760, %v6941_v35 }
 0x29f   : > { %8475 = vst [vmem:[#allocation89_spill] sm:$0xff] %v7464_v7  ;;  %5445 = vmatpush1.bf16.msra.mxu1 %v7449_v54  ;;  %5637 = vmatpush1.bf16.msra.mxu0 %v7449_v54  ;;  %vm8479_vm9 = vcmask 1041408   ;;  %v3798_v54 = vand.u32 4294901760, %v6990_v36  ;;  %8482 = vst [vmem:[#allocation92_spill] sm:$0xff] %v7487_v41  ;;  %v7492_v19 = vld [vmem:[#allocation3 + $0x1d8] sm:$0xff]  ;;  %v3793_v61 = vsub.f32 %v6986_v34, %v3792_v16  ;;  %v3805_v48 = vsub.f32 %v7000_v8, %v3804_v32 }
 0x2a0   : > { %v7476_v45 = vsub.f32 %v6941_v35, %v8477_v37  ;;  %v7480_v39 = vsel %vm8479_vm9, %v3546_v47, 0  ;;  %vm8481_vm5 = vmmov %vm8479_vm9  ;;  %v7497_v35 = vand.u32 4294901760, %v3581_v31  ;;  %v8276_v4 = vand.u32 4294901760, %v7492_v19 }
 0x2a1   : > { %8480 = vst [vmem:[#allocation91_spill] sm:$0xff] %v7480_v39  ;;  %v7483_v33 = vsel %vm8481_vm5, %v3545_v18, 0  ;;  %v8275_v18 = vand.u32 4294901760, %v7469_v60  ;;  %v7503_v5 = vsub.f32 %v3479_v58, %v7464_v7  ;;  %v3811_v42 = vsub.f32 %v7006_v44, %v3810_v20  ;;  %vm8710_vm4 = vmmov %vm8707_vm6 }
 0x2a2   : > { %8478 = vst [vmem:[#allocation90_spill] sm:$0xff] %v7476_v45  ;;  %8483 = vst [vmem:[#allocation93_spill] sm:$0xff] %v7497_v35  ;;  %v3817_v37 = vsub.f32 %v7020_v27, %v3816_v55  ;;  %v7508_v34 = vand.u32 4294901760, %v3481_v38  ;;  %v8487_v28 = vand.u32 4294901760, %v7461_v12  ;;  %v8488_v7 = vand.u32 4294901760, %v7403_v30 }
 0x2a3   : > { %8484 = vst [vmem:[#allocation94_spill] sm:$0xff] %v7503_v5  ;;  %v7514_v47 = vpack.c.bf16 %v8276_v4, %v8275_v18  ;;  %v3799_v10 = vsub.f32 %v6990_v36, %v3798_v54  ;;  %v7530_v18 = vsub.f32 %v3581_v31, %v7497_v35  ;;  %v3806_v8 = vand.u32 4294901760, %v3805_v48  ;;  %vm8711_vm8 = vmmov %vm8708_vm0 }
 0x2a4   : > { %8485 = vst [vmem:[#allocation95_spill] sm:$0xff] %v7508_v34  ;;  %v7523_v44 = vpack.c.bf16 %v8488_v7, %v8487_v28  ;;  %v7525_v27 = vld [vmem:[#allocation3 + $0x1e8] sm:$0xff]  ;;  %v8491_v58 = vand.u32 4294901760, %v6992_v43  ;;  %v3741_v7 = vand.u32 4294901760, %v7503_v5  ;;  %v3794_v31 = vand.u32 4294901760, %v3793_v61  ;;  %vm8712_vm7 = vmmov %vm8709_vm3 }
 0x2a5   : > { %8486 = vst [vmem:[#allocation96_spill] sm:$0xff] %v7514_v47  ;;  %8490 = vst [vmem:[#allocation98_spill] sm:$0xff] %v7530_v18  ;;  %5447 = vmatprep.subr.bf16.mxu1 %v7514_v47  ;;  %5639 = vmatprep.subr.bf16.mxu0 %v7514_v47  ;;  %v8288_v4 = vand.u32 4294901760, %v7525_v27  ;;  %v3812_v45 = vand.u32 4294901760, %v3811_v42  ;;  %v3818_v46 = vand.u32 4294901760, %v3817_v37  ;;  %v7544_v35 = vsub.f32 %v3481_v38, %v7508_v34 }
 0x2a6   : > { %8489 = vst [vmem:[#allocation97_spill] sm:$0xff] %v7523_v44  ;;  %v7538_v28 = vsub.f32 %v6992_v43, %v8491_v58  ;;  %5449 = vmatpush1.bf16.msra.mxu1 %v7523_v44  ;;  %5641 = vmatpush1.bf16.msra.mxu0 %v7523_v44  ;;  %v8493_v48 = vand.u32 4294901760, %v7480_v39  ;;  %v3852_v58 = vand.u32 4294901760, %v7038_v11  ;;  %v8495_v43 = vand.u32 4294901760, %v7487_v41  ;;  %vm8713_vm10 = vmmov %vm8710_vm4 }
 0x2a7   : > { %8492 = vst [vmem:[#allocation99_spill] sm:$0xff] %v7544_v35  ;;  %v8496_v61 = vand.u32 4294901760, %v7456_v3  ;;  %v8497_v42 = vand.u32 4294901760, %v7483_v33  ;;  %v5650_v37 = vpack.c.bf16 %v3804_v32, %v3792_v16  ;;  %v3800_v34 = vand.u32 4294901760, %v3799_v10 }
 0x2a8   : > { %v7550_v47 = vpack.c.bf16 %v8493_v48, %v8288_v4  ;;  %v3736_v44 = vsub.f32 %v7487_v41, %v8495_v43  ;;  %v5458_v48 = vpack.c.bf16 %v3806_v8, %v3794_v31  ;;  %v5652_v4 = vpack.c.bf16 %v3810_v20, %v3798_v54 }
 0x2a9   : > { %v7561_v38 = vpack.c.bf16 %v8497_v42, %v8496_v61  ;;  %v3742_v36 = vsub.f32 %v7503_v5, %v3741_v7  ;;  %v3757_v43 = vand.u32 4294901760, %v7544_v35  ;;  %v5460_v61 = vpack.c.bf16 %v3812_v45, %v3800_v34  ;;  %v8567_v5 = vld [vmem:[#allocation41_spill] sm:$0xff] }
 0x2aa   : > { %8494 = vst [vmem:[#allocation100_spill] sm:$0xff] %v7550_v47  ;;  %5451 = vmatprep.subr.bf16.mxu1 %v7550_v47  ;;  %5643 = vmatprep.subr.bf16.mxu0 %v7550_v47  ;;  %v8499_v16 = vand.u32 4294901760, %v7342_v56  ;;  %v8500_v32 = vand.u32 4294901760, %v7245_v21  ;;  %v8289_v39 = vand.u32 4294901760, %v6959_v49  ;;  %v8501_v8 = vand.u32 4294901760, %v7176_v63 }
 0x2ab   : > { %8498 = vst [vmem:[#allocation101_spill] sm:$0xff] %v7561_v38  ;;  %5453 = vmatpush1.bf16.msra.mxu1 %v7561_v38  ;;  %5645 = vmatpush1.bf16.msra.mxu0 %v7561_v38  ;;  %v3853_v45 = vsub.f32 %v7038_v11, %v3852_v58  ;;  %v3737_v56 = vand.u32 4294901760, %v3736_v44  ;;  %v8504_v20 = vand.u32 4294901760, %v7209_v9  ;;  %v8510_v44 = vand.u32 4294901760, %v7297_v1 }
 0x2ac   : > { %v5462_v10 = vpack.c.bf16 %v8499_v16, %v3818_v46  ;;  %v5654_v42 = vpack.c.bf16 %v8500_v32, %v3816_v55  ;;  %v7578_v54 = vsub.f32 %v7176_v63, %v8501_v8  ;;  %5455 = vmatprep.subr.bf16.mxu1 %v7435_v57  ;;  %5647 = vmatprep.subr.bf16.mxu0 %v7420_v51  ;;  %v8503_v46 = vand.u32 4294901760, %v7044_v26 }
 0x2ad   : > { %v7593_v55 = vsub.f32 %v7209_v9, %v8504_v20  ;;  %v8506_v63 = vand.u32 4294901760, %v7217_v0  ;;  %v8508_v51 = vand.u32 4294901760, %v7205_v52  ;;  %v8509_v16 = vand.u32 4294901760, %v7530_v18 }
 0x2ae   : > { %8502 = vst [vmem:[#allocation102_spill] sm:$0xff] %v7578_v54  ;;  %v7588_v34 = vsub.f32 %v7044_v26, %v8503_v46  ;;  %v7611_v8 = vsub.f32 %v7297_v1, %v8510_v44  ;;  %v8511_v9 = vand.u32 4294901760, %v7394_v53  ;;  %v3743_v46 = vand.u32 4294901760, %v3742_v36  ;;  %v8536_v36 = vld [vmem:[#allocation47_spill] sm:$0xff] }
 0x2af   : > { %8505 = vst [vmem:[#allocation103_spill] sm:$0xff] %v7593_v55  ;;  %v7598_v57 = vsub.f32 %v7217_v0, %v8506_v63  ;;  %v7603_v31 = vsub.f32 %v7205_v52, %v8508_v51  ;;  %v3752_v32 = vsub.f32 %v7530_v18, %v8509_v16  ;;  %v8512_v0 = vand.u32 4294901760, %v7300_v59 }
 0x2b0   : > { %3728 = vmatmul.mubr.f32.vlgmr.msra.gmra.mrb[8].mxu1 %v8511_v9  ;;  %v3758_v52 = vsub.f32 %v7544_v35, %v3757_v43  ;;  %v8513_v63 = vand.u32 4294901760, %v7307_v2  ;;  %v3824_v1 = vand.u32 4294901760, %v7538_v28  ;;  %v8515_v16 = vand.u32 4294901760, %v7281_v13 }
 0x2b1   : > { %8507 = vst [vmem:[#allocation104_spill] sm:$0xff] %v7598_v57  ;;  %4533 = vmatmul.mubr.f32.vlgmr.msra.gmra.mrb[8].mxu0 %v8512_v0  ;;  %5457 = vmatpush1.bf16.msra.mxu1 %v7452_v17  ;;  %v8518_v28 = vand.u32 4294901760, %v7287_v40  ;;  %v8533_v17 = vld [vmem:[#allocation64_spill] sm:$0xff]  ;;  %v8537_v20 = vand.u32 4294901760, %v8536_v36  ;;  %v8548_v53 = vand.u32 4294901760, %v7044_v26  ;;  %v8563_v59 = vand.u32 4294901760, %v6959_v49 }
 0x2b2   : > { %v7625_v51 = vsub.f32 %v7307_v2, %v8513_v63  ;;  %5649 = vmatpush1.bf16.msra.mxu0 %v7441_v24  ;;  %v7637_v44 = vsub.f32 %v7281_v13, %v8515_v16  ;;  %v8516_v2 = vand.u32 4294901760, %v7492_v19  ;;  %5459 = vmatprep.subr.bf16.mxu1 %v5458_v48  ;;  %v3854_v24 = vand.u32 4294901760, %v3853_v45 }
 0x2b3   : > { %5651 = vmatprep.subr.bf16.mxu0 %v5650_v37  ;;  %v7649_v0 = vsub.f32 %v7287_v40, %v8518_v28  ;;  %v8520_v63 = vand.u32 4294901760, %v7469_v60  ;;  %v8521_v16 = vand.u32 4294901760, %v7461_v12  ;;  %3738 = vmatprep.mubr.f32.mxu1 %v3737_v56  ;;  %v8523_v37 = vand.u32 4294901760, %v7487_v41 }
 0x2b4   : > { %8514 = vst [vmem:[#allocation105_spill] sm:$0xff] %v7625_v51  ;;  %v7642_v9 = vsub.f32 %v7492_v19, %v8516_v2  ;;  %v3753_v48 = vand.u32 4294901760, %v3752_v32  ;;  %3744 = vmatmul.mubr.f32.gmra.mrb[10].mxu1 %v3743_v46  ;;  %v3759_v45 = vand.u32 4294901760, %v3758_v52  ;;  %v8525_v32 = vand.u32 4294901760, %v6946_v62  ;;  %v8526_v46 = vld [vmem:[#allocation7_spill] sm:$0xff] }
 0x2b5   : > { %8519 = vst [vmem:[#allocation107_spill] sm:$0xff] %v7649_v0  ;;  %v7654_v13 = vsub.f32 %v7469_v60, %v8520_v63  ;;  %v7659_v19 = vsub.f32 %v7461_v12, %v8521_v16  ;;  %4541 = vmatprep.mubr.f32.mxu0 %v8523_v37  ;;  %v8524_v12 = vand.u32 4294901760, %v7403_v30  ;;  %5461 = vmatpush1.bf16.msra.mxu1 %v5460_v61  ;;  %v3888_v52 = vand.u32 4294901760, %v8526_v46  ;;  %v8527_v63 = vld [vmem:[#allocation90_spill] sm:$0xff]  ;;  %v8528_v37 = vld [vmem:[#allocation16_spill] sm:$0xff] }
 0x2b6   : > { %8517 = vst [vmem:[#allocation106_spill] sm:$0xff] %v7642_v9  ;;  %4545 = vmatmul.mubr.f32.gmra.mrb[10].mxu0 %v3741_v7  ;;  %v3847_v7 = vsub.f32 %v6946_v62, %v8525_v32  ;;  %5463 = vmatprep.subr.bf16.mxu1 %v5462_v10  ;;  %v3842_v16 = vand.u32 4294901760, %v8527_v63  ;;  %v8290_v61 = vand.u32 4294901760, %v8528_v37  ;;  %v8531_v60 = vld [vmem:[#allocation20_spill] sm:$0xff]  ;;  %v8534_v28 = vand.u32 4294901760, %v8533_v17 }
 0x2b7   : > { %8522 = vst [vmem:[#allocation108_spill] sm:$0xff] %v7659_v19  ;;  %v7672_v56 = vsub.f32 %v7403_v30, %v8524_v12  ;;  %5653 = vmatpush1.bf16.msra.mxu0 %v5652_v4  ;;  %v3901_v30 = vsub.f32 %v6959_v49, %v8289_v39  ;;  %v8529_v12 = vld [vmem:[#allocation74_spill] sm:$0xff]  ;;  %v8532_v40 = vand.u32 4294901760, %v8531_v60  ;;  %3754 = vmatprep.mubr.f32.mxu1 %v3753_v48  ;;  %v8535_v63 = vand.u32 4294901760, %v7530_v18 }
 0x2b8   : > { %5655 = vmatprep.subr.bf16.mxu0 %v5654_v42  ;;  %v8530_v32 = vand.u32 4294901760, %v8529_v12  ;;  %v3860_v42 = vand.u32 4294901760, %v7588_v34  ;;  %v7701_v4 = vsub.f32 %v8536_v36, %v8537_v20  ;;  %v8539_v12 = vld [vmem:[#allocation14_spill] sm:$0xff]  ;;  %3760 = vmatmul.mubr.f32.gmra.mrb[12].mxu1 %v3759_v45  ;;  %v3848_v34 = vand.u32 4294901760, %v3847_v7  ;;  %v3556_v20 = vld [vmem:[%s8139_s4 + $0x8] sm:$0xff]  ;;  %v8542_v36 = vld [vmem:[#allocation61_spill] sm:$0xff] }
 0x2b9   : > { %v5656_v10 = vpack.c.bf16 %v8534_v28, %v8532_v40  ;;  %4553 = vmatprep.mubr.f32.mxu0 %v8535_v63  ;;  %v8541_v48 = vld [vmem:[#allocation6_spill] sm:$0xff]  ;;  %v8544_v45 = vld [vmem:[#allocation5_spill] sm:$0xff]  ;;  %v8546_v7 = vld [vmem:[#allocation84_spill] sm:$0xff]  ;;  %3565 = vperm.xlu1 %5926, %v3556_v20  }
 0x2ba   : > { %v5464_v2 = vpack.c.bf16 %v8530_v32, %v3824_v1  ;;  %8538 = vst [vmem:[#allocation90_spill] sm:$0xff] %v7701_v4  ;;  %v5466_v1 = vpack.c.bf16 %v3854_v24, %v3842_v16  ;;  %v8540_v32 = vand.u32 4294901760, %v8539_v12  ;;  %4557 = vmatmul.mubr.f32.gmra.mrb[12].mxu0 %v3757_v43  ;;  %v8543_v24 = vand.u32 4294901760, %v8542_v36  ;;  %v8560_v20 = vld [vmem:[#allocation37_spill] sm:$0xff]  ;;  %v8583_v49 = vld [vmem:[#allocation58_spill] sm:$0xff] }
 0x2bb   : > { %5657 = vmatpush1.bf16.msra.mxu0 %v5656_v10  ;;  %v8545_v43 = vand.u32 4294901760, %v8544_v45  ;;  %v5468_v63 = vpack.c.bf16 %v3860_v42, %v3848_v34  ;;  %v3902_v10 = vand.u32 4294901760, %v3901_v30  ;;  %v3936_v42 = vand.u32 4294901760, %v7701_v4  ;;  %v8553_v34 = vld [vmem:[#allocation48_spill] sm:$0xff] }
 0x2bc   : > { %v5658_v40 = vpack.c.bf16 %v3852_v58, %v8540_v32  ;;  %5465 = vmatpush1.bf16.msra.mxu1 %v5464_v2  ;;  %v7716_v16 = vsub.f32 %v8542_v36, %v8543_v24  ;;  %v3889_v58 = vsub.f32 %v8526_v46, %v3888_v52  ;;  %v8547_v32 = vand.u32 4294901760, %v6946_v62  ;;  %v8559_v30 = vld [vmem:[#allocation44_spill] sm:$0xff]  ;;  %v8584_v46 = vld [vmem:[#allocation53_spill] sm:$0xff] }
 0x2bd   : > { %5467 = vmatprep.subr.bf16.mxu1 %v5466_v1  ;;  %v3895_v2 = vsub.f32 %v8544_v45, %v8545_v43  ;;  %v3907_v36 = vsub.f32 %v8528_v37, %v8290_v61  ;;  %v8549_v1 = vld [vmem:[#allocation12_spill] sm:$0xff]  ;;  %v8554_v28 = vand.u32 4294901760, %v8553_v34  ;;  %v8558_v18 = vand.u32 4294901760, %v8541_v48 }
 0x2be   : > { %5659 = vmatprep.subr.bf16.mxu0 %v5658_v40  ;;  %v5660_v39 = vpack.c.bf16 %v8548_v53, %v8547_v32  ;;  %4151 = vmatprep.mubr.f32.mxu1 %v8549_v1  ;;  %v8550_v40 = vld [vmem:[#allocation52_spill] sm:$0xff]  ;;  %v8556_v32 = vld [vmem:[#allocation66_spill] sm:$0xff]  ;;  %v3937_v38 = vsub.f32 %v7701_v4, %v3936_v42  ;;  %v8572_v14 = vand.u32 4294901760, %v8544_v45 }
 0x2bf   : > { %4820 = vmatprep.mubr.f32.mxu0 %v8549_v1  ;;  %v8551_v24 = vand.u32 4294901760, %v8550_v40  ;;  %v7741_v53 = vsub.f32 %v8553_v34, %v8554_v28  ;;  %v8557_v61 = vand.u32 4294901760, %v8556_v32  ;;  %v8561_v28 = vand.u32 4294901760, %v8546_v7 }
 0x2c0   : > { %5469 = vmatpush1.bf16.msra.mxu1 %v5468_v63  ;;  %5661 = vmatpush1.bf16.msra.mxu0 %v5660_v39  ;;  %v8562_v63 = vld [vmem:[#allocation39_spill] sm:$0xff]  ;;  %v3938_v25 = vand.u32 4294901760, %v3937_v38 }
 0x2c1   : > { %v7735_v43 = vsub.f32 %v8550_v40, %v8551_v24  ;;  %8555 = vst [vmem:[#allocation20_spill] sm:$0xff] %v7741_v53  ;;  %v7746_v35 = vsub.f32 %v8556_v32, %v8557_v61  ;;  %v7751_v40 = vsub.f32 %v8541_v48, %v8558_v18  ;;  %5471 = vmatprep.subr.bf16.mxu1 %v8559_v30  ;;  %v3890_v24 = vand.u32 4294901760, %v3889_v58  ;;  %v8580_v38 = vld [vmem:[#allocation55_spill] sm:$0xff] }
 0x2c2   : > { %5663 = vmatprep.subr.bf16.mxu0 %v8560_v20  ;;  %v3949_v34 = vsub.f32 %v8546_v7, %v8561_v28  ;;  %v3896_v61 = vand.u32 4294901760, %v3895_v2  ;;  %v3908_v32 = vand.u32 4294901760, %v3907_v36  ;;  %v3942_v39 = vand.u32 4294901760, %v8562_v63  ;;  %v8564_v20 = vld [vmem:[#allocation59_spill] sm:$0xff]  ;;  %v8566_v28 = vld [vmem:[#allocation40_spill] sm:$0xff] }
 0x2c3   : > { %8552 = vst [vmem:[#allocation74_spill] sm:$0xff] %v7735_v43  ;;  %v5474_v41 = vpack.c.bf16 %v3902_v10, %v3890_v24  ;;  %v5666_v18 = vpack.c.bf16 %v8563_v59, %v3888_v52  ;;  %v3972_v30 = vand.u32 4294901760, %v7735_v43  ;;  %v8565_v58 = vand.u32 4294901760, %v8564_v20  ;;  %v8568_v59 = vld [vmem:[#allocation73_spill] sm:$0xff] }
 0x2c4   : > { %5473 = vmatpush1.bf16.msra.mxu1 %v8566_v28  ;;  %5665 = vmatpush1.bf16.msra.mxu0 %v8567_v5  ;;  %v3956_v2 = vand.u32 4294901760, %v7751_v40  ;;  %v3960_v10 = vand.u32 4294901760, %v7741_v53  ;;  %v8569_v52 = vand.u32 4294901760, %v8568_v59  ;;  %v3950_v22 = vand.u32 4294901760, %v3949_v34 }
 0x2c5   : > { %v7767_v47 = vsub.f32 %v8564_v20, %v8565_v58  ;;  %5475 = vmatprep.subr.bf16.mxu1 %v5474_v41  ;;  %5667 = vmatprep.subr.bf16.mxu0 %v5666_v18  ;;  %v8570_v20 = vld [vmem:[#allocation17_spill] sm:$0xff]  ;;  %v8571_v28 = vand.u32 4294901760, %v7716_v16  ;;  %v5476_v40 = vpack.c.bf16 %v3908_v32, %v3896_v61  ;;  %v8573_v36 = vand.u32 4294901760, %v8528_v37  ;;  %v8575_v41 = vld [vmem:[#allocation76_spill] sm:$0xff]  ;;  %v8577_v61 = vld [vmem:[#allocation62_spill] sm:$0xff] }
 0x2c6   : > { %v7777_v24 = vsub.f32 %v8568_v59, %v8569_v52  ;;  %v3966_v58 = vand.u32 4294901760, %v8570_v20  ;;  %v3943_v50 = vsub.f32 %v8562_v63, %v3942_v39  ;;  %v8574_v59 = vld [vmem:[#allocation57_spill] sm:$0xff]  ;;  %v8576_v18 = vand.u32 4294901760, %v8575_v41 }
 0x2c7   : > { %v7783_v5 = vsub.f32 %v7716_v16, %v8571_v28  ;;  %v5668_v4 = vpack.c.bf16 %v8573_v36, %v8572_v14  ;;  %v3978_v52 = vand.u32 4294901760, %v8574_v59  ;;  %v3973_v29 = vsub.f32 %v7735_v43, %v3972_v30 }
 0x2c8   : > { %v7794_v34 = vsub.f32 %v8575_v41, %v8576_v18  ;;  %v3996_v28 = vand.u32 4294901760, %v7598_v57  ;;  %v8578_v32 = vand.u32 4294901760, %v8577_v61  ;;  %5477 = vmatpush1.bf16.msra.mxu1 %v5476_v40  ;;  %v3961_v14 = vsub.f32 %v7741_v53, %v3960_v10  ;;  %v8581_v18 = vld [vmem:[#allocation50_spill] sm:$0xff] }
 0x2c9   : > { %5669 = vmatpush1.bf16.msra.mxu0 %v5668_v4  ;;  %v8579_v63 = vand.u32 4294901760, %v7746_v35  ;;  %5479 = vmatprep.subr.bf16.mxu1 %v8580_v38  ;;  %v3967_v43 = vsub.f32 %v8570_v20, %v3966_v58  ;;  %v3979_v36 = vsub.f32 %v8574_v59, %v3978_v52  ;;  %v4002_v53 = vand.u32 4294901760, %v7578_v54 }
 0x2ca   : > { %v7801_v45 = vsub.f32 %v8577_v61, %v8578_v32  ;;  %5671 = vmatprep.subr.bf16.mxu0 %v8581_v18  ;;  %v3984_v61 = vand.u32 4294901760, %v7593_v55  ;;  %v3944_v32 = vand.u32 4294901760, %v3943_v50  ;;  %v5482_v37 = vpack.c.bf16 %v3950_v22, %v3938_v25 }
 0x2cb   : > { %v7808_v41 = vsub.f32 %v7746_v35, %v8579_v63  ;;  %v8582_v38 = vand.u32 4294901760, %v8546_v7  ;;  %v3974_v18 = vand.u32 4294901760, %v3973_v29  ;;  %v3997_v20 = vsub.f32 %v7598_v57, %v3996_v28  ;;  %v8588_v57 = vld [vmem:[#allocation78_spill] sm:$0xff] }
 0x2cc   : > { %5481 = vmatpush1.bf16.msra.mxu1 %v8583_v49  ;;  %v3962_v40 = vand.u32 4294901760, %v3961_v14  ;;  %v8585_v50 = vand.u32 4294901760, %v7767_v47  ;;  %v8586_v22 = vand.u32 4294901760, %v8541_v48  ;;  %v3968_v25 = vand.u32 4294901760, %v3967_v43 }
 0x2cd   : > { %v5674_v6 = vpack.c.bf16 %v8582_v38, %v3936_v42  ;;  %5673 = vmatpush1.bf16.msra.mxu0 %v8584_v46  ;;  %5483 = vmatprep.subr.bf16.mxu1 %v5482_v37  ;;  %v3985_v42 = vsub.f32 %v7593_v55, %v3984_v61  ;;  %v8587_v49 = vand.u32 4294901760, %v7603_v31  ;;  %v5484_v14 = vpack.c.bf16 %v3956_v2, %v3944_v32  ;;  %v8591_v32 = vld [vmem:[#allocation69_spill] sm:$0xff] }
 0x2ce   : > { %v4021_v4 = vsub.f32 %v7767_v47, %v8585_v50  ;;  %v5676_v29 = vpack.c.bf16 %v8586_v22, %v3942_v39  ;;  %v3980_v38 = vand.u32 4294901760, %v3979_v36  ;;  %v4003_v50 = vsub.f32 %v7578_v54, %v4002_v53 }
 0x2cf   : > { %5675 = vmatprep.subr.bf16.mxu0 %v5674_v6  ;;  %v3991_v46 = vsub.f32 %v7603_v31, %v8587_v49  ;;  %v4044_v59 = vand.u32 4294901760, %v7611_v8  ;;  %v8589_v63 = vand.u32 4294901760, %v8588_v57  ;;  %v5486_v37 = vpack.c.bf16 %v3974_v18, %v3962_v40 }
 0x2d0   : > { %v5678_v39 = vpack.c.bf16 %v3972_v30, %v3960_v10  ;;  %v3998_v43 = vand.u32 4294901760, %v3997_v20  ;;  %5485 = vmatpush1.bf16.msra.mxu1 %v5484_v14  ;;  %v5680_v22 = vpack.c.bf16 %v3978_v52, %v3966_v58  ;;  %v4022_v55 = vand.u32 4294901760, %v4021_v4  ;;  %v8593_v4 = vld [vmem:[#allocation83_spill] sm:$0xff] }
 0x2d1   : > { %v7840_v6 = vsub.f32 %v8588_v57, %v8589_v63  ;;  %5677 = vmatpush1.bf16.msra.mxu0 %v5676_v29  ;;  %v8590_v49 = vand.u32 4294901760, %v7801_v45  ;;  %v4032_v36 = vand.u32 4294901760, %v7637_v44  ;;  %v8592_v54 = vand.u32 4294901760, %v8591_v32  ;;  %5487 = vmatprep.subr.bf16.mxu1 %v5486_v37  ;;  %v8595_v37 = vld [vmem:[#allocation79_spill] sm:$0xff] }
 0x2d2   : > { %5679 = vmatprep.subr.bf16.mxu0 %v5678_v39  ;;  %v3986_v57 = vand.u32 4294901760, %v3985_v42  ;;  %v3992_v30 = vand.u32 4294901760, %v3991_v46  ;;  %v4050_v10 = vand.u32 4294901760, %v7625_v51  ;;  %v5488_v20 = vpack.c.bf16 %v3980_v38, %v3968_v25 }
 0x2d3   : > { %v4027_v2 = vsub.f32 %v7801_v45, %v8590_v49  ;;  %v7849_v48 = vsub.f32 %v8591_v32, %v8592_v54  ;;  %v4004_v58 = vand.u32 4294901760, %v4003_v50  ;;  %v4045_v52 = vsub.f32 %v7611_v8, %v4044_v59  ;;  %v8598_v32 = vld [vmem:[#allocation85_spill] sm:$0xff] }
 0x2d4   : > { %v4038_v40 = vand.u32 4294901760, %v7649_v0  ;;  %v8594_v63 = vand.u32 4294901760, %v8593_v4  ;;  %v5490_v29 = vpack.c.bf16 %v3998_v43, %v3986_v57  ;;  %v5682_v54 = vpack.c.bf16 %v3996_v28, %v3984_v61  ;;  %5489 = vmatpush1.bf16.msra.mxu1 %v5488_v20 }
 0x2d5   : > { %v4056_v14 = vand.u32 4294901760, %v7840_v6  ;;  %v8596_v42 = vand.u32 4294901760, %v8595_v37  ;;  %5681 = vmatpush1.bf16.msra.mxu0 %v5680_v22  ;;  %v4033_v25 = vsub.f32 %v7637_v44, %v4032_v36  ;;  %v8597_v38 = vand.u32 4294901760, %v7777_v24 }
 0x2d6   : > { %v7857_v18 = vsub.f32 %v8593_v4, %v8594_v63  ;;  %5491 = vmatprep.subr.bf16.mxu1 %v5490_v29  ;;  %5683 = vmatprep.subr.bf16.mxu0 %v5682_v54  ;;  %v5492_v28 = vpack.c.bf16 %v4004_v58, %v3992_v30  ;;  %v4028_v61 = vand.u32 4294901760, %v4027_v2  ;;  %v4051_v43 = vsub.f32 %v7625_v51, %v4050_v10 }
 0x2d7   : > { %v7863_v46 = vsub.f32 %v8595_v37, %v8596_v42  ;;  %v4069_v50 = vsub.f32 %v7777_v24, %v8597_v38  ;;  %v4062_v49 = vand.u32 4294901760, %v7849_v48  ;;  %v8599_v57 = vand.u32 4294901760, %v8598_v32 }
 0x2d8   : > { %v8600_v20 = vand.u32 4294901760, %v7603_v31  ;;  %v4046_v63 = vand.u32 4294901760, %v4045_v52  ;;  %v4039_v37 = vsub.f32 %v7649_v0, %v4038_v40  ;;  %v8601_v29 = vand.u32 4294901760, %v7783_v5  ;;  %5493 = vmatpush1.bf16.msra.mxu1 %v5492_v28 }
 0x2d9   : > { %v7875_v22 = vsub.f32 %v8598_v32, %v8599_v57  ;;  %v8602_v2 = vand.u32 4294901760, %v7716_v16  ;;  %v8603_v30 = vand.u32 4294901760, %v7767_v47  ;;  %v4057_v42 = vsub.f32 %v7840_v6, %v4056_v14  ;;  %v8604_v32 = vld [vmem:[#allocation81_spill] sm:$0xff] }
 0x2da   : > { %v5684_v4 = vpack.c.bf16 %v4002_v53, %v8600_v20  ;;  %v5494_v54 = vpack.c.bf16 %v4022_v55, %v8601_v29  ;;  %v4092_v38 = vand.u32 4294901760, %v7857_v18  ;;  %v8605_v57 = vand.u32 4294901760, %v8604_v32 }
 0x2db   : > { %v5686_v58 = vpack.c.bf16 %v8603_v30, %v8602_v2  ;;  %v4034_v53 = vand.u32 4294901760, %v4033_v25  ;;  %v8606_v5 = vand.u32 4294901760, %v7794_v34  ;;  %v4080_v52 = vand.u32 4294901760, %v7863_v46 }
 0x2dc   : > { %v7891_v39 = vsub.f32 %v8604_v32, %v8605_v57  ;;  %5685 = vmatpush1.bf16.msra.mxu0 %v5684_v4  ;;  %5495 = vmatprep.subr.bf16.mxu1 %v5494_v54  ;;  %v8607_v20 = vand.u32 4294901760, %v7808_v41  ;;  %v8608_v2 = vand.u32 4294901760, %v7746_v35  ;;  %v8609_v30 = vand.u32 4294901760, %v7801_v45 }
 0x2dd   : > { %v4075_v55 = vsub.f32 %v7794_v34, %v8606_v5  ;;  %5687 = vmatprep.subr.bf16.mxu0 %v5686_v58  ;;  %v4052_v57 = vand.u32 4294901760, %v4051_v43  ;;  %v4063_v28 = vsub.f32 %v7849_v48, %v4062_v49  ;;  %v5498_v25 = vpack.c.bf16 %v4046_v63, %v4034_v53 }
 0x2de   : > { %v5496_v29 = vpack.c.bf16 %v4028_v61, %v8607_v20  ;;  %v5688_v32 = vpack.c.bf16 %v8609_v30, %v8608_v2  ;;  %v5690_v4 = vpack.c.bf16 %v4044_v59, %v4032_v36  ;;  %v4040_v0 = vand.u32 4294901760, %v4039_v37  ;;  %v8611_v20 = vld [vmem:[#allocation91_spill] sm:$0xff] }
 0x2df   : > { %v4098_v5 = vand.u32 4294901760, %v7875_v22  ;;  %v8610_v51 = vand.u32 4294901760, %v7525_v27  ;;  %v4058_v41 = vand.u32 4294901760, %v4057_v42  ;;  %v4093_v61 = vsub.f32 %v7857_v18, %v4092_v38 }
 0x2e0   : > { %v4116_v58 = vand.u32 4294901760, %v7642_v9  ;;  %v8612_v2 = vand.u32 4294901760, %v8611_v20  ;;  %5497 = vmatpush1.bf16.msra.mxu1 %v5496_v29  ;;  %5689 = vmatpush1.bf16.msra.mxu0 %v5688_v32  ;;  %v4070_v59 = vand.u32 4294901760, %v4069_v50  ;;  %v4081_v36 = vsub.f32 %v7863_v46, %v4080_v52 }
 0x2e1   : > { %v7908_v54 = vsub.f32 %v7525_v27, %v8610_v51  ;;  %v4086_v63 = vand.u32 4294901760, %v7891_v39  ;;  %5499 = vmatprep.subr.bf16.mxu1 %v5498_v25  ;;  %5691 = vmatprep.subr.bf16.mxu0 %v5690_v4  ;;  %v5500_v27 = vpack.c.bf16 %v4052_v57, %v4040_v0  ;;  %v5692_v51 = vpack.c.bf16 %v4050_v10, %v4038_v40 }
 0x2e2   : > { %v7915_v43 = vsub.f32 %v8611_v20, %v8612_v2  ;;  %v4064_v37 = vand.u32 4294901760, %v4063_v28  ;;  %v4104_v42 = vand.u32 4294901760, %v7654_v13  ;;  %v8613_v53 = vand.u32 4294901760, %v7456_v3 }
 0x2e3   : > { %v8614_v29 = vand.u32 4294901760, %v7777_v24  ;;  %v4099_v50 = vsub.f32 %v7875_v22, %v4098_v5  ;;  %v4110_v20 = vand.u32 4294901760, %v7659_v19  ;;  %v5502_v2 = vpack.c.bf16 %v4070_v59, %v4058_v41 }
 0x2e4   : > { %v7923_v30 = vsub.f32 %v7456_v3, %v8613_v53  ;;  %v4094_v25 = vand.u32 4294901760, %v4093_v61  ;;  %v4117_v0 = vsub.f32 %v7642_v9, %v4116_v58  ;;  %v4128_v10 = vand.u32 4294901760, %v7908_v54  ;;  %5501 = vmatpush1.bf16.msra.mxu1 %v5500_v27  ;;  %5693 = vmatpush1.bf16.msra.mxu0 %v5692_v51 }
 0x2e5   : > { %v5694_v32 = vpack.c.bf16 %v8614_v29, %v4056_v14  ;;  %v8615_v40 = vand.u32 4294901760, %v7483_v33  ;;  %v4076_v3 = vand.u32 4294901760, %v4075_v55  ;;  %v4087_v14 = vsub.f32 %v7891_v39, %v4086_v63  ;;  %5503 = vmatprep.subr.bf16.mxu1 %v5502_v2 }
 0x2e6   : > { %v4122_v28 = vand.u32 4294901760, %v7672_v56  ;;  %v8616_v4 = vand.u32 4294901760, %v7794_v34  ;;  %v4082_v61 = vand.u32 4294901760, %v4081_v36  ;;  %v4105_v59 = vsub.f32 %v7654_v13, %v4104_v42 }
 0x2e7   : > { %v7934_v57 = vsub.f32 %v7483_v33, %v8615_v40  ;;  %5695 = vmatprep.subr.bf16.mxu0 %v5694_v32  ;;  %v4140_v53 = vand.u32 4294901760, %v7915_v43  ;;  %v5504_v29 = vpack.c.bf16 %v4076_v3, %v4064_v37  ;;  %v4100_v33 = vand.u32 4294901760, %v4099_v50 }
 0x2e8   : > { %v5696_v41 = vpack.c.bf16 %v8616_v4, %v4062_v49  ;;  %v4111_v27 = vsub.f32 %v7659_v19, %v4110_v20  ;;  %v4134_v55 = vand.u32 4294901760, %v7923_v30  ;;  %v5506_v51 = vpack.c.bf16 %v4094_v25, %v4082_v61 }
 0x2e9   : > { %v5698_v40 = vpack.c.bf16 %v4092_v38, %v4080_v52  ;;  %v4118_v9 = vand.u32 4294901760, %v4117_v0  ;;  %v4129_v2 = vsub.f32 %v7908_v54, %v4128_v10  ;;  %5505 = vmatpush1.bf16.msra.mxu1 %v5504_v29  ;;  %v4088_v32 = vand.u32 4294901760, %v4087_v14 }
 0x2ea   : > { %5697 = vmatpush1.bf16.msra.mxu0 %v5696_v41  ;;  %v4123_v49 = vsub.f32 %v7672_v56, %v4122_v28  ;;  %v4146_v36 = vand.u32 4294901760, %v7934_v57  ;;  %5507 = vmatprep.subr.bf16.mxu1 %v5506_v51  ;;  %v4106_v37 = vand.u32 4294901760, %v4105_v59  ;;  %v4141_v50 = vsub.f32 %v7915_v43, %v4140_v53 }
 0x2eb   : > { %5699 = vmatprep.subr.bf16.mxu0 %v5698_v40  ;;  %v5508_v3 = vpack.c.bf16 %v4100_v33, %v4088_v32  ;;  %v5700_v4 = vpack.c.bf16 %v4098_v5, %v4086_v63  ;;  %v4112_v19 = vand.u32 4294901760, %v4111_v27  ;;  %v4135_v38 = vsub.f32 %v7923_v30, %v4134_v55  ;;  %v8617_v63 = vld [vmem:[#allocation63_spill] sm:$0xff]  ;;  %v8622_v32 = vld [vmem:[#allocation68_spill] sm:$0xff] }
 0x2ec   : > { %v5510_v52 = vpack.c.bf16 %v4118_v9, %v4106_v37  ;;  %v5702_v25 = vpack.c.bf16 %v4116_v58, %v4104_v42  ;;  %v4130_v0 = vand.u32 4294901760, %v4129_v2  ;;  %v4124_v14 = vand.u32 4294901760, %v4123_v49  ;;  %v8618_v42 = vld [vmem:[#allocation9_spill] sm:$0xff]  ;;  %v8619_v2 = vld [vmem:[#allocation8_spill] sm:$0xff]  ;;  %v8627_v37 = vld [vmem:[#allocation19_spill] sm:$0xff] }
 0x2ed   : > { %5509 = vmatpush1.bf16.msra.mxu1 %v5508_v3  ;;  %v4147_v41 = vsub.f32 %v7934_v57, %v4146_v36  ;;  %v4142_v61 = vand.u32 4294901760, %v4141_v50  ;;  %v5704_v59 = vpack.c.bf16 %v4122_v28, %v4110_v20  ;;  %v4136_v51 = vand.u32 4294901760, %v4135_v38  ;;  %v8621_v20 = vld [vmem:[#allocation11_spill] sm:$0xff]  ;;  %v8628_v50 = vld [vmem:[#allocation24_spill] sm:$0xff]  ;;  %v8630_v38 = vld [vmem:[#allocation26_spill] sm:$0xff] }
 0x2ee   : > { %5701 = vmatpush1.bf16.msra.mxu0 %v5700_v4  ;;  %5511 = vmatprep.subr.bf16.mxu1 %v5510_v52  ;;  %v5512_v29 = vpack.c.bf16 %v4124_v14, %v4112_v19  ;;  %v5706_v33 = vpack.c.bf16 %v4140_v53, %v4128_v10  ;;  %v5708_v58 = vpack.c.bf16 %v4146_v36, %v4134_v55  ;;  %v8620_v19 = vld [vmem:[#allocation60_spill] sm:$0xff]  ;;  %v8623_v10 = vld [vmem:[#allocation18_spill] sm:$0xff]  ;;  %v8626_v36 = vld [vmem:[#allocation21_spill] sm:$0xff] }
 0x2ef   : > { %5703 = vmatprep.subr.bf16.mxu0 %v5702_v25  ;;  %v5514_v40 = vpack.c.bf16 %v4142_v61, %v4130_v0  ;;  %v4148_v5 = vand.u32 4294901760, %v4147_v41  ;;  %v5518_v27 = vpack.c.bf16 %v8618_v42, %v8617_v63  ;;  %v5520_v28 = vpack.c.bf16 %v8621_v20, %v8620_v19  ;;  %v8624_v53 = vld [vmem:[#allocation22_spill] sm:$0xff]  ;;  %v8629_v4 = vld [vmem:[#allocation87_spill] sm:$0xff]  ;;  %v8631_v25 = vld [vmem:[#allocation89_spill] sm:$0xff] }
 0x2f0   : > { %v5522_v49 = vpack.c.bf16 %v8624_v53, %v8623_v10  ;;  %v8625_v55 = vld [vmem:[#allocation10_spill] sm:$0xff]  ;;  %v5524_v3 = vpack.c.bf16 %v8628_v50, %v8627_v37  ;;  %v5526_v52 = vpack.c.bf16 %v7245_v21, %v8630_v38  ;;  %v8632_v0 = vld [vmem:[#allocation23_spill] sm:$0xff]  ;;  %v8633_v14 = vld [vmem:[#allocation25_spill] sm:$0xff]  ;;  %v5528_v41 = vpack.c.bf16 %v8533_v17, %v8531_v60 }
 0x2f1   : > { %5513 = vmatpush1.bf16.msra.mxu1 %v5512_v29  ;;  %v5516_v9 = vpack.c.bf16 %v4148_v5, %v4136_v51  ;;  %v8634_v61 = vld [vmem:[#allocation93_spill] sm:$0xff]  ;;  %v5530_v21 = vpack.c.bf16 %v7038_v11, %v8539_v12  ;;  %v8635_v29 = vld [vmem:[#allocation95_spill] sm:$0xff]  ;;  %v8637_v51 = vld [vmem:[#allocation28_spill] sm:$0xff]  ;;  %v5532_v17 = vpack.c.bf16 %v7044_v26, %v6946_v62  ;;  %v8640_v11 = vpack.c.bf16 %v7072_v15, %v7058_v23 }
 0x2f2   : > { %5705 = vmatpush1.bf16.msra.mxu0 %v5704_v59  ;;  %5515 = vmatprep.subr.bf16.mxu1 %v5514_v40  ;;  %v8636_v59 = vld [vmem:[#allocation27_spill] sm:$0xff]  ;;  %v8638_v60 = vld [vmem:[#allocation13_spill] sm:$0xff]  ;;  %v8641_v12 = vld [vmem:[#allocation32_spill] sm:$0xff] }
 0x2f3   : > { %5707 = vmatprep.subr.bf16.mxu0 %v5706_v33  ;;  %v8639_v40 = vld [vmem:[#allocation29_spill] sm:$0xff]  ;;  %v8642_v33 = vld [vmem:[#allocation7_spill] sm:$0xff]  ;;  %v8648_v26 = vld [vmem:[#allocation34_spill] sm:$0xff] }
 0x2f4   : > { %v8643_v5 = vld [vmem:[#allocation15_spill] sm:$0xff]  ;;  %v8647_v62 = vld [vmem:[#allocation33_spill] sm:$0xff]  ;;  %v8653_v19 = vld [vmem:[#allocation36_spill] sm:$0xff] }
 0x2f5   : > { %5517 = vmatpush1.bf16.msra.mxu1 %v5516_v9  ;;  %v5538_v9 = vpack.c.bf16 %v8643_v5, %v8642_v33  ;;  %v8645_v63 = vld [vmem:[#allocation31_spill] sm:$0xff]  ;;  %v8656_v10 = vld [vmem:[#allocation90_spill] sm:$0xff]  ;;  %v8660_v37 = vld [vmem:[#allocation45_spill] sm:$0xff]  ;;  %v5558_v5 = vpack.c.bf16 %v7767_v47, %v7716_v16 }
 0x2f6   : > { %5709 = vmatpush1.bf16.msra.mxu0 %v5708_v58  ;;  %5519 = vmatprep.subr.bf16.mxu1 %v5518_v27  ;;  %v8644_v58 = vld [vmem:[#allocation30_spill] sm:$0xff]  ;;  %v8650_v27 = vld [vmem:[#allocation16_spill] sm:$0xff]  ;;  %v8651_v15 = vld [vmem:[#allocation35_spill] sm:$0xff]  ;;  %v5546_v53 = vpack.c.bf16 %v8546_v7, %v8656_v10 }
 0x2f7   : > { %5711 = vmatprep.subr.bf16.mxu0 %v8619_v2  ;;  %v8646_v42 = vpack.c.bf16 %v8644_v58, %v8645_v63  ;;  %v8652_v23 = vld [vmem:[#allocation43_spill] sm:$0xff]  ;;  %v8661_v50 = vld [vmem:[#allocation49_spill] sm:$0xff]  ;;  %v8663_v38 = vld [vmem:[#allocation6_spill] sm:$0xff] }
 0x2f8   : > { %4153 = vmatmul.mubr.f32.vlgmr.msra.gmra.mrb[8].mxu1 %v8622_v32  ;;  %v8654_v20 = vpack.c.bf16 %v8652_v23, %v8653_v19  ;;  %v8667_v7 = vld [vmem:[#allocation54_spill] sm:$0xff]  ;;  %v8674_v33 = vld [vmem:[#allocation65_spill] sm:$0xff]  ;;  %v8677_v63 = vld [vmem:[#allocation67_spill] sm:$0xff] }
 0x2f9   : > { %4822 = vmatmul.mubr.f32.vlgmr.msra.gmra.mrb[8].mxu0 %v8622_v32  ;;  %5521 = vmatpush1.bf16.msra.mxu1 %v5520_v28  ;;  %v8655_v28 = vld [vmem:[#allocation42_spill] sm:$0xff]  ;;  %v8681_v47 = vld [vmem:[#allocation75_spill] sm:$0xff]  ;;  %v8682_v16 = vld [vmem:[#allocation105_spill] sm:$0xff] }
 0x2fa   : > { %5713 = vmatpush1.bf16.msra.mxu0 %v8625_v55  ;;  %5523 = vmatprep.subr.bf16.mxu1 %v5522_v49  ;;  %v8657_v49 = vld [vmem:[#allocation46_spill] sm:$0xff]  ;;  %v8689_v23 = vld [vmem:[#allocation88_spill] sm:$0xff] }
 0x2fb   : > { %5715 = vmatprep.subr.bf16.mxu0 %v8626_v36  ;;  %4159 = vmatprep.mubr.f32.mxu1 %v8629_v4  ;;  %v8658_v55 = vld [vmem:[#allocation38_spill] sm:$0xff]  ;;  %v8698_v10 = vld [vmem:[#allocation72_spill] sm:$0xff] }
 0x2fc   : > { %4828 = vmatprep.mubr.f32.mxu0 %v8629_v4  ;;  %4161 = vmatmul.mubr.f32.gmra.mrb[10].mxu1 %v8631_v25  ;;  %v8659_v36 = vpack.c.bf16 %v8657_v49, %v8658_v55  ;;  %v8690_v19 = vld [vmem:[#allocation106_spill] sm:$0xff] }
 0x2fd   : > { %4830 = vmatmul.mubr.f32.gmra.mrb[10].mxu0 %v8631_v25  ;;  %5525 = vmatpush1.bf16.msra.mxu1 %v5524_v3  ;;  %v8662_v3 = vld [vmem:[#allocation39_spill] sm:$0xff] }
 0x2fe   : > { %5717 = vmatpush1.bf16.msra.mxu0 %v8632_v0  ;;  %5527 = vmatprep.subr.bf16.mxu1 %v5526_v52  ;;  %v5548_v52 = vpack.c.bf16 %v8663_v38, %v8662_v3  ;;  %v8664_v0 = vld [vmem:[#allocation20_spill] sm:$0xff] }
 0x2ff   : > { %5719 = vmatprep.subr.bf16.mxu0 %v8633_v14  ;;  %4167 = vmatprep.mubr.f32.mxu1 %v8634_v61  ;;  %v8665_v14 = vld [vmem:[#allocation74_spill] sm:$0xff] }
 0x300   : > { %4836 = vmatprep.mubr.f32.mxu0 %v8634_v61  ;;  %4169 = vmatmul.mubr.f32.gmra.mrb[12].mxu1 %v8635_v29 }
 0x301   : > { %4838 = vmatmul.mubr.f32.gmra.mrb[12].mxu0 %v8635_v29  ;;  %5529 = vmatpush1.bf16.msra.mxu1 %v5528_v41  ;;  %v5550_v41 = vpack.c.bf16 %v8665_v14, %v8664_v0 }
 0x302   : > { %5721 = vmatpush1.bf16.msra.mxu0 %v8636_v59  ;;  %5531 = vmatprep.subr.bf16.mxu1 %v5530_v21  ;;  %v8666_v21 = vld [vmem:[#allocation51_spill] sm:$0xff]  ;;  %v8668_v59 = vld [vmem:[#allocation17_spill] sm:$0xff] }
 0x303   : > { %5723 = vmatprep.subr.bf16.mxu0 %v8637_v51  ;;  %4369 = vmatprep.mubr.f32.mxu1 %v8638_v60  ;;  %v8669_v51 = vld [vmem:[#allocation57_spill] sm:$0xff]  ;;  %v8670_v60 = vld [vmem:[#allocation56_spill] sm:$0xff] }
 0x304   : > { %4973 = vmatprep.mubr.f32.mxu0 %v8549_v1  ;;  %v8649_v1 = vld [vmem:[#allocation5_spill] sm:$0xff] }
 0x305   : > { %5533 = vmatpush1.bf16.msra.mxu1 %v5532_v17  ;;  %v5540_v2 = vpack.c.bf16 %v8650_v27, %v8649_v1  ;;  %v5552_v17 = vpack.c.bf16 %v8669_v51, %v8668_v59  ;;  %v8680_v1 = vpack.c.bf16 %v7611_v8, %v7637_v44  ;;  %v8683_v27 = vld [vmem:[#allocation107_spill] sm:$0xff]  ;;  %v5570_v8 = vpack.c.bf16 %v7857_v18, %v7863_v46  ;;  %v8687_v44 = vld [vmem:[#allocation82_spill] sm:$0xff]  ;;  %v8693_v18 = vld [vmem:[#allocation108_spill] sm:$0xff] }
 0x306   : > { %5725 = vmatpush1.bf16.msra.mxu0 %v8639_v40  ;;  %5535 = vmatprep.subr.bf16.mxu1 %v8640_v11  ;;  %v8671_v40 = vld [vmem:[#allocation104_spill] sm:$0xff]  ;;  %v8672_v11 = vld [vmem:[#allocation103_spill] sm:$0xff]  ;;  %v8694_v46 = vpack.c.bf16 %v7672_v56, %v8693_v18  ;;  %v8700_v56 = vld [vmem:[#allocation94_spill] sm:$0xff] }
 0x307   : > { %5727 = vmatprep.subr.bf16.mxu0 %v8641_v12  ;;  %v8673_v12 = vpack.c.bf16 %v8671_v40, %v8672_v11 }
 0x309   : > { %5537 = vmatpush1.bf16.msra.mxu1 %v8646_v42  ;;  %v8678_v42 = vld [vmem:[#allocation70_spill] sm:$0xff] }
 0x30a   : > { %5729 = vmatpush1.bf16.msra.mxu0 %v8647_v62  ;;  %5539 = vmatprep.subr.bf16.mxu1 %v5538_v9  ;;  %v8675_v9 = vld [vmem:[#allocation102_spill] sm:$0xff]  ;;  %v5560_v62 = vpack.c.bf16 %v7801_v45, %v7746_v35  ;;  %v8686_v35 = vld [vmem:[#allocation80_spill] sm:$0xff]  ;;  %v5568_v45 = vpack.c.bf16 %v7794_v34, %v7849_v48  ;;  %v5578_v34 = vpack.c.bf16 %v7915_v43, %v7908_v54 }
 0x30b   : > { %5731 = vmatprep.subr.bf16.mxu0 %v8648_v26  ;;  %v8676_v58 = vpack.c.bf16 %v8675_v9, %v7603_v31  ;;  %v8679_v26 = vld [vmem:[#allocation71_spill] sm:$0xff]  ;;  %v5566_v31 = vpack.c.bf16 %v7777_v24, %v7840_v6  ;;  %v8688_v24 = vld [vmem:[#allocation86_spill] sm:$0xff]  ;;  %v5572_v6 = vpack.c.bf16 %v7875_v22, %v7891_v39  ;;  %v8692_v48 = vld [vmem:[#allocation96_spill] sm:$0xff]  ;;  %v5580_v22 = vpack.c.bf16 %v7934_v57, %v7923_v30 }
 0x30c   : > { %v8696_v39 = vld [vmem:[#allocation100_spill] sm:$0xff]  ;;  %v8701_v43 = vld [vmem:[#allocation98_spill] sm:$0xff]  ;;  %v8702_v30 = vld [vmem:[#allocation99_spill] sm:$0xff]  ;;  %v8703_v57 = vmov 0.0  }
 0x30d   : > { %5541 = vmatpush1.bf16.msra.mxu1 %v5540_v2  ;;  %v8684_v2 = vpack.c.bf16 %v8682_v16, %v8683_v27  ;;  %v8699_v54 = vld [vmem:[#allocation92_spill] sm:$0xff]  ;;  %3549 = vst.msk [vmem:[#allocation4 + $0x8] sm:$0xff] %vm3548_vm11, %v8703_v57  ;;  %3551 = vst.msk [vmem:[#allocation4 + $0x18] sm:$0xff] %vm3548_vm11, %v8703_v57 }
 0x30e   : > { %5733 = vmatpush1.bf16.msra.mxu0 %v8651_v15  ;;  %5543 = vmatprep.subr.bf16.mxu1 %v8654_v20  ;;  %v8685_v15 = vld [vmem:[#allocation77_spill] sm:$0xff]  ;;  %v8691_v20 = vpack.c.bf16 %v8690_v19, %v7654_v13  ;;  %3554 = vst.msk [vmem:[#allocation4 + $0x28] sm:$0xf] %vm3553_vm12, %v8703_v57 }
 0x30f   : > { %5735 = vmatprep.subr.bf16.mxu0 %v8655_v28  ;;  %v8695_v28 = vld [vmem:[#allocation97_spill] sm:$0xff] }
 0x310   : > { %v8697_v13 = vld [vmem:[#allocation101_spill] sm:$0xff] }
 0x311   : > { %5545 = vmatpush1.bf16.msra.mxu1 %v8659_v36 }
 0x312   : > { %5737 = vmatpush1.bf16.msra.mxu0 %v8660_v37  ;;  %5547 = vmatprep.subr.bf16.mxu1 %v5546_v53 }
 0x313   : > { %5739 = vmatprep.subr.bf16.mxu0 %v8661_v50 }
 0x315   : > { %5549 = vmatpush1.bf16.msra.mxu1 %v5548_v52 }
 0x316   : > { %5741 = vmatpush1.bf16.msra.mxu0 %v8666_v21  ;;  %5551 = vmatprep.subr.bf16.mxu1 %v5550_v41 }
 0x317   : > { %5743 = vmatprep.subr.bf16.mxu0 %v8667_v7 }
 0x319   : > { %5553 = vmatpush1.bf16.msra.mxu1 %v5552_v17 }
 0x31a   : > { %5745 = vmatpush1.bf16.msra.mxu0 %v8670_v60  ;;  %5555 = vmatprep.subr.bf16.mxu1 %v8673_v12 }
 0x31b   : > { %5747 = vmatprep.subr.bf16.mxu0 %v8674_v33 }
 0x31d   : > { %5557 = vmatpush1.bf16.msra.mxu1 %v8676_v58 }
 0x31e   : > { %5749 = vmatpush1.bf16.msra.mxu0 %v8677_v63  ;;  %5559 = vmatprep.subr.bf16.mxu1 %v5558_v5 }
 0x31f   : > { %5751 = vmatprep.subr.bf16.mxu0 %v8678_v42 }
 0x321   : > { %5561 = vmatpush1.bf16.msra.mxu1 %v5560_v62 }
 0x322   : > { %5753 = vmatpush1.bf16.msra.mxu0 %v8679_v26  ;;  %5563 = vmatprep.subr.bf16.mxu1 %v8680_v1 }
 0x323   : > { %5755 = vmatprep.subr.bf16.mxu0 %v8681_v47 }
 0x325   : > { %5565 = vmatpush1.bf16.msra.mxu1 %v8684_v2 }
 0x326   : > { %5757 = vmatpush1.bf16.msra.mxu0 %v8685_v15  ;;  %5567 = vmatprep.subr.bf16.mxu1 %v5566_v31 }
 0x327   : > { %5759 = vmatprep.subr.bf16.mxu0 %v8686_v35 }
 0x329   : > { %5569 = vmatpush1.bf16.msra.mxu1 %v5568_v45 }
 0x32a   : > { %5761 = vmatpush1.bf16.msra.mxu0 %v8687_v44  ;;  %5571 = vmatprep.subr.bf16.mxu1 %v5570_v8 }
 0x32b   : > { %5763 = vmatprep.subr.bf16.mxu0 %v8688_v24 }
 0x32d   : > { %5573 = vmatpush1.bf16.msra.mxu1 %v5572_v6 }
 0x32e   : > { %5765 = vmatpush1.bf16.msra.mxu0 %v8689_v23  ;;  %5575 = vmatprep.subr.bf16.mxu1 %v8691_v20 }
 0x32f   : > { %5767 = vmatprep.subr.bf16.mxu0 %v8692_v48 }
 0x331   : > { %5577 = vmatpush1.bf16.msra.mxu1 %v8694_v46 }
 0x332   : > { %5769 = vmatpush1.bf16.msra.mxu0 %v8695_v28  ;;  %5579 = vmatprep.subr.bf16.mxu1 %v5578_v34 }
 0x333   : > { %5771 = vmatprep.subr.bf16.mxu0 %v8696_v39 }
 0x335   : > { %5581 = vmatpush1.bf16.msra.mxu1 %v5580_v22 }
 0x336   : > { %5773 = vmatpush1.bf16.msra.mxu0 %v8697_v13 }
 0x338   : > { %4372 = vmatmul.mubr.f32.vlgmr.msra.gmra.mrb[8].mxu1 %v8698_v10 }
 0x339   : > { %4975 = vmatmul.mubr.f32.vlgmr.msra.gmra.mrb[8].mxu0 %v8622_v32  ;;  %4379 = vmatprep.mubr.f32.mxu1 %v8699_v54  ;;  %v3561_v32 = vpop.permute.xlu0 %3560 }
 0x33a   : > { %4981 = vmatprep.mubr.f32.mxu0 %v8629_v4 }
 0x33c   : > { %4382 = vmatmul.mubr.f32.gmra.mrb[10].mxu1 %v8700_v56 }
 0x33d   : > { %4983 = vmatmul.mubr.f32.gmra.mrb[10].mxu0 %v8631_v25  ;;  %4389 = vmatprep.mubr.f32.mxu1 %v8701_v43  ;;  %v3571_v7 = vpop.permute.xlu0 %3570 }
 0x33e   : > { %4989 = vmatprep.mubr.f32.mxu0 %v8634_v61  ;;  %v3566_v61 = vpop.permute.xlu1 %3565 }
 0x340   : > { %4392 = vmatmul.mubr.f32.gmra.mrb[12].mxu1 %v8702_v30 }
 0x341   : > { %4991 = vmatmul.mubr.f32.gmra.mrb[12].mxu0 %v8635_v29 }
 0x40b   : > { %v4373_v4 = vpop.f32.mrb[8].mxu1 }
 0x40c   : > { %v4976_v53 = vpop.f32.mrb[8].mxu0  ;;  %v5774_v25 = vadd.f32 %v4373_v4, %v3561_v32  ;;  %v4375_v49 = vpop.f32.mrb[9].mxu1 }
 0x40d   : > { %v4978_v55 = vpop.f32.mrb[9].mxu0  ;;  %v5776_v36 = vadd.f32 %v4375_v49, %v3561_v32 }
 0x40e   : > { %v5775_v37 = vadd.f32 %v5774_v25, %v4976_v53 }
 0x40f   : > { %v5777_v50 = vadd.f32 %v5776_v36, %v4978_v55  ;;  %v4383_v3 = vpop.f32.mrb[10].mxu1 }
 0x410   : > { %v4984_v29 = vpop.f32.mrb[10].mxu0  ;;  %v4997_v38 = vmax.f32 %v5775_v37, 0.0  ;;  %v5778_v52 = vadd.f32 %v4383_v3, %v3566_v61  ;;  %v4385_v0 = vpop.f32.mrb[11].mxu1 }
 0x411   : > { %v4986_v14 = vpop.f32.mrb[11].mxu0  ;;  %v4998_v41 = vmax.f32 %v5777_v50, 0.0  ;;  %v5780_v21 = vadd.f32 %v4385_v0, %v3566_v61 }
 0x412   : > { %v5779_v59 = vadd.f32 %v5778_v52, %v4984_v29  ;;  %5021 = vrot.lane.b32.xlu1 %v4997_v38, %s5947_s15 }
 0x413   : > { %5004 = vst.msk [vmem:[#allocation4 + $0x8] sm:$0xff] %vm8704_vm14, %v4998_v41  ;;  %v5781_v51 = vadd.f32 %v5780_v21, %v4986_v14  ;;  %v4393_v17 = vpop.f32.mrb[12].mxu1 }
 0x414   : > { %v4992_v60 = vpop.f32.mrb[12].mxu0  ;;  %v8083_v40 = vmax.f32 %v5779_v59, 0.0  ;;  %v5782_v11 = vadd.f32 %v4393_v17, %v3571_v7  ;;  %v4395_v12 = vpop.f32.mrb[13].mxu1 }
 0x415   : > { %v4994_v33 = vpop.f32.mrb[13].mxu0  ;;  %v5000_v5 = vmax.f32 %v5781_v51, 0.0  ;;  %v5784_v9 = vadd.f32 %v4395_v12, %v3571_v7 }
 0x416   : > { %v5783_v58 = vadd.f32 %v5782_v11, %v4992_v60  ;;  %5048 = vrot.lane.b32.xlu1 %v4997_v38, %s5946_s14 }
 0x417   : > { %5006 = vst.msk [vmem:[#allocation4 + $0x18] sm:$0xff] %vm8705_vm1, %v5000_v5  ;;  %v5785_v63 = vadd.f32 %v5784_v9, %v4994_v33 }
 0x418   : > { %v5001_v42 = vmax.f32 %v5783_v58, 0.0 }
 0x419   : > { %v5002_v62 = vmax.f32 %v5785_v63, 0.0 }
 0x41a   : > { %5007 = vst [vmem:[#allocation4 + $0x20] sm:$0xf] %v5001_v42  ;;  %v5010_v26 = vld [vmem:[#allocation4 + $0x8] sm:$0xff]  ;;  %5075 = vrot.lane.b32.xlu1 %v4997_v38, %s5948_s16 }
 0x41b   : > { %5008 = vst.msk [vmem:[#allocation4 + $0x28] sm:$0xf] %vm2748_vm2, %v5002_v62  ;;  %5023 = vrot.lane.b32.xlu0 %v5010_v26, %s5947_s15 }
 0x41e   : > { %5025 = vrot.lane.b32.xlu1 %v8083_v40, %s5947_s15  ;;  %v5012_v1 = vld [vmem:[#allocation4 + $0x18] sm:$0xff] }
 0x41f   : > { %5050 = vrot.lane.b32.xlu0 %v5010_v26, %s5946_s14 }
 0x421   : > { %v5013_v47 = vld [vmem:[#allocation4 + $0x20] sm:$0xf] }
 0x422   : > { %5052 = vrot.lane.b32.xlu1 %v8083_v40, %s5946_s14  ;;  %v5014_v31 = vld [vmem:[#allocation4 + $0x28] sm:$0xf] }
 0x423   : > { %5077 = vrot.lane.b32.xlu0 %v5010_v26, %s5948_s16 }
 0x426   : > { %5079 = vrot.lane.b32.xlu1 %v8083_v40, %s5948_s16 }
 0x427   : > { %5027 = vrot.lane.b32.xlu0 %v5012_v1, %s5947_s15 }
 0x42a   : > { %5029 = vrot.lane.b32.xlu1 %v5013_v47, %s5947_s15 }
 0x42b   : > { %5054 = vrot.lane.b32.xlu0 %v5012_v1, %s5946_s14 }
 0x42e   : > { %5056 = vrot.lane.b32.xlu1 %v5013_v47, %s5946_s14 }
 0x42f   : > { %5081 = vrot.lane.b32.xlu0 %v5012_v1, %s5948_s16 }
 0x432   : > { %5083 = vrot.lane.b32.xlu1 %v5013_v47, %s5948_s16 }
 0x433   : > { %5031 = vrot.lane.b32.xlu0 %v5014_v31, %s5947_s15 }
 0x437   : > { %5058 = vrot.lane.b32.xlu0 %v5014_v31, %s5946_s14  ;;  %s8113_s14 = scalar_lea.vmem %s8140_s5, %s5890_s6 }
 0x43b   : > { %5085 = vrot.lane.b32.xlu0 %v5014_v31, %s5948_s16 }
 0x484   : > { %v5022_v16 = vpop.permute.xlu1 %5021 }
 0x488   : > { %v5049_v27 = vpop.permute.xlu1 %5048 }
 0x48c   : > { %v5076_v2 = vpop.permute.xlu1 %5075 }
 0x48d   : > { %v5024_v15 = vpop.permute.xlu0 %5023 }
 0x48e   : > { %v5033_v35 = vsel %vm2737_vm13, %v5022_v16, %v5024_v15  ;;  %v5043_v44 = vmax.f32 %v5010_v26, %v5024_v15 }
 0x48f   : > { %v5042_v6 = vmax.f32 %v4997_v38, %v5033_v35 }
 0x490   : > { %v5026_v45 = vpop.permute.xlu1 %5025 }
 0x491   : > { %v5051_v8 = vpop.permute.xlu0 %5050 }
 0x492   : > { %v5060_v24 = vsel %vm8706_vm15, %v5049_v27, %v5051_v8  ;;  %v5070_v23 = vmax.f32 %v5043_v44, %v5051_v8 }
 0x493   : > { %v5069_v19 = vmax.f32 %v5042_v6, %v5060_v24 }
 0x494   : > { %v5053_v48 = vpop.permute.xlu1 %5052 }
 0x495   : > { %v5078_v20 = vpop.permute.xlu0 %5077 }
 0x496   : > { %v5087_v34 = vsel %vm8707_vm6, %v5076_v2, %v5078_v20  ;;  %v5097_v18 = vmax.f32 %v5070_v23, %v5078_v20 }
 0x497   : > { %v5096_v46 = vmax.f32 %v5069_v19, %v5087_v34 }
 0x498   : > { %5103 = vst.msk [vmem:[%s8113_s14 + $0x8] sm:$0xff] %vm8708_vm0, %v5097_v18  ;;  %v5080_v39 = vpop.permute.xlu1 %5079 }
 0x499   : > { %5102 = vst [vmem:[%s8113_s14] sm:$0xff] %v5096_v46  ;;  %v5028_v28 = vpop.permute.xlu0 %5027 }
 0x49a   : > { %v5034_v22 = vsel %vm2737_vm13, %v5026_v45, %v5028_v28  ;;  %v5045_v10 = vmax.f32 %v5012_v1, %v5028_v28 }
 0x49b   : > { %v5044_v56 = vmax.f32 %v8083_v40, %v5034_v22 }
 0x49c   : > { %v5030_v32 = vpop.permute.xlu1 %5029 }
 0x49d   : > { %v5055_v13 = vpop.permute.xlu0 %5054 }
 0x49e   : > { %v5061_v54 = vsel %vm8709_vm3, %v5053_v48, %v5055_v13  ;;  %v5072_v43 = vmax.f32 %v5045_v10, %v5055_v13 }
 0x49f   : > { %v5071_v30 = vmax.f32 %v5044_v56, %v5061_v54 }
 0x4a0   : > { %v5057_v55 = vpop.permute.xlu1 %5056 }
 0x4a1   : > { %v5082_v57 = vpop.permute.xlu0 %5081 }
 0x4a2   : > { %v5088_v4 = vsel %vm8710_vm4, %v5080_v39, %v5082_v57  ;;  %v5099_v53 = vmax.f32 %v5072_v43, %v5082_v57 }
 0x4a3   : > { %v5098_v25 = vmax.f32 %v5071_v30, %v5088_v4 }
 0x4a4   : > { %5105 = vst.msk [vmem:[%s8113_s14 + $0x18] sm:$0xff] %vm8711_vm8, %v5099_v53  ;;  %v5084_v52 = vpop.permute.xlu1 %5083 }
 0x4a5   : > { %5104 = vst [vmem:[%s8113_s14 + $0x10] sm:$0xff] %v5098_v25  ;;  %v5032_v49 = vpop.permute.xlu0 %5031 }
 0x4a6   : > { %v5035_v36 = vsel %vm2737_vm13, %v5030_v32, %v5032_v49  ;;  %v5047_v37 = vmax.f32 %v5014_v31, %v5032_v49 }
 0x4a7   : > { %v5046_v3 = vmax.f32 %v5013_v47, %v5035_v36 }
 0x4a9   : > { %v5059_v61 = vpop.permute.xlu0 %5058 }
 0x4aa   : > { %v5062_v50 = vsel %vm8712_vm7, %v5057_v55, %v5059_v61  ;;  %v5074_v29 = vmax.f32 %v5047_v37, %v5059_v61 }
 0x4ab   : > { %v5073_v38 = vmax.f32 %v5046_v3, %v5062_v50 }
 0x4ad   : > { %v5086_v0 = vpop.permute.xlu0 %5085 }
 0x4ae   : > { %v5089_v14 = vsel %vm8713_vm10, %v5084_v52, %v5086_v0  ;;  %v5101_v41 = vmax.f32 %v5074_v29, %v5086_v0 }
 0x4af   : > { %v5100_v21 = vmax.f32 %v5073_v38, %v5089_v14 }
 0x4b0   : > { %5107 = vst.msk [vmem:[%s8113_s14 + $0x28] sm:$0xf] %vm2748_vm2, %v5101_v41 }
 0x4b1   : > { %5106 = vst [vmem:[%s8113_s14 + $0x20] sm:$0xf] %v5100_v21 }
 0x4b2 PF: > { %s15_s18 = sadd.s32 1, %s5935_s18  }
 0x4b3   : > { %p12_p4 = scmp.ge.s32.totalorder %s15_s18, 4  }
 0x4b5   :  { %14 = sbr.rel (!%p12_p4) target bundleno = 1 (0x1), region = 73 }

</bundles_post_ra>
